<compile_context>
chip_gen: v7x
topology: tpu7x:2x2x1
jax: 0.10.0
libtpu: 0.0.40
codegen_flags: <defaults>
</compile_context>

<pallas_src>
import functools

import jax
import jax.numpy as jnp
from jax import lax
from jax.experimental import pallas as pl
from jax.experimental.pallas import tpu as pltpu


# ----------------------------------------------------------------------------
# In-kernel GRU step (PyTorch GRU / GRUCell equations, gate order r, z, n).
# Weights are pre-transposed and gate-stacked: wih [in_dim, 3H], whh [H, 3H],
# biases [1, 3H].
# ----------------------------------------------------------------------------
def _gru_step(x, h, wih_ref, whh_ref, bih_ref, bhh_ref):
    H = whh_ref.shape[0]
    gi = jnp.dot(x, wih_ref[...], preferred_element_type=jnp.float32) + bih_ref[...]
    gh = jnp.dot(h, whh_ref[...], preferred_element_type=jnp.float32) + bhh_ref[...]
    rz = jax.nn.sigmoid(gi[:, :2 * H] + gh[:, :2 * H])
    r = rz[:, :H]
    z = rz[:, H:]
    n = jnp.tanh(gi[:, 2 * H:] + r * gh[:, 2 * H:])
    return n + z * (h - n)          # == (1 - z) * n + z * h


# ----------------------------------------------------------------------------
# Single fused kernel: encoder recurrence -> last-state select -> dec_start
# linear -> decoder recurrence + logits. No grid; time loops are in-kernel
# fori_loops (fully unrolled at these tiny trip counts).
# ----------------------------------------------------------------------------
def seq2seq_kernel(xe_ref, xd_ref, len_ref,
                   e_wih_ref, e_whh_ref, e_bih_ref, e_bhh_ref,
                   wds_ref, bds_ref,
                   d_wih_ref, d_whh_ref, d_bih_ref, d_bhh_ref,
                   wlog_ref, blog_ref,
                   out_ref):
    T, B, _ = xe_ref.shape
    Tm1 = xd_ref.shape[0]
    H = e_whh_ref.shape[0]

    lengths = len_ref[...]                          # [B, 1] int32

    # ---- encoder recurrence; keep the state at t == lengths[b] -------------
    def enc_body(t, carry):
        h, last = carry
        h = _gru_step(xe_ref[t], h, e_wih_ref, e_whh_ref, e_bih_ref, e_bhh_ref)
        last = jnp.where(lengths == t, h, last)
        return h, last

    zeros = jnp.zeros((B, H), jnp.float32)
    _, last = lax.fori_loop(0, T, enc_body, (zeros, zeros), unroll=True)

    # ---- dec_start linear ---------------------------------------------------
    h0 = (jnp.dot(last, wds_ref[...], preferred_element_type=jnp.float32)
          + bds_ref[...])

    # ---- decoder recurrence + logits (lane-dense Vpad-wide stores) ----------
    def dec_body(i, h):
        h = _gru_step(xd_ref[i], h, d_wih_ref, d_whh_ref, d_bih_ref, d_bhh_ref)
        out_ref[i] = (jnp.dot(h, wlog_ref[...],
                              preferred_element_type=jnp.float32)
                      + blog_ref[...]).astype(out_ref.dtype)
        return h

    lax.fori_loop(0, Tm1, dec_body, h0, unroll=True)


def run_seq2seq(xe, xd, lengths_col,
                e_wih, e_whh, e_bih, e_bhh,
                wds, bds,
                d_wih, d_whh, d_bih, d_bhh,
                wlog_pad, blog_pad):
    Tm1, B, _ = xd.shape
    Vpad = wlog_pad.shape[-1]
    # No grid: every operand is a single whole-array block resident in VMEM
    # (everything here is far below the VMEM budget on v5e/v6e/v7x).
    vmem = pl.BlockSpec(memory_space=pltpu.MemorySpace.VMEM)
    return pl.pallas_call(
        seq2seq_kernel,
        out_shape=jax.ShapeDtypeStruct((Tm1, B, Vpad), jnp.float32),
        in_specs=[vmem] * 15,
        out_specs=vmem,
    )(xe, xd, lengths_col,
      e_wih, e_whh, e_bih, e_bhh,
      wds, bds,
      d_wih, d_whh, d_bih, d_bhh,
      wlog_pad, blog_pad)


# ----------------------------------------------------------------------------
# Parameters (deterministic synthetic init) with the fused [in, 3H] layout.
# ----------------------------------------------------------------------------
def init_params(key, inp_voc_size, out_voc_size, emb_size, hid_size):
    ks = jax.random.split(key, 14)
    u = lambda k, shape, s=0.1: jax.random.uniform(
        k, shape, jnp.float32, minval=-s, maxval=s)
    H = hid_size
    return dict(
        emb_inp=u(ks[0], (inp_voc_size, emb_size)),
        emb_out=u(ks[1], (out_voc_size, emb_size)),
        # GRU weights pre-transposed + gate-stacked (r, z, n) along last axis.
        enc_wih=u(ks[2], (emb_size, 3 * H)),
        enc_whh=u(ks[3], (H, 3 * H)),
        enc_bih=u(ks[4], (1, 3 * H)),
        enc_bhh=u(ks[5], (1, 3 * H)),
        dec_start_w=u(ks[6], (H, H)),
        dec_start_b=u(ks[7], (1, H)),
        dec_wih=u(ks[8], (emb_size, 3 * H)),
        dec_whh=u(ks[9], (H, 3 * H)),
        dec_bih=u(ks[10], (1, 3 * H)),
        dec_bhh=u(ks[11], (1, 3 * H)),
        logits_w=u(ks[12], (H, out_voc_size)),
        logits_b=u(ks[13], (1, out_voc_size)),
    )


# ----------------------------------------------------------------------------
# Full forward pass (matches BasicModel.forward = encode + decode).
# ----------------------------------------------------------------------------
def forward(params, inp, out_tokens, *, inp_eos_ix, out_bos_ix, out_voc_size):
    B, T_in = inp.shape
    Tm1 = out_tokens.shape[1] - 1
    V = out_voc_size
    Vpad = pl.cdiv(V, 128) * 128

    # Glue: embedding lookups (produced directly time-major) and lengths.
    xe = jnp.take(params["emb_inp"], inp.T, axis=0)                   # [T,B,E]
    xd = jnp.take(params["emb_out"], out_tokens[:, :Tm1].T, axis=0)   # [Tm1,B,E]
    lengths = jnp.minimum(
        (inp != inp_eos_ix).astype(jnp.int32).sum(axis=1), T_in - 1)
    lengths_col = lengths[:, None].astype(jnp.int32)                  # [B,1]

    # Lane-dense logits: pad V up to a multiple of 128, slice back afterwards.
    wlog = jnp.pad(params["logits_w"], ((0, 0), (0, Vpad - V)))
    blog = jnp.pad(params["logits_b"], ((0, 0), (0, Vpad - V)))

    logits_tbv = run_seq2seq(
        xe, xd, lengths_col,
        params["enc_wih"], params["enc_whh"], params["enc_bih"], params["enc_bhh"],
        params["dec_start_w"], params["dec_start_b"],
        params["dec_wih"], params["dec_whh"], params["dec_bih"], params["dec_bhh"],
        wlog, blog)                                                   # [Tm1,B,Vpad]
    logits_btv = jnp.transpose(logits_tbv[:, :, :V], (1, 0, 2))       # [B,Tm1,V]

    onehot_bos = jax.nn.one_hot(
        jnp.full((B,), out_bos_ix, jnp.int32), V, dtype=jnp.float32)
    first_logits = jnp.log(onehot_bos + 1e-9)                         # [B,V]
    return jnp.concatenate([first_logits[:, None, :], logits_btv], axis=1)


# ----------------------------------------------------------------------------
# Pure-JAX reference (mirrors the PyTorch forward) for a correctness check.
# ----------------------------------------------------------------------------
def reference_forward(params, inp, out_tokens, *, inp_eos_ix, out_bos_ix,
                      out_voc_size):
    H = params["enc_whh"].shape[0]

    def gru(x, h, wih, whh, bih, bhh):
        gi = x @ wih + bih
        gh = h @ whh + bhh
        r = jax.nn.sigmoid(gi[:, :H] + gh[:, :H])
        z = jax.nn.sigmoid(gi[:, H:2 * H] + gh[:, H:2 * H])
        n = jnp.tanh(gi[:, 2 * H:] + r * gh[:, 2 * H:])
        return (1.0 - z) * n + z * h

    B, T_in = inp.shape
    inp_emb = params["emb_inp"][inp]                                  # [B,T,E]
    h = jnp.zeros((B, H), jnp.float32)
    enc = []
    for t in range(T_in):
        h = gru(inp_emb[:, t], h, params["enc_wih"], params["enc_whh"],
                params["enc_bih"], params["enc_bhh"])
        enc.append(h)
    enc_seq = jnp.stack(enc, axis=1)                                  # [B,T,H]
    lengths = jnp.minimum(
        (inp != inp_eos_ix).astype(jnp.int32).sum(axis=1), T_in - 1)
    last = enc_seq[jnp.arange(B), lengths]
    h = last @ params["dec_start_w"] + params["dec_start_b"]

    onehot_bos = jax.nn.one_hot(
        jnp.full((B,), out_bos_ix, jnp.int32), out_voc_size, dtype=jnp.float32)
    logits_seq = [jnp.log(onehot_bos + 1e-9)]
    for i in range(out_tokens.shape[1] - 1):
        x = params["emb_out"][out_tokens[:, i]]
        h = gru(x, h, params["dec_wih"], params["dec_whh"],
                params["dec_bih"], params["dec_bhh"])
        logits_seq.append(h @ params["logits_w"] + params["logits_b"])
    return jnp.stack(logits_seq, axis=1)


# ----------------------------------------------------------------------------
if __name__ == "__main__":
    INP_VOC, OUT_VOC = 11, 13          # len(inp_voc), len(out_voc)
    EOS_IX, BOS_IX = 2, 1
    EMB, HID = 64, 128                 # module defaults (H lane-dense)
    B, T_IN, T_OUT = 2, 8, 6

    key = jax.random.PRNGKey(0)
    k_par, k_inp, k_out = jax.random.split(key, 3)
    params = init_params(k_par, INP_VOC, OUT_VOC, EMB, HID)

    inp = jax.random.randint(k_inp, (B, T_IN), 0, INP_VOC, dtype=jnp.int32)
    out_tokens = jax.random.randint(k_out, (B, T_OUT), 0, OUT_VOC,
                                    dtype=jnp.int32)

    fwd = jax.jit(functools.partial(
        forward, inp_eos_ix=EOS_IX, out_bos_ix=BOS_IX, out_voc_size=OUT_VOC))
    result = jax.block_until_ready(fwd(params, inp, out_tokens))
    assert result.shape == (B, T_OUT, OUT_VOC), result.shape

    ref = jax.block_until_ready(reference_forward(
        params, inp, out_tokens, inp_eos_ix=EOS_IX, out_bos_ix=BOS_IX,
        out_voc_size=OUT_VOC))
    assert jnp.allclose(result, ref, rtol=2e-3, atol=2e-3), (
        float(jnp.max(jnp.abs(result - ref))))

    print("KERNEL_OK")
</pallas_src>

<mosaic_0001>
module attributes {stable_mosaic.version = 11 : i64} {
  func.func @seq2seq_kernel(%arg0: memref<8x2x64xf32, #tpu.memory_space<vmem>>, %arg1: memref<5x2x64xf32, #tpu.memory_space<vmem>>, %arg2: memref<2x1xi32, #tpu.memory_space<vmem>>, %arg3: memref<64x384xf32, #tpu.memory_space<vmem>>, %arg4: memref<128x384xf32, #tpu.memory_space<vmem>>, %arg5: memref<1x384xf32, #tpu.memory_space<vmem>>, %arg6: memref<1x384xf32, #tpu.memory_space<vmem>>, %arg7: memref<128x128xf32, #tpu.memory_space<vmem>>, %arg8: memref<1x128xf32, #tpu.memory_space<vmem>>, %arg9: memref<64x384xf32, #tpu.memory_space<vmem>>, %arg10: memref<128x384xf32, #tpu.memory_space<vmem>>, %arg11: memref<1x384xf32, #tpu.memory_space<vmem>>, %arg12: memref<1x384xf32, #tpu.memory_space<vmem>>, %arg13: memref<128x128xf32, #tpu.memory_space<vmem>>, %arg14: memref<1x128xf32, #tpu.memory_space<vmem>>, %arg15: memref<5x2x128xf32, #tpu.memory_space<vmem>>) attributes {dimension_semantics = [], scalar_prefetch = 0 : i64, scratch_operands = 0 : i64, tpu.core_type = #tpu.core_type<tc>} {
    %c0 = arith.constant 0 : index
    %c0_0 = arith.constant 0 : index
    %0 = vector.load %arg2[%c0, %c0_0] : memref<2x1xi32, #tpu.memory_space<vmem>>, vector<2x1xi32>
    %cst = arith.constant 0.000000e+00 : f32
    %1 = vector.broadcast %cst : f32 to vector<2x128xf32>
    %c0_i32 = arith.constant 0 : i32
    %2 = arith.index_cast %c0_i32 : i32 to index
    %c0_1 = arith.constant 0 : index
    %c0_2 = arith.constant 0 : index
    %3 = vector.load %arg0[%2, %c0_1, %c0_2] : memref<8x2x64xf32, #tpu.memory_space<vmem>>, vector<1x2x64xf32>
    %4 = vector.shape_cast %3 : vector<1x2x64xf32> to vector<2x64xf32>
    %c0_3 = arith.constant 0 : index
    %c0_4 = arith.constant 0 : index
    %5 = vector.load %arg3[%c0_3, %c0_4] : memref<64x384xf32, #tpu.memory_space<vmem>>, vector<64x384xf32>
    %cst_5 = arith.constant dense<0.000000e+00> : vector<2x384xf32>
    %6 = tpu.matmul %4, %5, %cst_5 {dimension_numbers = #tpu.dot_dimension_numbers<[1], [0], [0], [1], [0, 0, 1, 1], [], []>} : vector<2x64xf32>, vector<64x384xf32>, vector<2x384xf32> -> vector<2x384xf32>
    %c0_6 = arith.constant 0 : index
    %c0_7 = arith.constant 0 : index
    %7 = vector.load %arg5[%c0_6, %c0_7] : memref<1x384xf32, #tpu.memory_space<vmem>>, vector<1x384xf32>
    %8 = vector.broadcast %7 : vector<1x384xf32> to vector<2x384xf32>
    %9 = arith.addf %6, %8 : vector<2x384xf32>
    %c0_8 = arith.constant 0 : index
    %c0_9 = arith.constant 0 : index
    %10 = vector.load %arg4[%c0_8, %c0_9] : memref<128x384xf32, #tpu.memory_space<vmem>>, vector<128x384xf32>
    %cst_10 = arith.constant dense<0.000000e+00> : vector<2x384xf32>
    %11 = tpu.matmul %1, %10, %cst_10 {dimension_numbers = #tpu.dot_dimension_numbers<[1], [0], [0], [1], [0, 0, 1, 1], [], []>} : vector<2x128xf32>, vector<128x384xf32>, vector<2x384xf32> -> vector<2x384xf32>
    %c0_11 = arith.constant 0 : index
    %c0_12 = arith.constant 0 : index
    %12 = vector.load %arg6[%c0_11, %c0_12] : memref<1x384xf32, #tpu.memory_space<vmem>>, vector<1x384xf32>
    %13 = vector.broadcast %12 : vector<1x384xf32> to vector<2x384xf32>
    %14 = arith.addf %11, %13 : vector<2x384xf32>
    %15 = vector.extract_strided_slice %9 {offsets = [0, 0], sizes = [2, 256], strides = [1, 1]} : vector<2x384xf32> to vector<2x256xf32>
    %16 = vector.extract_strided_slice %14 {offsets = [0, 0], sizes = [2, 256], strides = [1, 1]} : vector<2x384xf32> to vector<2x256xf32>
    %17 = arith.addf %15, %16 : vector<2x256xf32>
    %18 = arith.negf %17 : vector<2x256xf32>
    %19 = math.exp %18 : vector<2x256xf32>
    %cst_13 = arith.constant 1.000000e+00 : f32
    %20 = vector.broadcast %cst_13 : f32 to vector<2x256xf32>
    %21 = arith.addf %20, %19 : vector<2x256xf32>
    %22 = arith.divf %20, %21 : vector<2x256xf32>
    %23 = vector.extract_strided_slice %22 {offsets = [0, 0], sizes = [2, 128], strides = [1, 1]} : vector<2x256xf32> to vector<2x128xf32>
    %24 = vector.extract_strided_slice %22 {offsets = [0, 128], sizes = [2, 128], strides = [1, 1]} : vector<2x256xf32> to vector<2x128xf32>
    %25 = vector.extract_strided_slice %9 {offsets = [0, 256], sizes = [2, 128], strides = [1, 1]} : vector<2x384xf32> to vector<2x128xf32>
    %26 = vector.extract_strided_slice %14 {offsets = [0, 256], sizes = [2, 128], strides = [1, 1]} : vector<2x384xf32> to vector<2x128xf32>
    %27 = arith.mulf %23, %26 : vector<2x128xf32>
    %28 = arith.addf %25, %27 : vector<2x128xf32>
    %29 = math.tanh %28 : vector<2x128xf32>
    %30 = arith.subf %1, %29 : vector<2x128xf32>
    %31 = arith.mulf %24, %30 : vector<2x128xf32>
    %32 = arith.addf %29, %31 : vector<2x128xf32>
    %33 = vector.broadcast %c0_i32 : i32 to vector<2x1xi32>
    %34 = arith.cmpi eq, %0, %33 : vector<2x1xi32>
    %35 = vector.shape_cast %34 : vector<2x1xi1> to vector<2x1xi1>
    %36 = vector.broadcast %35 : vector<2x1xi1> to vector<2x128xi1>
    %37 = arith.select %36, %32, %1 : vector<2x128xi1>, vector<2x128xf32>
    %c1_i32 = arith.constant 1 : i32
    %38 = arith.index_cast %c1_i32 : i32 to index
    %c0_14 = arith.constant 0 : index
    %c0_15 = arith.constant 0 : index
    %39 = vector.load %arg0[%38, %c0_14, %c0_15] : memref<8x2x64xf32, #tpu.memory_space<vmem>>, vector<1x2x64xf32>
    %40 = vector.shape_cast %39 : vector<1x2x64xf32> to vector<2x64xf32>
    %c0_16 = arith.constant 0 : index
    %c0_17 = arith.constant 0 : index
    %41 = vector.load %arg3[%c0_16, %c0_17] : memref<64x384xf32, #tpu.memory_space<vmem>>, vector<64x384xf32>
    %cst_18 = arith.constant dense<0.000000e+00> : vector<2x384xf32>
    %42 = tpu.matmul %40, %41, %cst_18 {dimension_numbers = #tpu.dot_dimension_numbers<[1], [0], [0], [1], [0, 0, 1, 1], [], []>} : vector<2x64xf32>, vector<64x384xf32>, vector<2x384xf32> -> vector<2x384xf32>
    %c0_19 = arith.constant 0 : index
    %c0_20 = arith.constant 0 : index
    %43 = vector.load %arg5[%c0_19, %c0_20] : memref<1x384xf32, #tpu.memory_space<vmem>>, vector<1x384xf32>
    %44 = vector.broadcast %43 : vector<1x384xf32> to vector<2x384xf32>
    %45 = arith.addf %42, %44 : vector<2x384xf32>
    %c0_21 = arith.constant 0 : index
    %c0_22 = arith.constant 0 : index
    %46 = vector.load %arg4[%c0_21, %c0_22] : memref<128x384xf32, #tpu.memory_space<vmem>>, vector<128x384xf32>
    %cst_23 = arith.constant dense<0.000000e+00> : vector<2x384xf32>
    %47 = tpu.matmul %32, %46, %cst_23 {dimension_numbers = #tpu.dot_dimension_numbers<[1], [0], [0], [1], [0, 0, 1, 1], [], []>} : vector<2x128xf32>, vector<128x384xf32>, vector<2x384xf32> -> vector<2x384xf32>
    %c0_24 = arith.constant 0 : index
    %c0_25 = arith.constant 0 : index
    %48 = vector.load %arg6[%c0_24, %c0_25] : memref<1x384xf32, #tpu.memory_space<vmem>>, vector<1x384xf32>
    %49 = vector.broadcast %48 : vector<1x384xf32> to vector<2x384xf32>
    %50 = arith.addf %47, %49 : vector<2x384xf32>
    %51 = vector.extract_strided_slice %45 {offsets = [0, 0], sizes = [2, 256], strides = [1, 1]} : vector<2x384xf32> to vector<2x256xf32>
    %52 = vector.extract_strided_slice %50 {offsets = [0, 0], sizes = [2, 256], strides = [1, 1]} : vector<2x384xf32> to vector<2x256xf32>
    %53 = arith.addf %51, %52 : vector<2x256xf32>
    %54 = arith.negf %53 : vector<2x256xf32>
    %55 = math.exp %54 : vector<2x256xf32>
    %cst_26 = arith.constant 1.000000e+00 : f32
    %56 = vector.broadcast %cst_26 : f32 to vector<2x256xf32>
    %57 = arith.addf %56, %55 : vector<2x256xf32>
    %58 = arith.divf %56, %57 : vector<2x256xf32>
    %59 = vector.extract_strided_slice %58 {offsets = [0, 0], sizes = [2, 128], strides = [1, 1]} : vector<2x256xf32> to vector<2x128xf32>
    %60 = vector.extract_strided_slice %58 {offsets = [0, 128], sizes = [2, 128], strides = [1, 1]} : vector<2x256xf32> to vector<2x128xf32>
    %61 = vector.extract_strided_slice %45 {offsets = [0, 256], sizes = [2, 128], strides = [1, 1]} : vector<2x384xf32> to vector<2x128xf32>
    %62 = vector.extract_strided_slice %50 {offsets = [0, 256], sizes = [2, 128], strides = [1, 1]} : vector<2x384xf32> to vector<2x128xf32>
    %63 = arith.mulf %59, %62 : vector<2x128xf32>
    %64 = arith.addf %61, %63 : vector<2x128xf32>
    %65 = math.tanh %64 : vector<2x128xf32>
    %66 = arith.subf %32, %65 : vector<2x128xf32>
    %67 = arith.mulf %60, %66 : vector<2x128xf32>
    %68 = arith.addf %65, %67 : vector<2x128xf32>
    %69 = vector.broadcast %c1_i32 : i32 to vector<2x1xi32>
    %70 = arith.cmpi eq, %0, %69 : vector<2x1xi32>
    %71 = vector.shape_cast %70 : vector<2x1xi1> to vector<2x1xi1>
    %72 = vector.broadcast %71 : vector<2x1xi1> to vector<2x128xi1>
    %73 = arith.select %72, %68, %37 : vector<2x128xi1>, vector<2x128xf32>
    %c2_i32 = arith.constant 2 : i32
    %74 = arith.index_cast %c2_i32 : i32 to index
    %c0_27 = arith.constant 0 : index
    %c0_28 = arith.constant 0 : index
    %75 = vector.load %arg0[%74, %c0_27, %c0_28] : memref<8x2x64xf32, #tpu.memory_space<vmem>>, vector<1x2x64xf32>
    %76 = vector.shape_cast %75 : vector<1x2x64xf32> to vector<2x64xf32>
    %c0_29 = arith.constant 0 : index
    %c0_30 = arith.constant 0 : index
    %77 = vector.load %arg3[%c0_29, %c0_30] : memref<64x384xf32, #tpu.memory_space<vmem>>, vector<64x384xf32>
    %cst_31 = arith.constant dense<0.000000e+00> : vector<2x384xf32>
    %78 = tpu.matmul %76, %77, %cst_31 {dimension_numbers = #tpu.dot_dimension_numbers<[1], [0], [0], [1], [0, 0, 1, 1], [], []>} : vector<2x64xf32>, vector<64x384xf32>, vector<2x384xf32> -> vector<2x384xf32>
    %c0_32 = arith.constant 0 : index
    %c0_33 = arith.constant 0 : index
    %79 = vector.load %arg5[%c0_32, %c0_33] : memref<1x384xf32, #tpu.memory_space<vmem>>, vector<1x384xf32>
    %80 = vector.broadcast %79 : vector<1x384xf32> to vector<2x384xf32>
    %81 = arith.addf %78, %80 : vector<2x384xf32>
    %c0_34 = arith.constant 0 : index
    %c0_35 = arith.constant 0 : index
    %82 = vector.load %arg4[%c0_34, %c0_35] : memref<128x384xf32, #tpu.memory_space<vmem>>, vector<128x384xf32>
    %cst_36 = arith.constant dense<0.000000e+00> : vector<2x384xf32>
    %83 = tpu.matmul %68, %82, %cst_36 {dimension_numbers = #tpu.dot_dimension_numbers<[1], [0], [0], [1], [0, 0, 1, 1], [], []>} : vector<2x128xf32>, vector<128x384xf32>, vector<2x384xf32> -> vector<2x384xf32>
    %c0_37 = arith.constant 0 : index
    %c0_38 = arith.constant 0 : index
    %84 = vector.load %arg6[%c0_37, %c0_38] : memref<1x384xf32, #tpu.memory_space<vmem>>, vector<1x384xf32>
    %85 = vector.broadcast %84 : vector<1x384xf32> to vector<2x384xf32>
    %86 = arith.addf %83, %85 : vector<2x384xf32>
    %87 = vector.extract_strided_slice %81 {offsets = [0, 0], sizes = [2, 256], strides = [1, 1]} : vector<2x384xf32> to vector<2x256xf32>
    %88 = vector.extract_strided_slice %86 {offsets = [0, 0], sizes = [2, 256], strides = [1, 1]} : vector<2x384xf32> to vector<2x256xf32>
    %89 = arith.addf %87, %88 : vector<2x256xf32>
    %90 = arith.negf %89 : vector<2x256xf32>
    %91 = math.exp %90 : vector<2x256xf32>
    %cst_39 = arith.constant 1.000000e+00 : f32
    %92 = vector.broadcast %cst_39 : f32 to vector<2x256xf32>
    %93 = arith.addf %92, %91 : vector<2x256xf32>
    %94 = arith.divf %92, %93 : vector<2x256xf32>
    %95 = vector.extract_strided_slice %94 {offsets = [0, 0], sizes = [2, 128], strides = [1, 1]} : vector<2x256xf32> to vector<2x128xf32>
    %96 = vector.extract_strided_slice %94 {offsets = [0, 128], sizes = [2, 128], strides = [1, 1]} : vector<2x256xf32> to vector<2x128xf32>
    %97 = vector.extract_strided_slice %81 {offsets = [0, 256], sizes = [2, 128], strides = [1, 1]} : vector<2x384xf32> to vector<2x128xf32>
    %98 = vector.extract_strided_slice %86 {offsets = [0, 256], sizes = [2, 128], strides = [1, 1]} : vector<2x384xf32> to vector<2x128xf32>
    %99 = arith.mulf %95, %98 : vector<2x128xf32>
    %100 = arith.addf %97, %99 : vector<2x128xf32>
    %101 = math.tanh %100 : vector<2x128xf32>
    %102 = arith.subf %68, %101 : vector<2x128xf32>
    %103 = arith.mulf %96, %102 : vector<2x128xf32>
    %104 = arith.addf %101, %103 : vector<2x128xf32>
    %105 = vector.broadcast %c2_i32 : i32 to vector<2x1xi32>
    %106 = arith.cmpi eq, %0, %105 : vector<2x1xi32>
    %107 = vector.shape_cast %106 : vector<2x1xi1> to vector<2x1xi1>
    %108 = vector.broadcast %107 : vector<2x1xi1> to vector<2x128xi1>
    %109 = arith.select %108, %104, %73 : vector<2x128xi1>, vector<2x128xf32>
    %c3_i32 = arith.constant 3 : i32
    %110 = arith.index_cast %c3_i32 : i32 to index
    %c0_40 = arith.constant 0 : index
    %c0_41 = arith.constant 0 : index
    %111 = vector.load %arg0[%110, %c0_40, %c0_41] : memref<8x2x64xf32, #tpu.memory_space<vmem>>, vector<1x2x64xf32>
    %112 = vector.shape_cast %111 : vector<1x2x64xf32> to vector<2x64xf32>
    %c0_42 = arith.constant 0 : index
    %c0_43 = arith.constant 0 : index
    %113 = vector.load %arg3[%c0_42, %c0_43] : memref<64x384xf32, #tpu.memory_space<vmem>>, vector<64x384xf32>
    %cst_44 = arith.constant dense<0.000000e+00> : vector<2x384xf32>
    %114 = tpu.matmul %112, %113, %cst_44 {dimension_numbers = #tpu.dot_dimension_numbers<[1], [0], [0], [1], [0, 0, 1, 1], [], []>} : vector<2x64xf32>, vector<64x384xf32>, vector<2x384xf32> -> vector<2x384xf32>
    %c0_45 = arith.constant 0 : index
    %c0_46 = arith.constant 0 : index
    %115 = vector.load %arg5[%c0_45, %c0_46] : memref<1x384xf32, #tpu.memory_space<vmem>>, vector<1x384xf32>
    %116 = vector.broadcast %115 : vector<1x384xf32> to vector<2x384xf32>
    %117 = arith.addf %114, %116 : vector<2x384xf32>
    %c0_47 = arith.constant 0 : index
    %c0_48 = arith.constant 0 : index
    %118 = vector.load %arg4[%c0_47, %c0_48] : memref<128x384xf32, #tpu.memory_space<vmem>>, vector<128x384xf32>
    %cst_49 = arith.constant dense<0.000000e+00> : vector<2x384xf32>
    %119 = tpu.matmul %104, %118, %cst_49 {dimension_numbers = #tpu.dot_dimension_numbers<[1], [0], [0], [1], [0, 0, 1, 1], [], []>} : vector<2x128xf32>, vector<128x384xf32>, vector<2x384xf32> -> vector<2x384xf32>
    %c0_50 = arith.constant 0 : index
    %c0_51 = arith.constant 0 : index
    %120 = vector.load %arg6[%c0_50, %c0_51] : memref<1x384xf32, #tpu.memory_space<vmem>>, vector<1x384xf32>
    %121 = vector.broadcast %120 : vector<1x384xf32> to vector<2x384xf32>
    %122 = arith.addf %119, %121 : vector<2x384xf32>
    %123 = vector.extract_strided_slice %117 {offsets = [0, 0], sizes = [2, 256], strides = [1, 1]} : vector<2x384xf32> to vector<2x256xf32>
    %124 = vector.extract_strided_slice %122 {offsets = [0, 0], sizes = [2, 256], strides = [1, 1]} : vector<2x384xf32> to vector<2x256xf32>
    %125 = arith.addf %123, %124 : vector<2x256xf32>
    %126 = arith.negf %125 : vector<2x256xf32>
    %127 = math.exp %126 : vector<2x256xf32>
    %cst_52 = arith.constant 1.000000e+00 : f32
    %128 = vector.broadcast %cst_52 : f32 to vector<2x256xf32>
    %129 = arith.addf %128, %127 : vector<2x256xf32>
    %130 = arith.divf %128, %129 : vector<2x256xf32>
    %131 = vector.extract_strided_slice %130 {offsets = [0, 0], sizes = [2, 128], strides = [1, 1]} : vector<2x256xf32> to vector<2x128xf32>
    %132 = vector.extract_strided_slice %130 {offsets = [0, 128], sizes = [2, 128], strides = [1, 1]} : vector<2x256xf32> to vector<2x128xf32>
    %133 = vector.extract_strided_slice %117 {offsets = [0, 256], sizes = [2, 128], strides = [1, 1]} : vector<2x384xf32> to vector<2x128xf32>
    %134 = vector.extract_strided_slice %122 {offsets = [0, 256], sizes = [2, 128], strides = [1, 1]} : vector<2x384xf32> to vector<2x128xf32>
    %135 = arith.mulf %131, %134 : vector<2x128xf32>
    %136 = arith.addf %133, %135 : vector<2x128xf32>
    %137 = math.tanh %136 : vector<2x128xf32>
    %138 = arith.subf %104, %137 : vector<2x128xf32>
    %139 = arith.mulf %132, %138 : vector<2x128xf32>
    %140 = arith.addf %137, %139 : vector<2x128xf32>
    %141 = vector.broadcast %c3_i32 : i32 to vector<2x1xi32>
    %142 = arith.cmpi eq, %0, %141 : vector<2x1xi32>
    %143 = vector.shape_cast %142 : vector<2x1xi1> to vector<2x1xi1>
    %144 = vector.broadcast %143 : vector<2x1xi1> to vector<2x128xi1>
    %145 = arith.select %144, %140, %109 : vector<2x128xi1>, vector<2x128xf32>
    %c4_i32 = arith.constant 4 : i32
    %146 = arith.index_cast %c4_i32 : i32 to index
    %c0_53 = arith.constant 0 : index
    %c0_54 = arith.constant 0 : index
    %147 = vector.load %arg0[%146, %c0_53, %c0_54] : memref<8x2x64xf32, #tpu.memory_space<vmem>>, vector<1x2x64xf32>
    %148 = vector.shape_cast %147 : vector<1x2x64xf32> to vector<2x64xf32>
    %c0_55 = arith.constant 0 : index
    %c0_56 = arith.constant 0 : index
    %149 = vector.load %arg3[%c0_55, %c0_56] : memref<64x384xf32, #tpu.memory_space<vmem>>, vector<64x384xf32>
    %cst_57 = arith.constant dense<0.000000e+00> : vector<2x384xf32>
    %150 = tpu.matmul %148, %149, %cst_57 {dimension_numbers = #tpu.dot_dimension_numbers<[1], [0], [0], [1], [0, 0, 1, 1], [], []>} : vector<2x64xf32>, vector<64x384xf32>, vector<2x384xf32> -> vector<2x384xf32>
    %c0_58 = arith.constant 0 : index
    %c0_59 = arith.constant 0 : index
    %151 = vector.load %arg5[%c0_58, %c0_59] : memref<1x384xf32, #tpu.memory_space<vmem>>, vector<1x384xf32>
    %152 = vector.broadcast %151 : vector<1x384xf32> to vector<2x384xf32>
    %153 = arith.addf %150, %152 : vector<2x384xf32>
    %c0_60 = arith.constant 0 : index
    %c0_61 = arith.constant 0 : index
    %154 = vector.load %arg4[%c0_60, %c0_61] : memref<128x384xf32, #tpu.memory_space<vmem>>, vector<128x384xf32>
    %cst_62 = arith.constant dense<0.000000e+00> : vector<2x384xf32>
    %155 = tpu.matmul %140, %154, %cst_62 {dimension_numbers = #tpu.dot_dimension_numbers<[1], [0], [0], [1], [0, 0, 1, 1], [], []>} : vector<2x128xf32>, vector<128x384xf32>, vector<2x384xf32> -> vector<2x384xf32>
    %c0_63 = arith.constant 0 : index
    %c0_64 = arith.constant 0 : index
    %156 = vector.load %arg6[%c0_63, %c0_64] : memref<1x384xf32, #tpu.memory_space<vmem>>, vector<1x384xf32>
    %157 = vector.broadcast %156 : vector<1x384xf32> to vector<2x384xf32>
    %158 = arith.addf %155, %157 : vector<2x384xf32>
    %159 = vector.extract_strided_slice %153 {offsets = [0, 0], sizes = [2, 256], strides = [1, 1]} : vector<2x384xf32> to vector<2x256xf32>
    %160 = vector.extract_strided_slice %158 {offsets = [0, 0], sizes = [2, 256], strides = [1, 1]} : vector<2x384xf32> to vector<2x256xf32>
    %161 = arith.addf %159, %160 : vector<2x256xf32>
    %162 = arith.negf %161 : vector<2x256xf32>
    %163 = math.exp %162 : vector<2x256xf32>
    %cst_65 = arith.constant 1.000000e+00 : f32
    %164 = vector.broadcast %cst_65 : f32 to vector<2x256xf32>
    %165 = arith.addf %164, %163 : vector<2x256xf32>
    %166 = arith.divf %164, %165 : vector<2x256xf32>
    %167 = vector.extract_strided_slice %166 {offsets = [0, 0], sizes = [2, 128], strides = [1, 1]} : vector<2x256xf32> to vector<2x128xf32>
    %168 = vector.extract_strided_slice %166 {offsets = [0, 128], sizes = [2, 128], strides = [1, 1]} : vector<2x256xf32> to vector<2x128xf32>
    %169 = vector.extract_strided_slice %153 {offsets = [0, 256], sizes = [2, 128], strides = [1, 1]} : vector<2x384xf32> to vector<2x128xf32>
    %170 = vector.extract_strided_slice %158 {offsets = [0, 256], sizes = [2, 128], strides = [1, 1]} : vector<2x384xf32> to vector<2x128xf32>
    %171 = arith.mulf %167, %170 : vector<2x128xf32>
    %172 = arith.addf %169, %171 : vector<2x128xf32>
    %173 = math.tanh %172 : vector<2x128xf32>
    %174 = arith.subf %140, %173 : vector<2x128xf32>
    %175 = arith.mulf %168, %174 : vector<2x128xf32>
    %176 = arith.addf %173, %175 : vector<2x128xf32>
    %177 = vector.broadcast %c4_i32 : i32 to vector<2x1xi32>
    %178 = arith.cmpi eq, %0, %177 : vector<2x1xi32>
    %179 = vector.shape_cast %178 : vector<2x1xi1> to vector<2x1xi1>
    %180 = vector.broadcast %179 : vector<2x1xi1> to vector<2x128xi1>
    %181 = arith.select %180, %176, %145 : vector<2x128xi1>, vector<2x128xf32>
    %c5_i32 = arith.constant 5 : i32
    %182 = arith.index_cast %c5_i32 : i32 to index
    %c0_66 = arith.constant 0 : index
    %c0_67 = arith.constant 0 : index
    %183 = vector.load %arg0[%182, %c0_66, %c0_67] : memref<8x2x64xf32, #tpu.memory_space<vmem>>, vector<1x2x64xf32>
    %184 = vector.shape_cast %183 : vector<1x2x64xf32> to vector<2x64xf32>
    %c0_68 = arith.constant 0 : index
    %c0_69 = arith.constant 0 : index
    %185 = vector.load %arg3[%c0_68, %c0_69] : memref<64x384xf32, #tpu.memory_space<vmem>>, vector<64x384xf32>
    %cst_70 = arith.constant dense<0.000000e+00> : vector<2x384xf32>
    %186 = tpu.matmul %184, %185, %cst_70 {dimension_numbers = #tpu.dot_dimension_numbers<[1], [0], [0], [1], [0, 0, 1, 1], [], []>} : vector<2x64xf32>, vector<64x384xf32>, vector<2x384xf32> -> vector<2x384xf32>
    %c0_71 = arith.constant 0 : index
    %c0_72 = arith.constant 0 : index
    %187 = vector.load %arg5[%c0_71, %c0_72] : memref<1x384xf32, #tpu.memory_space<vmem>>, vector<1x384xf32>
    %188 = vector.broadcast %187 : vector<1x384xf32> to vector<2x384xf32>
    %189 = arith.addf %186, %188 : vector<2x384xf32>
    %c0_73 = arith.constant 0 : index
    %c0_74 = arith.constant 0 : index
    %190 = vector.load %arg4[%c0_73, %c0_74] : memref<128x384xf32, #tpu.memory_space<vmem>>, vector<128x384xf32>
    %cst_75 = arith.constant dense<0.000000e+00> : vector<2x384xf32>
    %191 = tpu.matmul %176, %190, %cst_75 {dimension_numbers = #tpu.dot_dimension_numbers<[1], [0], [0], [1], [0, 0, 1, 1], [], []>} : vector<2x128xf32>, vector<128x384xf32>, vector<2x384xf32> -> vector<2x384xf32>
    %c0_76 = arith.constant 0 : index
    %c0_77 = arith.constant 0 : index
    %192 = vector.load %arg6[%c0_76, %c0_77] : memref<1x384xf32, #tpu.memory_space<vmem>>, vector<1x384xf32>
    %193 = vector.broadcast %192 : vector<1x384xf32> to vector<2x384xf32>
    %194 = arith.addf %191, %193 : vector<2x384xf32>
    %195 = vector.extract_strided_slice %189 {offsets = [0, 0], sizes = [2, 256], strides = [1, 1]} : vector<2x384xf32> to vector<2x256xf32>
    %196 = vector.extract_strided_slice %194 {offsets = [0, 0], sizes = [2, 256], strides = [1, 1]} : vector<2x384xf32> to vector<2x256xf32>
    %197 = arith.addf %195, %196 : vector<2x256xf32>
    %198 = arith.negf %197 : vector<2x256xf32>
    %199 = math.exp %198 : vector<2x256xf32>
    %cst_78 = arith.constant 1.000000e+00 : f32
    %200 = vector.broadcast %cst_78 : f32 to vector<2x256xf32>
    %201 = arith.addf %200, %199 : vector<2x256xf32>
    %202 = arith.divf %200, %201 : vector<2x256xf32>
    %203 = vector.extract_strided_slice %202 {offsets = [0, 0], sizes = [2, 128], strides = [1, 1]} : vector<2x256xf32> to vector<2x128xf32>
    %204 = vector.extract_strided_slice %202 {offsets = [0, 128], sizes = [2, 128], strides = [1, 1]} : vector<2x256xf32> to vector<2x128xf32>
    %205 = vector.extract_strided_slice %189 {offsets = [0, 256], sizes = [2, 128], strides = [1, 1]} : vector<2x384xf32> to vector<2x128xf32>
    %206 = vector.extract_strided_slice %194 {offsets = [0, 256], sizes = [2, 128], strides = [1, 1]} : vector<2x384xf32> to vector<2x128xf32>
    %207 = arith.mulf %203, %206 : vector<2x128xf32>
    %208 = arith.addf %205, %207 : vector<2x128xf32>
    %209 = math.tanh %208 : vector<2x128xf32>
    %210 = arith.subf %176, %209 : vector<2x128xf32>
    %211 = arith.mulf %204, %210 : vector<2x128xf32>
    %212 = arith.addf %209, %211 : vector<2x128xf32>
    %213 = vector.broadcast %c5_i32 : i32 to vector<2x1xi32>
    %214 = arith.cmpi eq, %0, %213 : vector<2x1xi32>
    %215 = vector.shape_cast %214 : vector<2x1xi1> to vector<2x1xi1>
    %216 = vector.broadcast %215 : vector<2x1xi1> to vector<2x128xi1>
    %217 = arith.select %216, %212, %181 : vector<2x128xi1>, vector<2x128xf32>
    %c6_i32 = arith.constant 6 : i32
    %218 = arith.index_cast %c6_i32 : i32 to index
    %c0_79 = arith.constant 0 : index
    %c0_80 = arith.constant 0 : index
    %219 = vector.load %arg0[%218, %c0_79, %c0_80] : memref<8x2x64xf32, #tpu.memory_space<vmem>>, vector<1x2x64xf32>
    %220 = vector.shape_cast %219 : vector<1x2x64xf32> to vector<2x64xf32>
    %c0_81 = arith.constant 0 : index
    %c0_82 = arith.constant 0 : index
    %221 = vector.load %arg3[%c0_81, %c0_82] : memref<64x384xf32, #tpu.memory_space<vmem>>, vector<64x384xf32>
    %cst_83 = arith.constant dense<0.000000e+00> : vector<2x384xf32>
    %222 = tpu.matmul %220, %221, %cst_83 {dimension_numbers = #tpu.dot_dimension_numbers<[1], [0], [0], [1], [0, 0, 1, 1], [], []>} : vector<2x64xf32>, vector<64x384xf32>, vector<2x384xf32> -> vector<2x384xf32>
    %c0_84 = arith.constant 0 : index
    %c0_85 = arith.constant 0 : index
    %223 = vector.load %arg5[%c0_84, %c0_85] : memref<1x384xf32, #tpu.memory_space<vmem>>, vector<1x384xf32>
    %224 = vector.broadcast %223 : vector<1x384xf32> to vector<2x384xf32>
    %225 = arith.addf %222, %224 : vector<2x384xf32>
    %c0_86 = arith.constant 0 : index
    %c0_87 = arith.constant 0 : index
    %226 = vector.load %arg4[%c0_86, %c0_87] : memref<128x384xf32, #tpu.memory_space<vmem>>, vector<128x384xf32>
    %cst_88 = arith.constant dense<0.000000e+00> : vector<2x384xf32>
    %227 = tpu.matmul %212, %226, %cst_88 {dimension_numbers = #tpu.dot_dimension_numbers<[1], [0], [0], [1], [0, 0, 1, 1], [], []>} : vector<2x128xf32>, vector<128x384xf32>, vector<2x384xf32> -> vector<2x384xf32>
    %c0_89 = arith.constant 0 : index
    %c0_90 = arith.constant 0 : index
    %228 = vector.load %arg6[%c0_89, %c0_90] : memref<1x384xf32, #tpu.memory_space<vmem>>, vector<1x384xf32>
    %229 = vector.broadcast %228 : vector<1x384xf32> to vector<2x384xf32>
    %230 = arith.addf %227, %229 : vector<2x384xf32>
    %231 = vector.extract_strided_slice %225 {offsets = [0, 0], sizes = [2, 256], strides = [1, 1]} : vector<2x384xf32> to vector<2x256xf32>
    %232 = vector.extract_strided_slice %230 {offsets = [0, 0], sizes = [2, 256], strides = [1, 1]} : vector<2x384xf32> to vector<2x256xf32>
    %233 = arith.addf %231, %232 : vector<2x256xf32>
    %234 = arith.negf %233 : vector<2x256xf32>
    %235 = math.exp %234 : vector<2x256xf32>
    %cst_91 = arith.constant 1.000000e+00 : f32
    %236 = vector.broadcast %cst_91 : f32 to vector<2x256xf32>
    %237 = arith.addf %236, %235 : vector<2x256xf32>
    %238 = arith.divf %236, %237 : vector<2x256xf32>
    %239 = vector.extract_strided_slice %238 {offsets = [0, 0], sizes = [2, 128], strides = [1, 1]} : vector<2x256xf32> to vector<2x128xf32>
    %240 = vector.extract_strided_slice %238 {offsets = [0, 128], sizes = [2, 128], strides = [1, 1]} : vector<2x256xf32> to vector<2x128xf32>
    %241 = vector.extract_strided_slice %225 {offsets = [0, 256], sizes = [2, 128], strides = [1, 1]} : vector<2x384xf32> to vector<2x128xf32>
    %242 = vector.extract_strided_slice %230 {offsets = [0, 256], sizes = [2, 128], strides = [1, 1]} : vector<2x384xf32> to vector<2x128xf32>
    %243 = arith.mulf %239, %242 : vector<2x128xf32>
    %244 = arith.addf %241, %243 : vector<2x128xf32>
    %245 = math.tanh %244 : vector<2x128xf32>
    %246 = arith.subf %212, %245 : vector<2x128xf32>
    %247 = arith.mulf %240, %246 : vector<2x128xf32>
    %248 = arith.addf %245, %247 : vector<2x128xf32>
    %249 = vector.broadcast %c6_i32 : i32 to vector<2x1xi32>
    %250 = arith.cmpi eq, %0, %249 : vector<2x1xi32>
    %251 = vector.shape_cast %250 : vector<2x1xi1> to vector<2x1xi1>
    %252 = vector.broadcast %251 : vector<2x1xi1> to vector<2x128xi1>
    %253 = arith.select %252, %248, %217 : vector<2x128xi1>, vector<2x128xf32>
    %c7_i32 = arith.constant 7 : i32
    %254 = arith.index_cast %c7_i32 : i32 to index
    %c0_92 = arith.constant 0 : index
    %c0_93 = arith.constant 0 : index
    %255 = vector.load %arg0[%254, %c0_92, %c0_93] : memref<8x2x64xf32, #tpu.memory_space<vmem>>, vector<1x2x64xf32>
    %256 = vector.shape_cast %255 : vector<1x2x64xf32> to vector<2x64xf32>
    %c0_94 = arith.constant 0 : index
    %c0_95 = arith.constant 0 : index
    %257 = vector.load %arg3[%c0_94, %c0_95] : memref<64x384xf32, #tpu.memory_space<vmem>>, vector<64x384xf32>
    %cst_96 = arith.constant dense<0.000000e+00> : vector<2x384xf32>
    %258 = tpu.matmul %256, %257, %cst_96 {dimension_numbers = #tpu.dot_dimension_numbers<[1], [0], [0], [1], [0, 0, 1, 1], [], []>} : vector<2x64xf32>, vector<64x384xf32>, vector<2x384xf32> -> vector<2x384xf32>
    %c0_97 = arith.constant 0 : index
    %c0_98 = arith.constant 0 : index
    %259 = vector.load %arg5[%c0_97, %c0_98] : memref<1x384xf32, #tpu.memory_space<vmem>>, vector<1x384xf32>
    %260 = vector.broadcast %259 : vector<1x384xf32> to vector<2x384xf32>
    %261 = arith.addf %258, %260 : vector<2x384xf32>
    %c0_99 = arith.constant 0 : index
    %c0_100 = arith.constant 0 : index
    %262 = vector.load %arg4[%c0_99, %c0_100] : memref<128x384xf32, #tpu.memory_space<vmem>>, vector<128x384xf32>
    %cst_101 = arith.constant dense<0.000000e+00> : vector<2x384xf32>
    %263 = tpu.matmul %248, %262, %cst_101 {dimension_numbers = #tpu.dot_dimension_numbers<[1], [0], [0], [1], [0, 0, 1, 1], [], []>} : vector<2x128xf32>, vector<128x384xf32>, vector<2x384xf32> -> vector<2x384xf32>
    %c0_102 = arith.constant 0 : index
    %c0_103 = arith.constant 0 : index
    %264 = vector.load %arg6[%c0_102, %c0_103] : memref<1x384xf32, #tpu.memory_space<vmem>>, vector<1x384xf32>
    %265 = vector.broadcast %264 : vector<1x384xf32> to vector<2x384xf32>
    %266 = arith.addf %263, %265 : vector<2x384xf32>
    %267 = vector.extract_strided_slice %261 {offsets = [0, 0], sizes = [2, 256], strides = [1, 1]} : vector<2x384xf32> to vector<2x256xf32>
    %268 = vector.extract_strided_slice %266 {offsets = [0, 0], sizes = [2, 256], strides = [1, 1]} : vector<2x384xf32> to vector<2x256xf32>
    %269 = arith.addf %267, %268 : vector<2x256xf32>
    %270 = arith.negf %269 : vector<2x256xf32>
    %271 = math.exp %270 : vector<2x256xf32>
    %cst_104 = arith.constant 1.000000e+00 : f32
    %272 = vector.broadcast %cst_104 : f32 to vector<2x256xf32>
    %273 = arith.addf %272, %271 : vector<2x256xf32>
    %274 = arith.divf %272, %273 : vector<2x256xf32>
    %275 = vector.extract_strided_slice %274 {offsets = [0, 0], sizes = [2, 128], strides = [1, 1]} : vector<2x256xf32> to vector<2x128xf32>
    %276 = vector.extract_strided_slice %274 {offsets = [0, 128], sizes = [2, 128], strides = [1, 1]} : vector<2x256xf32> to vector<2x128xf32>
    %277 = vector.extract_strided_slice %261 {offsets = [0, 256], sizes = [2, 128], strides = [1, 1]} : vector<2x384xf32> to vector<2x128xf32>
    %278 = vector.extract_strided_slice %266 {offsets = [0, 256], sizes = [2, 128], strides = [1, 1]} : vector<2x384xf32> to vector<2x128xf32>
    %279 = arith.mulf %275, %278 : vector<2x128xf32>
    %280 = arith.addf %277, %279 : vector<2x128xf32>
    %281 = math.tanh %280 : vector<2x128xf32>
    %282 = arith.subf %248, %281 : vector<2x128xf32>
    %283 = arith.mulf %276, %282 : vector<2x128xf32>
    %284 = arith.addf %281, %283 : vector<2x128xf32>
    %285 = vector.broadcast %c7_i32 : i32 to vector<2x1xi32>
    %286 = arith.cmpi eq, %0, %285 : vector<2x1xi32>
    %287 = vector.shape_cast %286 : vector<2x1xi1> to vector<2x1xi1>
    %288 = vector.broadcast %287 : vector<2x1xi1> to vector<2x128xi1>
    %289 = arith.select %288, %284, %253 : vector<2x128xi1>, vector<2x128xf32>
    %c8_i32 = arith.constant 8 : i32
    %c0_105 = arith.constant 0 : index
    %c0_106 = arith.constant 0 : index
    %290 = vector.load %arg7[%c0_105, %c0_106] : memref<128x128xf32, #tpu.memory_space<vmem>>, vector<128x128xf32>
    %cst_107 = arith.constant dense<0.000000e+00> : vector<2x128xf32>
    %291 = tpu.matmul %289, %290, %cst_107 {dimension_numbers = #tpu.dot_dimension_numbers<[1], [0], [0], [1], [0, 0, 1, 1], [], []>} : vector<2x128xf32>, vector<128x128xf32>, vector<2x128xf32> -> vector<2x128xf32>
    %c0_108 = arith.constant 0 : index
    %c0_109 = arith.constant 0 : index
    %292 = vector.load %arg8[%c0_108, %c0_109] : memref<1x128xf32, #tpu.memory_space<vmem>>, vector<1x128xf32>
    %293 = vector.broadcast %292 : vector<1x128xf32> to vector<2x128xf32>
    %294 = arith.addf %291, %293 : vector<2x128xf32>
    %c0_i32_110 = arith.constant 0 : i32
    %295 = arith.index_cast %c0_i32_110 : i32 to index
    %c0_111 = arith.constant 0 : index
    %c0_112 = arith.constant 0 : index
    %296 = vector.load %arg1[%295, %c0_111, %c0_112] : memref<5x2x64xf32, #tpu.memory_space<vmem>>, vector<1x2x64xf32>
    %297 = vector.shape_cast %296 : vector<1x2x64xf32> to vector<2x64xf32>
    %c0_113 = arith.constant 0 : index
    %c0_114 = arith.constant 0 : index
    %298 = vector.load %arg9[%c0_113, %c0_114] : memref<64x384xf32, #tpu.memory_space<vmem>>, vector<64x384xf32>
    %cst_115 = arith.constant dense<0.000000e+00> : vector<2x384xf32>
    %299 = tpu.matmul %297, %298, %cst_115 {dimension_numbers = #tpu.dot_dimension_numbers<[1], [0], [0], [1], [0, 0, 1, 1], [], []>} : vector<2x64xf32>, vector<64x384xf32>, vector<2x384xf32> -> vector<2x384xf32>
    %c0_116 = arith.constant 0 : index
    %c0_117 = arith.constant 0 : index
    %300 = vector.load %arg11[%c0_116, %c0_117] : memref<1x384xf32, #tpu.memory_space<vmem>>, vector<1x384xf32>
    %301 = vector.broadcast %300 : vector<1x384xf32> to vector<2x384xf32>
    %302 = arith.addf %299, %301 : vector<2x384xf32>
    %c0_118 = arith.constant 0 : index
    %c0_119 = arith.constant 0 : index
    %303 = vector.load %arg10[%c0_118, %c0_119] : memref<128x384xf32, #tpu.memory_space<vmem>>, vector<128x384xf32>
    %cst_120 = arith.constant dense<0.000000e+00> : vector<2x384xf32>
    %304 = tpu.matmul %294, %303, %cst_120 {dimension_numbers = #tpu.dot_dimension_numbers<[1], [0], [0], [1], [0, 0, 1, 1], [], []>} : vector<2x128xf32>, vector<128x384xf32>, vector<2x384xf32> -> vector<2x384xf32>
    %c0_121 = arith.constant 0 : index
    %c0_122 = arith.constant 0 : index
    %305 = vector.load %arg12[%c0_121, %c0_122] : memref<1x384xf32, #tpu.memory_space<vmem>>, vector<1x384xf32>
    %306 = vector.broadcast %305 : vector<1x384xf32> to vector<2x384xf32>
    %307 = arith.addf %304, %306 : vector<2x384xf32>
    %308 = vector.extract_strided_slice %302 {offsets = [0, 0], sizes = [2, 256], strides = [1, 1]} : vector<2x384xf32> to vector<2x256xf32>
    %309 = vector.extract_strided_slice %307 {offsets = [0, 0], sizes = [2, 256], strides = [1, 1]} : vector<2x384xf32> to vector<2x256xf32>
    %310 = arith.addf %308, %309 : vector<2x256xf32>
    %311 = arith.negf %310 : vector<2x256xf32>
    %312 = math.exp %311 : vector<2x256xf32>
    %cst_123 = arith.constant 1.000000e+00 : f32
    %313 = vector.broadcast %cst_123 : f32 to vector<2x256xf32>
    %314 = arith.addf %313, %312 : vector<2x256xf32>
    %315 = arith.divf %313, %314 : vector<2x256xf32>
    %316 = vector.extract_strided_slice %315 {offsets = [0, 0], sizes = [2, 128], strides = [1, 1]} : vector<2x256xf32> to vector<2x128xf32>
    %317 = vector.extract_strided_slice %315 {offsets = [0, 128], sizes = [2, 128], strides = [1, 1]} : vector<2x256xf32> to vector<2x128xf32>
    %318 = vector.extract_strided_slice %302 {offsets = [0, 256], sizes = [2, 128], strides = [1, 1]} : vector<2x384xf32> to vector<2x128xf32>
    %319 = vector.extract_strided_slice %307 {offsets = [0, 256], sizes = [2, 128], strides = [1, 1]} : vector<2x384xf32> to vector<2x128xf32>
    %320 = arith.mulf %316, %319 : vector<2x128xf32>
    %321 = arith.addf %318, %320 : vector<2x128xf32>
    %322 = math.tanh %321 : vector<2x128xf32>
    %323 = arith.subf %294, %322 : vector<2x128xf32>
    %324 = arith.mulf %317, %323 : vector<2x128xf32>
    %325 = arith.addf %322, %324 : vector<2x128xf32>
    %c0_124 = arith.constant 0 : index
    %c0_125 = arith.constant 0 : index
    %326 = vector.load %arg13[%c0_124, %c0_125] : memref<128x128xf32, #tpu.memory_space<vmem>>, vector<128x128xf32>
    %cst_126 = arith.constant dense<0.000000e+00> : vector<2x128xf32>
    %327 = tpu.matmul %325, %326, %cst_126 {dimension_numbers = #tpu.dot_dimension_numbers<[1], [0], [0], [1], [0, 0, 1, 1], [], []>} : vector<2x128xf32>, vector<128x128xf32>, vector<2x128xf32> -> vector<2x128xf32>
    %c0_127 = arith.constant 0 : index
    %c0_128 = arith.constant 0 : index
    %328 = vector.load %arg14[%c0_127, %c0_128] : memref<1x128xf32, #tpu.memory_space<vmem>>, vector<1x128xf32>
    %329 = vector.broadcast %328 : vector<1x128xf32> to vector<2x128xf32>
    %330 = arith.addf %327, %329 : vector<2x128xf32>
    %331 = arith.index_cast %c0_i32_110 : i32 to index
    %c0_129 = arith.constant 0 : index
    %c0_130 = arith.constant 0 : index
    %332 = vector.load %arg15[%331, %c0_129, %c0_130] : memref<5x2x128xf32, #tpu.memory_space<vmem>>, vector<1x2x128xf32>
    %333 = vector.shape_cast %332 : vector<1x2x128xf32> to vector<2x128xf32>
    %334 = vector.shape_cast %330 : vector<2x128xf32> to vector<1x2x128xf32>
    tpu.vector_store %arg15[%331, %c0_129, %c0_130], %334 {strides = array<i32>} : memref<5x2x128xf32, #tpu.memory_space<vmem>>, vector<1x2x128xf32>,
    %c1_i32_131 = arith.constant 1 : i32
    %335 = arith.index_cast %c1_i32_131 : i32 to index
    %c0_132 = arith.constant 0 : index
    %c0_133 = arith.constant 0 : index
    %336 = vector.load %arg1[%335, %c0_132, %c0_133] : memref<5x2x64xf32, #tpu.memory_space<vmem>>, vector<1x2x64xf32>
    %337 = vector.shape_cast %336 : vector<1x2x64xf32> to vector<2x64xf32>
    %c0_134 = arith.constant 0 : index
    %c0_135 = arith.constant 0 : index
    %338 = vector.load %arg9[%c0_134, %c0_135] : memref<64x384xf32, #tpu.memory_space<vmem>>, vector<64x384xf32>
    %cst_136 = arith.constant dense<0.000000e+00> : vector<2x384xf32>
    %339 = tpu.matmul %337, %338, %cst_136 {dimension_numbers = #tpu.dot_dimension_numbers<[1], [0], [0], [1], [0, 0, 1, 1], [], []>} : vector<2x64xf32>, vector<64x384xf32>, vector<2x384xf32> -> vector<2x384xf32>
    %c0_137 = arith.constant 0 : index
    %c0_138 = arith.constant 0 : index
    %340 = vector.load %arg11[%c0_137, %c0_138] : memref<1x384xf32, #tpu.memory_space<vmem>>, vector<1x384xf32>
    %341 = vector.broadcast %340 : vector<1x384xf32> to vector<2x384xf32>
    %342 = arith.addf %339, %341 : vector<2x384xf32>
    %c0_139 = arith.constant 0 : index
    %c0_140 = arith.constant 0 : index
    %343 = vector.load %arg10[%c0_139, %c0_140] : memref<128x384xf32, #tpu.memory_space<vmem>>, vector<128x384xf32>
    %cst_141 = arith.constant dense<0.000000e+00> : vector<2x384xf32>
    %344 = tpu.matmul %325, %343, %cst_141 {dimension_numbers = #tpu.dot_dimension_numbers<[1], [0], [0], [1], [0, 0, 1, 1], [], []>} : vector<2x128xf32>, vector<128x384xf32>, vector<2x384xf32> -> vector<2x384xf32>
    %c0_142 = arith.constant 0 : index
    %c0_143 = arith.constant 0 : index
    %345 = vector.load %arg12[%c0_142, %c0_143] : memref<1x384xf32, #tpu.memory_space<vmem>>, vector<1x384xf32>
    %346 = vector.broadcast %345 : vector<1x384xf32> to vector<2x384xf32>
    %347 = arith.addf %344, %346 : vector<2x384xf32>
    %348 = vector.extract_strided_slice %342 {offsets = [0, 0], sizes = [2, 256], strides = [1, 1]} : vector<2x384xf32> to vector<2x256xf32>
    %349 = vector.extract_strided_slice %347 {offsets = [0, 0], sizes = [2, 256], strides = [1, 1]} : vector<2x384xf32> to vector<2x256xf32>
    %350 = arith.addf %348, %349 : vector<2x256xf32>
    %351 = arith.negf %350 : vector<2x256xf32>
    %352 = math.exp %351 : vector<2x256xf32>
    %cst_144 = arith.constant 1.000000e+00 : f32
    %353 = vector.broadcast %cst_144 : f32 to vector<2x256xf32>
    %354 = arith.addf %353, %352 : vector<2x256xf32>
    %355 = arith.divf %353, %354 : vector<2x256xf32>
    %356 = vector.extract_strided_slice %355 {offsets = [0, 0], sizes = [2, 128], strides = [1, 1]} : vector<2x256xf32> to vector<2x128xf32>
    %357 = vector.extract_strided_slice %355 {offsets = [0, 128], sizes = [2, 128], strides = [1, 1]} : vector<2x256xf32> to vector<2x128xf32>
    %358 = vector.extract_strided_slice %342 {offsets = [0, 256], sizes = [2, 128], strides = [1, 1]} : vector<2x384xf32> to vector<2x128xf32>
    %359 = vector.extract_strided_slice %347 {offsets = [0, 256], sizes = [2, 128], strides = [1, 1]} : vector<2x384xf32> to vector<2x128xf32>
    %360 = arith.mulf %356, %359 : vector<2x128xf32>
    %361 = arith.addf %358, %360 : vector<2x128xf32>
    %362 = math.tanh %361 : vector<2x128xf32>
    %363 = arith.subf %325, %362 : vector<2x128xf32>
    %364 = arith.mulf %357, %363 : vector<2x128xf32>
    %365 = arith.addf %362, %364 : vector<2x128xf32>
    %c0_145 = arith.constant 0 : index
    %c0_146 = arith.constant 0 : index
    %366 = vector.load %arg13[%c0_145, %c0_146] : memref<128x128xf32, #tpu.memory_space<vmem>>, vector<128x128xf32>
    %cst_147 = arith.constant dense<0.000000e+00> : vector<2x128xf32>
    %367 = tpu.matmul %365, %366, %cst_147 {dimension_numbers = #tpu.dot_dimension_numbers<[1], [0], [0], [1], [0, 0, 1, 1], [], []>} : vector<2x128xf32>, vector<128x128xf32>, vector<2x128xf32> -> vector<2x128xf32>
    %c0_148 = arith.constant 0 : index
    %c0_149 = arith.constant 0 : index
    %368 = vector.load %arg14[%c0_148, %c0_149] : memref<1x128xf32, #tpu.memory_space<vmem>>, vector<1x128xf32>
    %369 = vector.broadcast %368 : vector<1x128xf32> to vector<2x128xf32>
    %370 = arith.addf %367, %369 : vector<2x128xf32>
    %371 = arith.index_cast %c1_i32_131 : i32 to index
    %c0_150 = arith.constant 0 : index
    %c0_151 = arith.constant 0 : index
    %372 = vector.load %arg15[%371, %c0_150, %c0_151] : memref<5x2x128xf32, #tpu.memory_space<vmem>>, vector<1x2x128xf32>
    %373 = vector.shape_cast %372 : vector<1x2x128xf32> to vector<2x128xf32>
    %374 = vector.shape_cast %370 : vector<2x128xf32> to vector<1x2x128xf32>
    tpu.vector_store %arg15[%371, %c0_150, %c0_151], %374 {strides = array<i32>} : memref<5x2x128xf32, #tpu.memory_space<vmem>>, vector<1x2x128xf32>,
    %c2_i32_152 = arith.constant 2 : i32
    %375 = arith.index_cast %c2_i32_152 : i32 to index
    %c0_153 = arith.constant 0 : index
    %c0_154 = arith.constant 0 : index
    %376 = vector.load %arg1[%375, %c0_153, %c0_154] : memref<5x2x64xf32, #tpu.memory_space<vmem>>, vector<1x2x64xf32>
    %377 = vector.shape_cast %376 : vector<1x2x64xf32> to vector<2x64xf32>
    %c0_155 = arith.constant 0 : index
    %c0_156 = arith.constant 0 : index
    %378 = vector.load %arg9[%c0_155, %c0_156] : memref<64x384xf32, #tpu.memory_space<vmem>>, vector<64x384xf32>
    %cst_157 = arith.constant dense<0.000000e+00> : vector<2x384xf32>
    %379 = tpu.matmul %377, %378, %cst_157 {dimension_numbers = #tpu.dot_dimension_numbers<[1], [0], [0], [1], [0, 0, 1, 1], [], []>} : vector<2x64xf32>, vector<64x384xf32>, vector<2x384xf32> -> vector<2x384xf32>
    %c0_158 = arith.constant 0 : index
    %c0_159 = arith.constant 0 : index
    %380 = vector.load %arg11[%c0_158, %c0_159] : memref<1x384xf32, #tpu.memory_space<vmem>>, vector<1x384xf32>
    %381 = vector.broadcast %380 : vector<1x384xf32> to vector<2x384xf32>
    %382 = arith.addf %379, %381 : vector<2x384xf32>
    %c0_160 = arith.constant 0 : index
    %c0_161 = arith.constant 0 : index
    %383 = vector.load %arg10[%c0_160, %c0_161] : memref<128x384xf32, #tpu.memory_space<vmem>>, vector<128x384xf32>
    %cst_162 = arith.constant dense<0.000000e+00> : vector<2x384xf32>
    %384 = tpu.matmul %365, %383, %cst_162 {dimension_numbers = #tpu.dot_dimension_numbers<[1], [0], [0], [1], [0, 0, 1, 1], [], []>} : vector<2x128xf32>, vector<128x384xf32>, vector<2x384xf32> -> vector<2x384xf32>
    %c0_163 = arith.constant 0 : index
    %c0_164 = arith.constant 0 : index
    %385 = vector.load %arg12[%c0_163, %c0_164] : memref<1x384xf32, #tpu.memory_space<vmem>>, vector<1x384xf32>
    %386 = vector.broadcast %385 : vector<1x384xf32> to vector<2x384xf32>
    %387 = arith.addf %384, %386 : vector<2x384xf32>
    %388 = vector.extract_strided_slice %382 {offsets = [0, 0], sizes = [2, 256], strides = [1, 1]} : vector<2x384xf32> to vector<2x256xf32>
    %389 = vector.extract_strided_slice %387 {offsets = [0, 0], sizes = [2, 256], strides = [1, 1]} : vector<2x384xf32> to vector<2x256xf32>
    %390 = arith.addf %388, %389 : vector<2x256xf32>
    %391 = arith.negf %390 : vector<2x256xf32>
    %392 = math.exp %391 : vector<2x256xf32>
    %cst_165 = arith.constant 1.000000e+00 : f32
    %393 = vector.broadcast %cst_165 : f32 to vector<2x256xf32>
    %394 = arith.addf %393, %392 : vector<2x256xf32>
    %395 = arith.divf %393, %394 : vector<2x256xf32>
    %396 = vector.extract_strided_slice %395 {offsets = [0, 0], sizes = [2, 128], strides = [1, 1]} : vector<2x256xf32> to vector<2x128xf32>
    %397 = vector.extract_strided_slice %395 {offsets = [0, 128], sizes = [2, 128], strides = [1, 1]} : vector<2x256xf32> to vector<2x128xf32>
    %398 = vector.extract_strided_slice %382 {offsets = [0, 256], sizes = [2, 128], strides = [1, 1]} : vector<2x384xf32> to vector<2x128xf32>
    %399 = vector.extract_strided_slice %387 {offsets = [0, 256], sizes = [2, 128], strides = [1, 1]} : vector<2x384xf32> to vector<2x128xf32>
    %400 = arith.mulf %396, %399 : vector<2x128xf32>
    %401 = arith.addf %398, %400 : vector<2x128xf32>
    %402 = math.tanh %401 : vector<2x128xf32>
    %403 = arith.subf %365, %402 : vector<2x128xf32>
    %404 = arith.mulf %397, %403 : vector<2x128xf32>
    %405 = arith.addf %402, %404 : vector<2x128xf32>
    %c0_166 = arith.constant 0 : index
    %c0_167 = arith.constant 0 : index
    %406 = vector.load %arg13[%c0_166, %c0_167] : memref<128x128xf32, #tpu.memory_space<vmem>>, vector<128x128xf32>
    %cst_168 = arith.constant dense<0.000000e+00> : vector<2x128xf32>
    %407 = tpu.matmul %405, %406, %cst_168 {dimension_numbers = #tpu.dot_dimension_numbers<[1], [0], [0], [1], [0, 0, 1, 1], [], []>} : vector<2x128xf32>, vector<128x128xf32>, vector<2x128xf32> -> vector<2x128xf32>
    %c0_169 = arith.constant 0 : index
    %c0_170 = arith.constant 0 : index
    %408 = vector.load %arg14[%c0_169, %c0_170] : memref<1x128xf32, #tpu.memory_space<vmem>>, vector<1x128xf32>
    %409 = vector.broadcast %408 : vector<1x128xf32> to vector<2x128xf32>
    %410 = arith.addf %407, %409 : vector<2x128xf32>
    %411 = arith.index_cast %c2_i32_152 : i32 to index
    %c0_171 = arith.constant 0 : index
    %c0_172 = arith.constant 0 : index
    %412 = vector.load %arg15[%411, %c0_171, %c0_172] : memref<5x2x128xf32, #tpu.memory_space<vmem>>, vector<1x2x128xf32>
    %413 = vector.shape_cast %412 : vector<1x2x128xf32> to vector<2x128xf32>
    %414 = vector.shape_cast %410 : vector<2x128xf32> to vector<1x2x128xf32>
    tpu.vector_store %arg15[%411, %c0_171, %c0_172], %414 {strides = array<i32>} : memref<5x2x128xf32, #tpu.memory_space<vmem>>, vector<1x2x128xf32>,
    %c3_i32_173 = arith.constant 3 : i32
    %415 = arith.index_cast %c3_i32_173 : i32 to index
    %c0_174 = arith.constant 0 : index
    %c0_175 = arith.constant 0 : index
    %416 = vector.load %arg1[%415, %c0_174, %c0_175] : memref<5x2x64xf32, #tpu.memory_space<vmem>>, vector<1x2x64xf32>
    %417 = vector.shape_cast %416 : vector<1x2x64xf32> to vector<2x64xf32>
    %c0_176 = arith.constant 0 : index
    %c0_177 = arith.constant 0 : index
    %418 = vector.load %arg9[%c0_176, %c0_177] : memref<64x384xf32, #tpu.memory_space<vmem>>, vector<64x384xf32>
    %cst_178 = arith.constant dense<0.000000e+00> : vector<2x384xf32>
    %419 = tpu.matmul %417, %418, %cst_178 {dimension_numbers = #tpu.dot_dimension_numbers<[1], [0], [0], [1], [0, 0, 1, 1], [], []>} : vector<2x64xf32>, vector<64x384xf32>, vector<2x384xf32> -> vector<2x384xf32>
    %c0_179 = arith.constant 0 : index
    %c0_180 = arith.constant 0 : index
    %420 = vector.load %arg11[%c0_179, %c0_180] : memref<1x384xf32, #tpu.memory_space<vmem>>, vector<1x384xf32>
    %421 = vector.broadcast %420 : vector<1x384xf32> to vector<2x384xf32>
    %422 = arith.addf %419, %421 : vector<2x384xf32>
    %c0_181 = arith.constant 0 : index
    %c0_182 = arith.constant 0 : index
    %423 = vector.load %arg10[%c0_181, %c0_182] : memref<128x384xf32, #tpu.memory_space<vmem>>, vector<128x384xf32>
    %cst_183 = arith.constant dense<0.000000e+00> : vector<2x384xf32>
    %424 = tpu.matmul %405, %423, %cst_183 {dimension_numbers = #tpu.dot_dimension_numbers<[1], [0], [0], [1], [0, 0, 1, 1], [], []>} : vector<2x128xf32>, vector<128x384xf32>, vector<2x384xf32> -> vector<2x384xf32>
    %c0_184 = arith.constant 0 : index
    %c0_185 = arith.constant 0 : index
    %425 = vector.load %arg12[%c0_184, %c0_185] : memref<1x384xf32, #tpu.memory_space<vmem>>, vector<1x384xf32>
    %426 = vector.broadcast %425 : vector<1x384xf32> to vector<2x384xf32>
    %427 = arith.addf %424, %426 : vector<2x384xf32>
    %428 = vector.extract_strided_slice %422 {offsets = [0, 0], sizes = [2, 256], strides = [1, 1]} : vector<2x384xf32> to vector<2x256xf32>
    %429 = vector.extract_strided_slice %427 {offsets = [0, 0], sizes = [2, 256], strides = [1, 1]} : vector<2x384xf32> to vector<2x256xf32>
    %430 = arith.addf %428, %429 : vector<2x256xf32>
    %431 = arith.negf %430 : vector<2x256xf32>
    %432 = math.exp %431 : vector<2x256xf32>
    %cst_186 = arith.constant 1.000000e+00 : f32
    %433 = vector.broadcast %cst_186 : f32 to vector<2x256xf32>
    %434 = arith.addf %433, %432 : vector<2x256xf32>
    %435 = arith.divf %433, %434 : vector<2x256xf32>
    %436 = vector.extract_strided_slice %435 {offsets = [0, 0], sizes = [2, 128], strides = [1, 1]} : vector<2x256xf32> to vector<2x128xf32>
    %437 = vector.extract_strided_slice %435 {offsets = [0, 128], sizes = [2, 128], strides = [1, 1]} : vector<2x256xf32> to vector<2x128xf32>
    %438 = vector.extract_strided_slice %422 {offsets = [0, 256], sizes = [2, 128], strides = [1, 1]} : vector<2x384xf32> to vector<2x128xf32>
    %439 = vector.extract_strided_slice %427 {offsets = [0, 256], sizes = [2, 128], strides = [1, 1]} : vector<2x384xf32> to vector<2x128xf32>
    %440 = arith.mulf %436, %439 : vector<2x128xf32>
    %441 = arith.addf %438, %440 : vector<2x128xf32>
    %442 = math.tanh %441 : vector<2x128xf32>
    %443 = arith.subf %405, %442 : vector<2x128xf32>
    %444 = arith.mulf %437, %443 : vector<2x128xf32>
    %445 = arith.addf %442, %444 : vector<2x128xf32>
    %c0_187 = arith.constant 0 : index
    %c0_188 = arith.constant 0 : index
    %446 = vector.load %arg13[%c0_187, %c0_188] : memref<128x128xf32, #tpu.memory_space<vmem>>, vector<128x128xf32>
    %cst_189 = arith.constant dense<0.000000e+00> : vector<2x128xf32>
    %447 = tpu.matmul %445, %446, %cst_189 {dimension_numbers = #tpu.dot_dimension_numbers<[1], [0], [0], [1], [0, 0, 1, 1], [], []>} : vector<2x128xf32>, vector<128x128xf32>, vector<2x128xf32> -> vector<2x128xf32>
    %c0_190 = arith.constant 0 : index
    %c0_191 = arith.constant 0 : index
    %448 = vector.load %arg14[%c0_190, %c0_191] : memref<1x128xf32, #tpu.memory_space<vmem>>, vector<1x128xf32>
    %449 = vector.broadcast %448 : vector<1x128xf32> to vector<2x128xf32>
    %450 = arith.addf %447, %449 : vector<2x128xf32>
    %451 = arith.index_cast %c3_i32_173 : i32 to index
    %c0_192 = arith.constant 0 : index
    %c0_193 = arith.constant 0 : index
    %452 = vector.load %arg15[%451, %c0_192, %c0_193] : memref<5x2x128xf32, #tpu.memory_space<vmem>>, vector<1x2x128xf32>
    %453 = vector.shape_cast %452 : vector<1x2x128xf32> to vector<2x128xf32>
    %454 = vector.shape_cast %450 : vector<2x128xf32> to vector<1x2x128xf32>
    tpu.vector_store %arg15[%451, %c0_192, %c0_193], %454 {strides = array<i32>} : memref<5x2x128xf32, #tpu.memory_space<vmem>>, vector<1x2x128xf32>,
    %c4_i32_194 = arith.constant 4 : i32
    %455 = arith.index_cast %c4_i32_194 : i32 to index
    %c0_195 = arith.constant 0 : index
    %c0_196 = arith.constant 0 : index
    %456 = vector.load %arg1[%455, %c0_195, %c0_196] : memref<5x2x64xf32, #tpu.memory_space<vmem>>, vector<1x2x64xf32>
    %457 = vector.shape_cast %456 : vector<1x2x64xf32> to vector<2x64xf32>
    %c0_197 = arith.constant 0 : index
    %c0_198 = arith.constant 0 : index
    %458 = vector.load %arg9[%c0_197, %c0_198] : memref<64x384xf32, #tpu.memory_space<vmem>>, vector<64x384xf32>
    %cst_199 = arith.constant dense<0.000000e+00> : vector<2x384xf32>
    %459 = tpu.matmul %457, %458, %cst_199 {dimension_numbers = #tpu.dot_dimension_numbers<[1], [0], [0], [1], [0, 0, 1, 1], [], []>} : vector<2x64xf32>, vector<64x384xf32>, vector<2x384xf32> -> vector<2x384xf32>
    %c0_200 = arith.constant 0 : index
    %c0_201 = arith.constant 0 : index
    %460 = vector.load %arg11[%c0_200, %c0_201] : memref<1x384xf32, #tpu.memory_space<vmem>>, vector<1x384xf32>
    %461 = vector.broadcast %460 : vector<1x384xf32> to vector<2x384xf32>
    %462 = arith.addf %459, %461 : vector<2x384xf32>
    %c0_202 = arith.constant 0 : index
    %c0_203 = arith.constant 0 : index
    %463 = vector.load %arg10[%c0_202, %c0_203] : memref<128x384xf32, #tpu.memory_space<vmem>>, vector<128x384xf32>
    %cst_204 = arith.constant dense<0.000000e+00> : vector<2x384xf32>
    %464 = tpu.matmul %445, %463, %cst_204 {dimension_numbers = #tpu.dot_dimension_numbers<[1], [0], [0], [1], [0, 0, 1, 1], [], []>} : vector<2x128xf32>, vector<128x384xf32>, vector<2x384xf32> -> vector<2x384xf32>
    %c0_205 = arith.constant 0 : index
    %c0_206 = arith.constant 0 : index
    %465 = vector.load %arg12[%c0_205, %c0_206] : memref<1x384xf32, #tpu.memory_space<vmem>>, vector<1x384xf32>
    %466 = vector.broadcast %465 : vector<1x384xf32> to vector<2x384xf32>
    %467 = arith.addf %464, %466 : vector<2x384xf32>
    %468 = vector.extract_strided_slice %462 {offsets = [0, 0], sizes = [2, 256], strides = [1, 1]} : vector<2x384xf32> to vector<2x256xf32>
    %469 = vector.extract_strided_slice %467 {offsets = [0, 0], sizes = [2, 256], strides = [1, 1]} : vector<2x384xf32> to vector<2x256xf32>
    %470 = arith.addf %468, %469 : vector<2x256xf32>
    %471 = arith.negf %470 : vector<2x256xf32>
    %472 = math.exp %471 : vector<2x256xf32>
    %cst_207 = arith.constant 1.000000e+00 : f32
    %473 = vector.broadcast %cst_207 : f32 to vector<2x256xf32>
    %474 = arith.addf %473, %472 : vector<2x256xf32>
    %475 = arith.divf %473, %474 : vector<2x256xf32>
    %476 = vector.extract_strided_slice %475 {offsets = [0, 0], sizes = [2, 128], strides = [1, 1]} : vector<2x256xf32> to vector<2x128xf32>
    %477 = vector.extract_strided_slice %475 {offsets = [0, 128], sizes = [2, 128], strides = [1, 1]} : vector<2x256xf32> to vector<2x128xf32>
    %478 = vector.extract_strided_slice %462 {offsets = [0, 256], sizes = [2, 128], strides = [1, 1]} : vector<2x384xf32> to vector<2x128xf32>
    %479 = vector.extract_strided_slice %467 {offsets = [0, 256], sizes = [2, 128], strides = [1, 1]} : vector<2x384xf32> to vector<2x128xf32>
    %480 = arith.mulf %476, %479 : vector<2x128xf32>
    %481 = arith.addf %478, %480 : vector<2x128xf32>
    %482 = math.tanh %481 : vector<2x128xf32>
    %483 = arith.subf %445, %482 : vector<2x128xf32>
    %484 = arith.mulf %477, %483 : vector<2x128xf32>
    %485 = arith.addf %482, %484 : vector<2x128xf32>
    %c0_208 = arith.constant 0 : index
    %c0_209 = arith.constant 0 : index
    %486 = vector.load %arg13[%c0_208, %c0_209] : memref<128x128xf32, #tpu.memory_space<vmem>>, vector<128x128xf32>
    %cst_210 = arith.constant dense<0.000000e+00> : vector<2x128xf32>
    %487 = tpu.matmul %485, %486, %cst_210 {dimension_numbers = #tpu.dot_dimension_numbers<[1], [0], [0], [1], [0, 0, 1, 1], [], []>} : vector<2x128xf32>, vector<128x128xf32>, vector<2x128xf32> -> vector<2x128xf32>
    %c0_211 = arith.constant 0 : index
    %c0_212 = arith.constant 0 : index
    %488 = vector.load %arg14[%c0_211, %c0_212] : memref<1x128xf32, #tpu.memory_space<vmem>>, vector<1x128xf32>
    %489 = vector.broadcast %488 : vector<1x128xf32> to vector<2x128xf32>
    %490 = arith.addf %487, %489 : vector<2x128xf32>
    %491 = arith.index_cast %c4_i32_194 : i32 to index
    %c0_213 = arith.constant 0 : index
    %c0_214 = arith.constant 0 : index
    %492 = vector.load %arg15[%491, %c0_213, %c0_214] : memref<5x2x128xf32, #tpu.memory_space<vmem>>, vector<1x2x128xf32>
    %493 = vector.shape_cast %492 : vector<1x2x128xf32> to vector<2x128xf32>
    %494 = vector.shape_cast %490 : vector<2x128xf32> to vector<1x2x128xf32>
    tpu.vector_store %arg15[%491, %c0_213, %c0_214], %494 {strides = array<i32>} : memref<5x2x128xf32, #tpu.memory_space<vmem>>, vector<1x2x128xf32>,
    %c5_i32_215 = arith.constant 5 : i32
    return
  }
}

</mosaic_0001>

<bundles_post_ra>
// kernel: forward.1
= control target key start
LH: loop header
LB: loop body
LE: loop exit
PB: predicated region body
PF: predicated region fallthrough
CT: control target
= control target key end

     0   :  { %20 = vsyncpa [#allocation3], 0  ;;  %s10347_s0 = inlined_call_operand.vmem [shape: f32[8,2,64], index: 0, kind: input, shape index: {}]   ;;  %s10348_s1 = inlined_call_operand.vmem [shape: f32[5,2,64], index: 1, kind: input, shape index: {}]   ;;  %s10349_s2 = inlined_call_operand.vmem [shape: s32[2,1], index: 2, kind: input, shape index: {}]   ;;  %s10350_s3 = inlined_call_operand.hbm [shape: f32[64,384], index: 3, kind: input, shape index: {}]   ;;  %s10351_s4 = inlined_call_operand.vmem [shape: f32[128,384], index: 4, kind: input, shape index: {}]   ;;  %s10352_s5 = inlined_call_operand.vmem [shape: f32[1,384], index: 5, kind: input, shape index: {}]   ;;  %s10353_s6 = inlined_call_operand.vmem [shape: f32[1,384], index: 6, kind: input, shape index: {}]   ;;  %s10354_s7 = inlined_call_operand.hbm [shape: f32[128,128], index: 7, kind: input, shape index: {}]   ;;  %s10355_s8 = inlined_call_operand.vmem [shape: f32[1,128], index: 8, kind: input, shape index: {}]   ;;  %s10356_s9 = inlined_call_operand.hbm [shape: f32[64,384], index: 9, kind: input, shape index: {}]   ;;  %s10357_s10 = inlined_call_operand.vmem [shape: f32[128,384], index: 10, kind: input, shape index: {}]   ;;  %s10358_s11 = inlined_call_operand.vmem [shape: f32[1,384], index: 11, kind: input, shape index: {}]   ;;  %s10359_s12 = inlined_call_operand.vmem [shape: f32[1,384], index: 12, kind: input, shape index: {}]   ;;  %s10360_s13 = inlined_call_operand.vmem [shape: f32[128,128], index: 13, kind: input, shape index: {}]   ;;  %s10361_s14 = inlined_call_operand.vmem [shape: f32[1,128], index: 14, kind: input, shape index: {}]   ;;  %s10362_s15 = inlined_call_operand.vmem [shape: f32[5,2,128], index: 15, kind: output, shape index: {}]  }
   0x1   :  { %21 = vsyncpa [#allocation5], 0  ;;  %s8300_s18 = smov [#allocation4]   ;;  %s8230_s22 = scalar_lea.hbm %s10354_s7, 2048 }
   0x2   :  { %s51_s19 = sshll.u32 %s8300_s18, 4  ;;  %p8231_p0 = scmp.ne.s32.totalorder %s10354_s7, %s8230_s22  ;;  %s52_s19 = int_to_ptr.vmem [resolvable:$true] %s51_s19 }
   0x3   :  { %p8234_p1 = scmp.lt.u32.totalorder %s8230_s22, %s10354_s7 }
   0x5   :  { %p8236_p2 = pnand %p8234_p1, %p8231_p0 }
   0x7   :  { %8239 = shalt.err (!%p8236_p2)
}
   0x8   :  { %s8240_s27 = scalar_lea.vmem %s52_s19, 2048  ;;  %p8245_p4 = scmp.lt.s32.totalorder %s52_s19, %s52_s19 }
   0x9   :  { %p8241_p3 = scmp.ne.s32.totalorder %s52_s19, %s8240_s27  ;;  %p8246_p5 = scmp.lt.s32.totalorder %s8240_s27, %s8240_s27 }
   0xb   :  { %p8247_p6 = por %p8246_p5, %p8245_p4 }
   0xd   :  { %p8248_p7 = pnand %p8247_p6, %p8241_p3 }
   0xf   :  { %8251 = shalt.err (!%p8248_p7)
}
  0x10   :  { %s8301_s28 = smov 128   ;;  %s8302_s29 = smov 8  }
  0x11   :  { %57 = dma.hbm_to_vmem [thread:$0]  %s10354_s7, 2048, %s52_s19, [#allocation5], %s8301_s28, %s8301_s28, %s8302_s29  }
  0x12   :  { %s8303_s17 = smov [#allocation2]   ;;  %s8252_s22 = scalar_lea.hbm %s10350_s3, 3072 }
  0x13   :  { %s33_s18 = sshll.u32 %s8303_s17, 4  ;;  %p8253_p8 = scmp.ne.s32.totalorder %s10350_s3, %s8252_s22  ;;  %s34_s18 = int_to_ptr.vmem [resolvable:$true] %s33_s18 }
  0x14   :  { %p8256_p9 = scmp.lt.u32.totalorder %s8252_s22, %s10350_s3 }
  0x16   :  { %p8258_p10 = pnand %p8256_p9, %p8253_p8 }
  0x18   :  { %8261 = shalt.err (!%p8258_p10)
}
  0x19   :  { %s8262_s27 = scalar_lea.vmem %s34_s18, 3072  ;;  %p8267_p12 = scmp.lt.s32.totalorder %s34_s18, %s34_s18 }
  0x1a   :  { %p8263_p11 = scmp.ne.s32.totalorder %s34_s18, %s8262_s27  ;;  %p8268_p13 = scmp.lt.s32.totalorder %s8262_s27, %s8262_s27 }
  0x1c   :  { %p8269_p0 = por %p8268_p13, %p8267_p12 }
  0x1e   :  { %p8270_p1 = pnand %p8269_p0, %p8263_p11 }
  0x20   :  { %8273 = shalt.err (!%p8270_p1)
}
  0x21   :  { %s8304_s7 = smov 384   ;;  %s8305_s19 = smov 24  }
  0x22   :  { %39 = dma.hbm_to_vmem [thread:$0]  %s10350_s3, 3072, %s34_s18, [#allocation3], %s8304_s7, %s8304_s7, %s8305_s19  }
  0x23   :  { %s8306_s30 = smov [#allocation6]   ;;  %s8274_s21 = scalar_lea.hbm %s10356_s9, 3072 }
  0x24   :  { %s65_s16 = sshll.u32 %s8306_s30, 4  ;;  %p8275_p2 = scmp.ne.s32.totalorder %s10356_s9, %s8274_s21  ;;  %s66_s16 = int_to_ptr.vmem [resolvable:$true] %s65_s16 }
  0x25   :  { %p8278_p3 = scmp.lt.u32.totalorder %s8274_s21, %s10356_s9 }
  0x27   :  { %p8280_p4 = pnand %p8278_p3, %p8275_p2 }
  0x29   :  { %8283 = shalt.err (!%p8280_p4)
}
  0x2a   :  { %s8284_s26 = scalar_lea.vmem %s66_s16, 3072  ;;  %p8289_p6 = scmp.lt.s32.totalorder %s66_s16, %s66_s16 }
  0x2b   :  { %p8285_p5 = scmp.ne.s32.totalorder %s66_s16, %s8284_s26  ;;  %p8290_p7 = scmp.lt.s32.totalorder %s8284_s26, %s8284_s26 }
  0x2d   :  { %p8291_p8 = por %p8290_p7, %p8289_p6 }
  0x2f   :  { %p8292_p9 = pnand %p8291_p8, %p8285_p5 }
  0x31   :  { %8295 = shalt.err (!%p8292_p9)
}
  0x32   :  { %71 = dma.hbm_to_vmem [thread:$0]  %s10356_s9, 3072, %s66_s16, [#allocation5], %s8304_s7, %s8304_s7, %s8305_s19  }
  0x33   :  { %8296 = dma.done.wait [#allocation3], 3072  }
  0x34   :  { %8297 = vsyncadd [#allocation3], 4294964224 }
  0x35   :  { %8298 = dma.done.wait [#allocation5], 5120  }
  0x36   :  { %8299 = vsyncadd [#allocation5], 4294962176  ;;  %v10365_v0 = vmov 0.0   ;;  %v10363_v1 = vmov 0   ;;  %v94_v2 = vld [vmem:[#allocation2 + $0x8] sm:$0xff]  ;;  %v97_v3 = vld [vmem:[#allocation2 + $0x20] sm:$0xff] }
  0x37   :  { %202 = vmatprep.mubr.f32.mxu1 %v10365_v0  ;;  %408 = vmatprep.mubr.f32.mxu0 %v10365_v0  ;;  %v280_v4 = vld [vmem:[%s10351_s4 + $0x8] sm:$0xff]  ;;  %v8434_v5 = vpack.c.bf16 %v97_v3, %v94_v2  ;;  %v283_v6 = vld [vmem:[%s10351_s4 + $0x20] sm:$0xff]  ;;  %v96_v8 = vld [vmem:[#allocation2 + $0x18] sm:$0xff]  ;;  %vm134_vm0 = vcmask 523264   ;;  %v10367_v61 = vmov 0.0|0.0   ;;  %vm8310_vm1 = vmmov 0  }
  0x38   :  { %8097 = vset.pattern.permute.xlu0 %v10363_v1  ;;  %8098 = vset.pattern.permute.xlu1 %v10363_v1  ;;  %v93_v7 = vld [vmem:[#allocation2] sm:$0xff]  ;;  %v8439_v9 = vpack.c.bf16 %v283_v6, %v280_v4  ;;  %v282_v12 = vld [vmem:[%s10351_s4 + $0x18] sm:$0xff]  ;;  %v103_v15 = vld [vmem:[#allocation2 + $0x50] sm:$0xff] }
  0x39   :  { %v8441_v10 = vpack.c.bf16 %v96_v8, %v93_v7  ;;  %v279_v11 = vld [vmem:[%s10351_s4] sm:$0xff]  ;;  %v100_v13 = vld [vmem:[#allocation2 + $0x38] sm:$0xff]  ;;  %6773 = vmatprep.subr.bf16.mxu1 %v8434_v5  ;;  %v289_v17 = vld [vmem:[%s10351_s4 + $0x50] sm:$0xff] }
  0x3a   :  { %v8450_v14 = vpack.c.bf16 %v282_v12, %v279_v11  ;;  %v286_v16 = vld [vmem:[%s10351_s4 + $0x38] sm:$0xff]  ;;  %6801 = vmatprep.subr.bf16.mxu0 %v8439_v9  ;;  %v8460_v18 = vpack.c.bf16 %v103_v15, %v100_v13  ;;  %v99_v20 = vld [vmem:[#allocation2 + $0x30] sm:$0xff]  ;;  %v102_v21 = vld [vmem:[#allocation2 + $0x48] sm:$0xff] }
  0x3b   :  { %6775 = vmatpush1.bf16.msra.mxu1 %v8441_v10  ;;  %v8462_v19 = vpack.c.bf16 %v289_v17, %v286_v16  ;;  %v285_v22 = vld [vmem:[%s10351_s4 + $0x30] sm:$0xff]  ;;  %v8468_v23 = vpack.c.bf16 %v102_v21, %v99_v20  ;;  %v288_v24 = vld [vmem:[%s10351_s4 + $0x48] sm:$0xff]  ;;  %v109_v26 = vld [vmem:[#allocation2 + $0x80] sm:$0xff] }
  0x3c   :  { %6803 = vmatpush1.bf16.msra.mxu0 %v8450_v14  ;;  %v106_v25 = vld [vmem:[#allocation2 + $0x68] sm:$0xff]  ;;  %6777 = vmatprep.subr.bf16.mxu1 %v8460_v18  ;;  %v8475_v27 = vpack.c.bf16 %v288_v24, %v285_v22  ;;  %v295_v30 = vld [vmem:[%s10351_s4 + $0x80] sm:$0xff]  ;;  %v108_v33 = vld [vmem:[#allocation2 + $0x78] sm:$0xff] }
  0x3d   :  { %6805 = vmatprep.subr.bf16.mxu0 %v8462_v19  ;;  %v8477_v28 = vpack.c.bf16 %v109_v26, %v106_v25  ;;  %v292_v29 = vld [vmem:[%s10351_s4 + $0x68] sm:$0xff]  ;;  %v105_v31 = vld [vmem:[#allocation2 + $0x60] sm:$0xff]  ;;  %v294_v35 = vld [vmem:[%s10351_s4 + $0x78] sm:$0xff] }
  0x3e   :  { %v8485_v32 = vpack.c.bf16 %v295_v30, %v292_v29  ;;  %v291_v34 = vld [vmem:[%s10351_s4 + $0x60] sm:$0xff]  ;;  %v8494_v36 = vpack.c.bf16 %v108_v33, %v105_v31  ;;  %v112_v37 = vld [vmem:[#allocation2 + $0x98] sm:$0xff]  ;;  %v115_v38 = vld [vmem:[#allocation2 + $0xb0] sm:$0xff] }
  0x3f   :  { %6779 = vmatpush1.bf16.msra.mxu1 %v8468_v23  ;;  %v298_v39 = vld [vmem:[%s10351_s4 + $0x98] sm:$0xff]  ;;  %v8501_v40 = vpack.c.bf16 %v294_v35, %v291_v34  ;;  %v8503_v41 = vpack.c.bf16 %v115_v38, %v112_v37  ;;  %v301_v42 = vld [vmem:[%s10351_s4 + $0xb0] sm:$0xff]  ;;  %v114_v44 = vld [vmem:[#allocation2 + $0xa8] sm:$0xff] }
  0x40   :  { %6807 = vmatpush1.bf16.msra.mxu0 %v8475_v27  ;;  %6781 = vmatprep.subr.bf16.mxu1 %v8477_v28  ;;  %v111_v43 = vld [vmem:[#allocation2 + $0x90] sm:$0xff]  ;;  %v8509_v45 = vpack.c.bf16 %v301_v42, %v298_v39  ;;  %v300_v47 = vld [vmem:[%s10351_s4 + $0xa8] sm:$0xff]  ;;  %v307_v49 = vld [vmem:[%s10351_s4 + $0xe0] sm:$0xff] }
  0x41   :  { %6809 = vmatprep.subr.bf16.mxu0 %v8485_v32  ;;  %v297_v46 = vld [vmem:[%s10351_s4 + $0x90] sm:$0xff]  ;;  %v304_v48 = vld [vmem:[%s10351_s4 + $0xc8] sm:$0xff]  ;;  %v8524_v50 = vpack.c.bf16 %v114_v44, %v111_v43  ;;  %v303_v55 = vld [vmem:[%s10351_s4 + $0xc0] sm:$0xff] }
  0x42   :  { %v8528_v51 = vpack.c.bf16 %v300_v47, %v297_v46  ;;  %v95_v52 = vld [vmem:[#allocation2 + $0x10] sm:$0xff]  ;;  %v98_v53 = vld [vmem:[#allocation2 + $0x28] sm:$0xff]  ;;  %v8531_v54 = vpack.c.bf16 %v307_v49, %v304_v48  ;;  %v306_v56 = vld [vmem:[%s10351_s4 + $0xd8] sm:$0xff] }
  0x43   :  { %6783 = vmatpush1.bf16.msra.mxu1 %v8494_v36  ;;  %v310_v57 = vld [vmem:[%s10351_s4 + $0xf8] sm:$0xff]  ;;  %v313_v58 = vld [vmem:[%s10351_s4 + $0x110] sm:$0xff]  ;;  %v92_v59 = vld [vmem:[%s10347_s0] sm:$0x3]  ;;  %v8549_v60 = vpack.c.bf16 %v98_v53, %v95_v52  ;;  %v8553_v62 = vpack.c.bf16 %v306_v56, %v303_v55 }
  0x44   :  { %6811 = vmatpush1.bf16.msra.mxu0 %v8501_v40  ;;  %6785 = vmatprep.subr.bf16.mxu1 %v8503_v41  ;;  %v101_v63 = vld [vmem:[#allocation2 + $0x40] sm:$0xff]  ;;  %v104_v2 = vld [vmem:[#allocation2 + $0x58] sm:$0xff]  ;;  %v8556_v3 = vpack.c.bf16 %v313_v58, %v310_v57  ;;  %v309_v4 = vld [vmem:[%s10351_s4 + $0xf0] sm:$0xff] }
  0x45   :  { %6813 = vmatprep.subr.bf16.mxu0 %v8509_v45  ;;  %v312_v6 = vld [vmem:[%s10351_s4 + $0x108] sm:$0xff]  ;;  %v319_v8 = vld [vmem:[%s10351_s4 + $0x140] sm:$0xff]  ;;  %v8572_v11 = vpack.c.bf16 %v104_v2, %v101_v63  ;;  %v107_v13 = vld [vmem:[#allocation2 + $0x70] sm:$0xff] }
  0x46   :  { %v316_v7 = vld [vmem:[%s10351_s4 + $0x128] sm:$0xff]  ;;  %v8578_v12 = vpack.c.bf16 %v312_v6, %v309_v4  ;;  %v315_v17 = vld [vmem:[%s10351_s4 + $0x120] sm:$0xff]  ;;  %v318_v20 = vld [vmem:[%s10351_s4 + $0x138] sm:$0xff] }
  0x47   :  { %6787 = vmatpush1.bf16.msra.mxu1 %v8524_v50  ;;  %v110_v15 = vld [vmem:[#allocation2 + $0x88] sm:$0xff]  ;;  %v8581_v16 = vpack.c.bf16 %v319_v8, %v316_v7  ;;  %v322_v21 = vld [vmem:[%s10351_s4 + $0x158] sm:$0xff]  ;;  %v325_v22 = vld [vmem:[%s10351_s4 + $0x170] sm:$0xff]  ;;  %v8605_v26 = vpack.c.bf16 %v318_v20, %v315_v17 }
  0x48   :  { %6815 = vmatpush1.bf16.msra.mxu0 %v8528_v51  ;;  %6788 = vmatprep.subr.bf16.mxu1 %v10367_v61  ;;  %v8596_v24 = vpack.c.bf16 %v110_v15, %v107_v13  ;;  %v8601_v25 = vld [vmem:[%s10349_s2] sm:$0x3]  ;;  %v116_v30 = vld [vmem:[#allocation2 + $0xb8] sm:$0xff]  ;;  %v8609_v31 = vpack.c.bf16 %v325_v22, %v322_v21  ;;  %v321_v33 = vld [vmem:[%s10351_s4 + $0x150] sm:$0xff]  ;;  %v119_v22 = vlaneseq }
  0x49   :  { %6817 = vmatprep.subr.bf16.mxu0 %v8531_v54  ;;  %v113_v29 = vld [vmem:[#allocation2 + $0xa0] sm:$0xff]  ;;  %vm505_vm2 = vcmp.eq.s32.totalorder %v8601_v25, 0  ;;  %v324_v34 = vld [vmem:[%s10351_s4 + $0x168] sm:$0xff]  ;;  %v281_v39 = vld [vmem:[%s10351_s4 + $0x10] sm:$0xff]  ;;  %vm819_vm3 = vcmp.eq.s32.totalorder %v8601_v25, 1  ;;  %vm1133_vm4 = vcmp.eq.s32.totalorder %v8601_v25, 2 }
  0x4a   :  { %5347 = vmatmul.mubr.msk.f32.vlgmr.msra.gmra.mrb[0].mxu1 %vm134_vm0, %v92_v59  ;;  %v506_v35 = vsel %vm505_vm2, 1, %v10363_v1  ;;  %v8619_v37 = vpack.c.bf16 %v116_v30, %v113_v29  ;;  %v8623_v38 = vpack.c.bf16 %v324_v34, %v321_v33  ;;  %v284_v42 = vld [vmem:[%s10351_s4 + $0x28] sm:$0xff]  ;;  %v287_v44 = vld [vmem:[%s10351_s4 + $0x40] sm:$0xff]  ;;  %v290_v46 = vld [vmem:[%s10351_s4 + $0x58] sm:$0xff]  ;;  %v820_v21 = vsel %vm819_vm3, 1, %v10363_v1 }
  0x4b   :  { %6790 = vmatpush3.bf16.msra.mxu1 %v8549_v60  ;;  %5876 = vmatprep.mubr.msk.f32.mxu1 %vm8310_vm1, %v10365_v0  ;;  %v8633_v43 = vpack.c.bf16 %v284_v42, %v281_v39  ;;  %v8647_v47 = vpack.c.bf16 %v290_v46, %v287_v44  ;;  %v293_v48 = vld [vmem:[%s10351_s4 + $0x70] sm:$0xff]  ;;  %v296_v49 = vld [vmem:[%s10351_s4 + $0x88] sm:$0xff]  ;;  %v299_v53 = vld [vmem:[%s10351_s4 + $0xa0] sm:$0xff]  ;;  %v120_v29 = vshrl.u32 %v119_v22, 7  ;;  %vm1447_vm5 = vcmp.eq.s32.totalorder %v8601_v25, 3 }
  0x4c   :  { %6819 = vmatpush1.bf16.msra.mxu0 %v8553_v62  ;;  %6791 = vmatprep.subr.bf16.mxu1 %v10367_v61  ;;  %v8662_v52 = vpack.c.bf16 %v296_v49, %v293_v48  ;;  %v302_v55 = vld [vmem:[%s10351_s4 + $0xb8] sm:$0xff]  ;;  %v305_v57 = vld [vmem:[%s10351_s4 + $0xd0] sm:$0xff]  ;;  %v308_v58 = vld [vmem:[%s10351_s4 + $0xe8] sm:$0xff]  ;;  %vm1761_vm6 = vcmp.eq.s32.totalorder %v8601_v25, 4  ;;  %vm2075_vm7 = vcmp.eq.s32.totalorder %v8601_v25, 5 }
  0x4d   :  { %6821 = vmatprep.subr.bf16.mxu0 %v8556_v3  ;;  %508 = vperm.xlu0 %8097, %v506_v35   ;;  %v8674_v56 = vpack.c.bf16 %v302_v55, %v299_v53  ;;  %v311_v63 = vld [vmem:[%s10351_s4 + $0x100] sm:$0xff]  ;;  %v314_v2 = vld [vmem:[%s10351_s4 + $0x118] sm:$0xff]  ;;  %v317_v6 = vld [vmem:[%s10351_s4 + $0x130] sm:$0xff]  ;;  %v8776_v34 = vsub.s32 0, %v120_v29  ;;  %v8781_v39 = vsub.s32 1, %v120_v29 }
  0x4e   :  { %v8698_v4 = vpack.c.bf16 %v314_v2, %v311_v63  ;;  %v320_v7 = vld [vmem:[%s10351_s4 + $0x148] sm:$0xff]  ;;  %v323_v13 = vld [vmem:[%s10351_s4 + $0x160] sm:$0xff]  ;;  %v326_v15 = vld [vmem:[%s10351_s4 + $0x178] sm:$0xff] }
  0x4f   :  { %6793 = vmatpush3.bf16.msra.mxu1 %v8572_v11  ;;  %v8708_v8 = vpack.c.bf16 %v320_v7, %v317_v6  ;;  %v8718_v17 = vpack.c.bf16 %v326_v15, %v323_v13  ;;  %v5351_v20 = vld [vmem:[%s10347_s0 + $0x2] sm:$0x3]  ;;  %10383 = vst [vmem:[#allocation9_spill] sm:$0xff] %v8776_v34  ;;  %10384 = vst [vmem:[#allocation10_spill] sm:$0xff] %v8781_v39 }
  0x50   :  { %6823 = vmatpush1.bf16.msra.mxu0 %v8578_v12  ;;  %6794 = vmatprep.subr.bf16.mxu1 %v10367_v61  ;;  %v117_v35 = vld [vmem:[%s10352_s5] sm:$0x7] }
  0x51   :  { %6825 = vmatprep.subr.bf16.mxu0 %v8581_v16  ;;  %822 = vperm.xlu0 %8097, %v820_v21   ;;  %v8784_v42 = vrot.slane %v117_v35, %v8776_v34  ;;  %v327_v44 = vld [vmem:[%s10353_s6] sm:$0x7]  ;;  %v8790_v46 = vrot.slane %v117_v35, %v8781_v39 }
  0x52   :  { %v8794_v49 = vrot.slane %v327_v44, %v8776_v34  ;;  %v8798_v55 = vrot.slane %v327_v44, %v8781_v39 }
  0x53   :  { %6796 = vmatpush3.bf16.msra.mxu1 %v8596_v24 }
  0x54   :  { %6827 = vmatpush1.bf16.msra.mxu0 %v8605_v26  ;;  %6797 = vmatprep.subr.bf16.mxu1 %v10367_v61 }
  0x55   :  { %6829 = vmatprep.subr.bf16.mxu0 %v8609_v31 }
  0x57   :  { %6799 = vmatpush3.bf16.msra.mxu1 %v8619_v37 }
  0x58   :  { %6831 = vmatpush1.bf16.msra.mxu0 %v8623_v38  ;;  %6832 = vmatprep.subr.bf16.mxu1 %v10367_v61 }
  0x59   :  { %6857 = vmatprep.subr.bf16.mxu0 %v8434_v5 }
  0x5a   :  { %5877 = vmatmul.mubr.msk.f32.vlgmr.msra.gmra.mrb[2].mxu1 %vm134_vm0, %v92_v59  ;;  %v8686_v59 = vpack.c.bf16 %v308_v58, %v305_v57 }
  0x5b   :  { %409 = vmatmul.mubr.f32.vlgmr.msra.gmra.mrb[0].mxu0 %v10365_v0  ;;  %6834 = vmatpush3.bf16.msra.mxu1 %v8633_v43 }
  0x5c   :  { %6835 = vmatprep.subr.bf16.mxu1 %v10367_v61  ;;  %5911 = vmatprep.mubr.msk.f32.mxu1 %vm8310_vm1, %v10365_v0 }
  0x5d   :  { %6859 = vmatpush1.bf16.msra.mxu0 %v8441_v10  ;;  %581 = vmatprep.mubr.f32.mxu0 %v10365_v0 }
  0x5e   :  { %6861 = vmatprep.subr.bf16.mxu0 %v8460_v18 }
  0x5f   :  { %6837 = vmatpush3.bf16.msra.mxu1 %v8647_v47 }
  0x60   :  { %6838 = vmatprep.subr.bf16.mxu1 %v10367_v61 }
  0x61   :  { %6863 = vmatpush1.bf16.msra.mxu0 %v8468_v23 }
  0x62   :  { %6865 = vmatprep.subr.bf16.mxu0 %v8477_v28 }
  0x63   :  { %6840 = vmatpush3.bf16.msra.mxu1 %v8662_v52 }
  0x64   :  { %6841 = vmatprep.subr.bf16.mxu1 %v10367_v61 }
  0x65   :  { %6867 = vmatpush1.bf16.msra.mxu0 %v8494_v36 }
  0x66   :  { %6869 = vmatprep.subr.bf16.mxu0 %v8503_v41 }
  0x67   :  { %6843 = vmatpush3.bf16.msra.mxu1 %v8674_v56 }
  0x68   :  { %6844 = vmatprep.subr.bf16.mxu1 %v10367_v61 }
  0x69   :  { %6871 = vmatpush1.bf16.msra.mxu0 %v8524_v50 }
  0x6a   :  { %6885 = vmatprep.subr.bf16.mxu0 %v8439_v9 }
  0x6b   :  { %6846 = vmatpush3.bf16.msra.mxu1 %v8686_v59 }
  0x6c   :  { %6847 = vmatprep.subr.bf16.mxu1 %v10367_v61  ;;  %5352 = vmatmul.mubr.msk.f32.vlgmr.msra.gmra.mrb[2].mxu0 %vm134_vm0, %v5351_v20 }
  0x6d   :  { %6887 = vmatpush1.bf16.msra.mxu0 %v8450_v14  ;;  %722 = vmatprep.mubr.f32.mxu0 %v10365_v0 }
  0x6e   :  { %6889 = vmatprep.subr.bf16.mxu0 %v8462_v19 }
  0x6f   :  { %6849 = vmatpush3.bf16.msra.mxu1 %v8698_v4 }
  0x70   :  { %6850 = vmatprep.subr.bf16.mxu1 %v10367_v61 }
  0x71   :  { %6891 = vmatpush1.bf16.msra.mxu0 %v8475_v27 }
  0x72   :  { %6893 = vmatprep.subr.bf16.mxu0 %v8485_v32 }
  0x73   :  { %6852 = vmatpush3.bf16.msra.mxu1 %v8708_v8 }
  0x74   :  { %6853 = vmatprep.subr.bf16.mxu1 %v10367_v61 }
  0x75   :  { %6895 = vmatpush1.bf16.msra.mxu0 %v8501_v40 }
  0x76   :  { %6897 = vmatprep.subr.bf16.mxu0 %v8509_v45 }
  0x77   :  { %6855 = vmatpush3.bf16.msra.mxu1 %v8718_v17 }
  0x78   :  { %6872 = vmatprep.subr.bf16.mxu1 %v10367_v61 }
  0x79   :  { %6899 = vmatpush1.bf16.msra.mxu0 %v8528_v51 }
  0x7a   :  { %5912 = vmatmul.mubr.f32.vlgmr.msra.gmra.mrb[4].mxu1 %v10365_v0  ;;  %6901 = vmatprep.subr.bf16.mxu0 %v8531_v54 }
  0x7b   :  { %6874 = vmatpush3.bf16.msra.mxu1 %v8549_v60  ;;  %5930 = vmatprep.mubr.msk.f32.mxu1 %vm8310_vm1, %v10365_v0 }
  0x7c   :  { %6875 = vmatprep.subr.bf16.mxu1 %v10367_v61 }
  0x7d   :  { %6903 = vmatpush1.bf16.msra.mxu0 %v8553_v62 }
  0x7e   :  { %6905 = vmatprep.subr.bf16.mxu0 %v8556_v3 }
  0x7f   :  { %6877 = vmatpush3.bf16.msra.mxu1 %v8572_v11 }
  0x80   :  { %6878 = vmatprep.subr.bf16.mxu1 %v10367_v61 }
  0x81   :  { %6907 = vmatpush1.bf16.msra.mxu0 %v8578_v12 }
  0x82   :  { %6909 = vmatprep.subr.bf16.mxu0 %v8581_v16 }
  0x83   :  { %6880 = vmatpush3.bf16.msra.mxu1 %v8596_v24 }
  0x84   :  { %6881 = vmatprep.subr.bf16.mxu1 %v10367_v61 }
  0x85   :  { %6911 = vmatpush1.bf16.msra.mxu0 %v8605_v26 }
  0x86   :  { %6913 = vmatprep.subr.bf16.mxu0 %v8609_v31 }
  0x87   :  { %6883 = vmatpush3.bf16.msra.mxu1 %v8619_v37 }
  0x88   :  { %6916 = vmatprep.subr.bf16.mxu1 %v10367_v61 }
  0x89   :  { %6915 = vmatpush1.bf16.msra.mxu0 %v8623_v38 }
  0x8a   :  { %5931 = vmatmul.mubr.msk.f32.vlgmr.msra.gmra.mrb[6].mxu1 %vm134_vm0, %v5351_v20  ;;  %6941 = vmatprep.subr.bf16.mxu0 %v8434_v5 }
  0x8b   :  { %6918 = vmatpush3.bf16.msra.mxu1 %v8633_v43  ;;  %5965 = vmatprep.mubr.msk.f32.mxu1 %vm8310_vm1, %v10365_v0 }
  0x8c   :  { %6919 = vmatprep.subr.bf16.mxu1 %v10367_v61 }
  0x8f   :  { %6921 = vmatpush3.bf16.msra.mxu1 %v8647_v47 }
  0x90   :  { %6922 = vmatprep.subr.bf16.mxu1 %v10367_v61 }
  0x93   :  { %6924 = vmatpush3.bf16.msra.mxu1 %v8662_v52 }
  0x94   :  { %6925 = vmatprep.subr.bf16.mxu1 %v10367_v61 }
  0x97   :  { %6927 = vmatpush3.bf16.msra.mxu1 %v8674_v56 }
  0x98   :  { %6928 = vmatprep.subr.bf16.mxu1 %v10367_v61 }
  0x9b   :  { %6930 = vmatpush3.bf16.msra.mxu1 %v8686_v59 }
  0x9c   :  { %6931 = vmatprep.subr.bf16.mxu1 %v10367_v61 }
  0x9f   :  { %6933 = vmatpush3.bf16.msra.mxu1 %v8698_v4 }
  0xa0   :  { %6934 = vmatprep.subr.bf16.mxu1 %v10367_v61 }
  0xa3   :  { %6936 = vmatpush3.bf16.msra.mxu1 %v8708_v8 }
  0xa4   :  { %6937 = vmatprep.subr.bf16.mxu1 %v10367_v61 }
  0xa7   :  { %6939 = vmatpush3.bf16.msra.mxu1 %v8718_v17 }
  0xa8   :  { %6956 = vmatprep.subr.bf16.mxu1 %v10367_v61 }
 0x11d   :  { %v204_v30 = vpop.f32.mrb[0].mxu1 }
 0x11e   :  { %v206_v33 = vpop.f32.mrb[1].mxu1  ;;  %v205_v48 = vadd.f32 %v204_v30, %v8784_v42 }
 0x11f   :  { %v207_v53 = vadd.f32 %v206_v33, %v8790_v46  ;;  %v8802_v33 = vsub.s32 2, %v120_v29 }
 0x120   :  { %v8009_v58 = vadd.f32 %v8794_v49, %v205_v48 }
 0x121   :  { %v8012_v6 = vadd.f32 %v8798_v55, %v207_v53  ;;  %10385 = vst [vmem:[#allocation11_spill] sm:$0xff] %v8802_v33  ;;  %v8805_v1 = vrot.slane %v327_v44, %v8802_v33  ;;  %v8808_v48 = vrot.slane %v117_v35, %v8802_v33 }
 0x12d   :  { %v275_v57 = vpop.f32.mrb[2].mxu1 }
 0x12e   :  { %v410_v63 = vpop.f32.mrb[0].mxu0  ;;  %v5878_v2 = vpop.f32.mrb[3].mxu1 }
 0x12f   :  { %v8010_v7 = vadd.f32 %v8009_v58, %v410_v63  ;;  %v412_v13 = vpop.f32.mrb[1].mxu0 }
 0x130   :  { %v8013_v15 = vadd.f32 %v8012_v6, %v412_v13 }
 0x131   :  { %v5349_v20 = vmul.f32 -1.442695, %v8010_v7  ;;  %v276_v7 = vadd.f32 %v275_v57, %v8808_v48 }
 0x132   :  { %v5350_v22 = vmul.f32 -1.442695, %v8013_v15 }
 0x133   :  { %8099 = vpow2.f32 %v5349_v20 }
 0x134   :  { %8101 = vpow2.f32 %v5350_v22 }
 0x13d   :  { %v8100_v21 = vpop.eup %8099 }
 0x13e   :  { %v493_v30 = vadd.f32 1.0, %v8100_v21  ;;  %v8102_v53 = vpop.eup %8101 }
 0x13f   :  { %v494_v15 = vadd.f32 1.0, %v8102_v53  ;;  %v10386_v53 = vmov 0  }
 0x140   :  { %8103 = vrcp.f32 %v493_v30 }
 0x14a   :  { %v8104_v6 = vpop.eup %8103 }
 0x14d   :  { %v481_v2 = vpop.f32.mrb[4].mxu1 }
 0x14e   :  { %v482_v58 = vadd.f32 %v481_v2, %v8805_v1  ;;  %v5913_v63 = vpop.f32.mrb[5].mxu1  ;;  %v5356_v2 = vld [vmem:[%s10347_s0 + $0x4] sm:$0x3] }
 0x14f   :  { %v8879_v63 = vadd.f32 %v8794_v49, %v8784_v42 }
 0x150   :  { %v499_v13 = vmul.f32 %v8104_v6, %v482_v58  ;;  %v1134_v58 = vsel %vm1133_vm4, 1, %v10386_v53 }
 0x151   :  { %1136 = vperm.xlu1 %8098, %v1134_v58  }
 0x152   :  { %v500_v20 = vadd.f32 %v499_v13, %v276_v7 }
 0x154   :  { %8105 = vtanh.f32 %v500_v20 }
 0x155   :  { %8107 = vrcp.f32 %v494_v15 }
 0x15d   :  { %v654_v35 = vpop.f32.mrb[6].mxu1 }
 0x15e   :  { %v8106_v29 = vpop.eup %8105  ;;  %v5932_v57 = vpop.f32.mrb[7].mxu1 }
 0x15f   :  { %v502_v21 = vsub.f32 0.0, %v8106_v29  ;;  %v8108_v44 = vpop.eup %8107 }
 0x161   :  { %v503_v22 = vmul.f32 %v8108_v44, %v502_v21  ;;  %v8884_v21 = vadd.f32 %v8798_v55, %v8790_v46 }
 0x163   :  { %v8812_v30 = vadd.f32 %v8106_v29, %v503_v22 }
 0x165   :  { %723 = vmatmul.mubr.f32.vlgmr.msra.gmra.mrb[2].mxu0 %v8812_v30  ;;  %5966 = vmatmul.mubr.f32.vlgmr.msra.gmra.mrb[8].mxu1 %v8812_v30 }
 0x166   :  { %6943 = vmatpush1.bf16.msra.mxu0 %v8441_v10  ;;  %6958 = vmatpush3.bf16.msra.mxu1 %v8549_v60 }
 0x167   :  { %6945 = vmatprep.subr.bf16.mxu0 %v8460_v18  ;;  %6959 = vmatprep.subr.bf16.mxu1 %v10367_v61 }
 0x168   :  { %895 = vmatprep.mubr.f32.mxu0 %v10365_v0  ;;  %5984 = vmatprep.mubr.msk.f32.mxu1 %vm8310_vm1, %v10365_v0 }
 0x16a   :  { %6947 = vmatpush1.bf16.msra.mxu0 %v8468_v23  ;;  %6961 = vmatpush3.bf16.msra.mxu1 %v8572_v11 }
 0x16b   :  { %6949 = vmatprep.subr.bf16.mxu0 %v8477_v28  ;;  %6962 = vmatprep.subr.bf16.mxu1 %v10367_v61 }
 0x16e   :  { %6951 = vmatpush1.bf16.msra.mxu0 %v8494_v36  ;;  %6964 = vmatpush3.bf16.msra.mxu1 %v8596_v24 }
 0x16f   :  { %6953 = vmatprep.subr.bf16.mxu0 %v8503_v41  ;;  %6965 = vmatprep.subr.bf16.mxu1 %v10367_v61 }
 0x172   :  { %6955 = vmatpush1.bf16.msra.mxu0 %v8524_v50  ;;  %6967 = vmatpush3.bf16.msra.mxu1 %v8619_v37 }
 0x173   :  { %6969 = vmatprep.subr.bf16.mxu0 %v8439_v9  ;;  %7000 = vmatprep.subr.bf16.mxu1 %v10367_v61 }
 0x175   :  { %5357 = vmatmul.mubr.msk.f32.vlgmr.msra.gmra.mrb[4].mxu0 %vm134_vm0, %v5356_v2  ;;  %5985 = vmatmul.mubr.msk.f32.vlgmr.msra.gmra.mrb[10].mxu1 %vm134_vm0, %v5356_v2 }
 0x176   :  { %6971 = vmatpush1.bf16.msra.mxu0 %v8450_v14  ;;  %7002 = vmatpush3.bf16.msra.mxu1 %v8633_v43 }
 0x177   :  { %6973 = vmatprep.subr.bf16.mxu0 %v8462_v19  ;;  %7003 = vmatprep.subr.bf16.mxu1 %v10367_v61 }
 0x178   :  { %1036 = vmatprep.mubr.f32.mxu0 %v10365_v0  ;;  %6019 = vmatprep.mubr.msk.f32.mxu1 %vm8310_vm1, %v10365_v0 }
 0x17a   :  { %6975 = vmatpush1.bf16.msra.mxu0 %v8475_v27  ;;  %7005 = vmatpush3.bf16.msra.mxu1 %v8647_v47 }
 0x17b   :  { %6977 = vmatprep.subr.bf16.mxu0 %v8485_v32  ;;  %7006 = vmatprep.subr.bf16.mxu1 %v10367_v61 }
 0x17e   :  { %6979 = vmatpush1.bf16.msra.mxu0 %v8501_v40  ;;  %7008 = vmatpush3.bf16.msra.mxu1 %v8662_v52 }
 0x17f   :  { %6981 = vmatprep.subr.bf16.mxu0 %v8509_v45  ;;  %7009 = vmatprep.subr.bf16.mxu1 %v10367_v61 }
 0x182   :  { %6983 = vmatpush1.bf16.msra.mxu0 %v8528_v51  ;;  %7011 = vmatpush3.bf16.msra.mxu1 %v8674_v56 }
 0x183   :  { %6985 = vmatprep.subr.bf16.mxu0 %v8531_v54  ;;  %7012 = vmatprep.subr.bf16.mxu1 %v10367_v61 }
 0x186   :  { %6987 = vmatpush1.bf16.msra.mxu0 %v8553_v62  ;;  %7014 = vmatpush3.bf16.msra.mxu1 %v8686_v59 }
 0x187   :  { %6989 = vmatprep.subr.bf16.mxu0 %v8556_v3  ;;  %7015 = vmatprep.subr.bf16.mxu1 %v10367_v61 }
 0x18a   :  { %6991 = vmatpush1.bf16.msra.mxu0 %v8578_v12  ;;  %7017 = vmatpush3.bf16.msra.mxu1 %v8698_v4 }
 0x18b   :  { %6993 = vmatprep.subr.bf16.mxu0 %v8581_v16  ;;  %7018 = vmatprep.subr.bf16.mxu1 %v10367_v61 }
 0x18e   :  { %6995 = vmatpush1.bf16.msra.mxu0 %v8605_v26  ;;  %7020 = vmatpush3.bf16.msra.mxu1 %v8708_v8 }
 0x18f   :  { %6997 = vmatprep.subr.bf16.mxu0 %v8609_v31  ;;  %7021 = vmatprep.subr.bf16.mxu1 %v10367_v61 }
 0x192   :  { %6999 = vmatpush1.bf16.msra.mxu0 %v8623_v38  ;;  %7023 = vmatpush3.bf16.msra.mxu1 %v8718_v17 }
 0x193   :  { %7025 = vmatprep.subr.bf16.mxu0 %v8434_v5  ;;  %7040 = vmatprep.subr.bf16.mxu1 %v10367_v61 }
 0x238   :  { %v724_v6 = vpop.f32.mrb[2].mxu0  ;;  %v795_v7 = vpop.f32.mrb[8].mxu1 }
 0x239   :  { %v8015_v13 = vadd.f32 %v8879_v63, %v724_v6  ;;  %v726_v15 = vpop.f32.mrb[3].mxu0  ;;  %v5967_v20 = vpop.f32.mrb[9].mxu1  ;;  %v796_v49 = vadd.f32 %v795_v7, %v8805_v1  ;;  %v655_v6 = vadd.f32 %v654_v35, %v8808_v48 }
 0x23a   :  { %v8017_v44 = vadd.f32 %v8884_v21, %v726_v15 }
 0x23b   :  { %v5354_v29 = vmul.f32 -1.442695, %v8015_v13 }
 0x23c   :  { %v5355_v22 = vmul.f32 -1.442695, %v8017_v44 }
 0x23d   :  { %8109 = vpow2.f32 %v5354_v29 }
 0x23e   :  { %8111 = vpow2.f32 %v5355_v22  ;;  %v5361_v22 = vld [vmem:[%s10347_s0 + $0x6] sm:$0x3] }
 0x247   :  { %v8110_v57 = vpop.eup %8109 }
 0x248   :  { %v807_v2 = vadd.f32 1.0, %v8110_v57  ;;  %v8112_v42 = vpop.eup %8111  ;;  %v968_v35 = vpop.f32.mrb[10].mxu1  ;;  %v1448_v57 = vsel %vm1447_vm5, 1, %v10386_v53 }
 0x249   :  { %v808_v0 = vadd.f32 1.0, %v8112_v42  ;;  %v5986_v7 = vpop.f32.mrb[11].mxu1  ;;  %1450 = vperm.xlu1 %8098, %v1448_v57   ;;  %v969_v57 = vadd.f32 %v968_v35, %v8808_v48 }
 0x24a   :  { %8113 = vrcp.f32 %v807_v2 }
 0x254   :  { %v8114_v58 = vpop.eup %8113 }
 0x255   :  { %v813_v20 = vmul.f32 %v8114_v58, %v796_v49 }
 0x257   :  { %v814_v13 = vadd.f32 %v813_v20, %v655_v6 }
 0x259   :  { %8115 = vtanh.f32 %v814_v13 }
 0x25a   :  { %8117 = vrcp.f32 %v808_v0  ;;  %v10387_v0 = vmov 0.0  }
 0x263   :  { %v8116_v46 = vpop.eup %8115 }
 0x264   :  { %v816_v55 = vsub.f32 %v8812_v30, %v8116_v46  ;;  %v8118_v15 = vpop.eup %8117 }
 0x266   :  { %v817_v29 = vmul.f32 %v8118_v15, %v816_v55 }
 0x268   :  { %v8890_v44 = vadd.f32 %v8116_v46, %v817_v29 }
 0x26a   :  { %1037 = vmatmul.mubr.f32.vlgmr.msra.gmra.mrb[4].mxu0 %v8890_v44  ;;  %6020 = vmatmul.mubr.f32.vlgmr.msra.gmra.mrb[12].mxu1 %v8890_v44 }
 0x26b   :  { %7027 = vmatpush1.bf16.msra.mxu0 %v8441_v10  ;;  %7042 = vmatpush3.bf16.msra.mxu1 %v8549_v60 }
 0x26c   :  { %7029 = vmatprep.subr.bf16.mxu0 %v8460_v18  ;;  %7043 = vmatprep.subr.bf16.mxu1 %v10367_v61 }
 0x26d   :  { %1209 = vmatprep.mubr.f32.mxu0 %v10387_v0  ;;  %6038 = vmatprep.mubr.msk.f32.mxu1 %vm8310_vm1, %v10387_v0 }
 0x26f   :  { %7031 = vmatpush1.bf16.msra.mxu0 %v8468_v23  ;;  %7045 = vmatpush3.bf16.msra.mxu1 %v8572_v11 }
 0x270   :  { %7033 = vmatprep.subr.bf16.mxu0 %v8477_v28  ;;  %7046 = vmatprep.subr.bf16.mxu1 %v10367_v61 }
 0x273   :  { %7035 = vmatpush1.bf16.msra.mxu0 %v8494_v36  ;;  %7048 = vmatpush3.bf16.msra.mxu1 %v8596_v24 }
 0x274   :  { %7037 = vmatprep.subr.bf16.mxu0 %v8503_v41  ;;  %7049 = vmatprep.subr.bf16.mxu1 %v10367_v61 }
 0x277   :  { %7039 = vmatpush1.bf16.msra.mxu0 %v8524_v50  ;;  %7051 = vmatpush3.bf16.msra.mxu1 %v8619_v37 }
 0x278   :  { %7053 = vmatprep.subr.bf16.mxu0 %v8439_v9  ;;  %7084 = vmatprep.subr.bf16.mxu1 %v10367_v61 }
 0x27a   :  { %5362 = vmatmul.mubr.msk.f32.vlgmr.msra.gmra.mrb[6].mxu0 %vm134_vm0, %v5361_v22  ;;  %6039 = vmatmul.mubr.msk.f32.vlgmr.msra.gmra.mrb[14].mxu1 %vm134_vm0, %v5361_v22 }
 0x27b   :  { %7055 = vmatpush1.bf16.msra.mxu0 %v8450_v14  ;;  %7086 = vmatpush3.bf16.msra.mxu1 %v8633_v43 }
 0x27c   :  { %7057 = vmatprep.subr.bf16.mxu0 %v8462_v19  ;;  %7087 = vmatprep.subr.bf16.mxu1 %v10367_v61 }
 0x27d   :  { %1350 = vmatprep.mubr.f32.mxu0 %v10387_v0  ;;  %6073 = vmatprep.mubr.msk.f32.mxu1 %vm8310_vm1, %v10387_v0 }
 0x27f   :  { %7059 = vmatpush1.bf16.msra.mxu0 %v8475_v27  ;;  %7089 = vmatpush3.bf16.msra.mxu1 %v8647_v47 }
 0x280   :  { %7061 = vmatprep.subr.bf16.mxu0 %v8485_v32  ;;  %7090 = vmatprep.subr.bf16.mxu1 %v10367_v61 }
 0x283   :  { %7063 = vmatpush1.bf16.msra.mxu0 %v8501_v40  ;;  %7092 = vmatpush3.bf16.msra.mxu1 %v8662_v52 }
 0x284   :  { %7065 = vmatprep.subr.bf16.mxu0 %v8509_v45  ;;  %7093 = vmatprep.subr.bf16.mxu1 %v10367_v61 }
 0x287   :  { %7067 = vmatpush1.bf16.msra.mxu0 %v8528_v51  ;;  %7095 = vmatpush3.bf16.msra.mxu1 %v8674_v56 }
 0x288   :  { %7069 = vmatprep.subr.bf16.mxu0 %v8531_v54  ;;  %7096 = vmatprep.subr.bf16.mxu1 %v10367_v61 }
 0x28b   :  { %7071 = vmatpush1.bf16.msra.mxu0 %v8553_v62  ;;  %7098 = vmatpush3.bf16.msra.mxu1 %v8686_v59 }
 0x28c   :  { %7073 = vmatprep.subr.bf16.mxu0 %v8556_v3  ;;  %7099 = vmatprep.subr.bf16.mxu1 %v10367_v61 }
 0x28f   :  { %7075 = vmatpush1.bf16.msra.mxu0 %v8578_v12  ;;  %7101 = vmatpush3.bf16.msra.mxu1 %v8698_v4 }
 0x290   :  { %7077 = vmatprep.subr.bf16.mxu0 %v8581_v16  ;;  %7102 = vmatprep.subr.bf16.mxu1 %v10367_v61 }
 0x293   :  { %7079 = vmatpush1.bf16.msra.mxu0 %v8605_v26  ;;  %7104 = vmatpush3.bf16.msra.mxu1 %v8708_v8 }
 0x294   :  { %7081 = vmatprep.subr.bf16.mxu0 %v8609_v31  ;;  %7105 = vmatprep.subr.bf16.mxu1 %v10367_v61 }
 0x297   :  { %7083 = vmatpush1.bf16.msra.mxu0 %v8623_v38  ;;  %7107 = vmatpush3.bf16.msra.mxu1 %v8718_v17 }
 0x298   :  { %7109 = vmatprep.subr.bf16.mxu0 %v8434_v5  ;;  %7124 = vmatprep.subr.bf16.mxu1 %v10367_v61 }
 0x33d   :  { %v1038_v2 = vpop.f32.mrb[4].mxu0  ;;  %v1109_v42 = vpop.f32.mrb[12].mxu1 }
 0x33e   :  { %v8019_v49 = vadd.f32 %v8879_v63, %v1038_v2  ;;  %v1040_v58 = vpop.f32.mrb[5].mxu0  ;;  %v6021_v6 = vpop.f32.mrb[13].mxu1  ;;  %v1110_v7 = vadd.f32 %v1109_v42, %v8805_v1  ;;  %v5366_v42 = vld [vmem:[%s10347_s0 + $0x8] sm:$0x3] }
 0x33f   :  { %v8021_v13 = vadd.f32 %v8884_v21, %v1040_v58 }
 0x340   :  { %v5359_v20 = vmul.f32 -1.442695, %v8019_v49 }
 0x341   :  { %v5360_v46 = vmul.f32 -1.442695, %v8021_v13 }
 0x342   :  { %8119 = vpow2.f32 %v5359_v20 }
 0x343   :  { %8121 = vpow2.f32 %v5360_v46  ;;  %v1762_v46 = vsel %vm1761_vm6, 1, %v10386_v53 }
 0x344   :  { %1764 = vperm.xlu0 %8097, %v1762_v46  }
 0x34c   :  { %v8120_v55 = vpop.eup %8119 }
 0x34d   :  { %v1121_v15 = vadd.f32 1.0, %v8120_v55  ;;  %v8122_v29 = vpop.eup %8121 }
 0x34e   :  { %v1122_v2 = vadd.f32 1.0, %v8122_v29 }
 0x34f   :  { %8123 = vrcp.f32 %v1121_v15 }
 0x359   :  { %v8124_v22 = vpop.eup %8123 }
 0x35a   :  { %v1127_v61 = vmul.f32 %v8124_v22, %v1110_v7 }
 0x35c   :  { %v1128_v33 = vadd.f32 %v1127_v61, %v969_v57  ;;  %v10388_v61 = vmov 0.0|0.0  }
 0x35e   :  { %8125 = vtanh.f32 %v1128_v33  ;;  %v1282_v33 = vpop.f32.mrb[14].mxu1 }
 0x35f   :  { %8127 = vrcp.f32 %v1122_v2  ;;  %v6040_v35 = vpop.f32.mrb[15].mxu1  ;;  %v1283_v46 = vadd.f32 %v1282_v33, %v8808_v48  ;;  %v5371_v33 = vld [vmem:[%s10347_s0 + $0xa] sm:$0x3] }
 0x368   :  { %v8126_v49 = vpop.eup %8125 }
 0x369   :  { %v1130_v6 = vsub.f32 %v8890_v44, %v8126_v49  ;;  %v8128_v58 = vpop.eup %8127 }
 0x36b   :  { %v1131_v20 = vmul.f32 %v8128_v58, %v1130_v6 }
 0x36d   :  { %v8960_v13 = vadd.f32 %v8126_v49, %v1131_v20 }
 0x36f   :  { %1351 = vmatmul.mubr.f32.vlgmr.msra.gmra.mrb[6].mxu0 %v8960_v13  ;;  %6074 = vmatmul.mubr.f32.vlgmr.msra.gmra.mrb[16].mxu1 %v8960_v13 }
 0x370   :  { %7111 = vmatpush1.bf16.msra.mxu0 %v8441_v10  ;;  %7126 = vmatpush3.bf16.msra.mxu1 %v8549_v60 }
 0x371   :  { %7113 = vmatprep.subr.bf16.mxu0 %v8460_v18  ;;  %7127 = vmatprep.subr.bf16.mxu1 %v10388_v61 }
 0x372   :  { %1523 = vmatprep.mubr.f32.mxu0 %v10387_v0  ;;  %6092 = vmatprep.mubr.msk.f32.mxu1 %vm8310_vm1, %v10387_v0 }
 0x374   :  { %7115 = vmatpush1.bf16.msra.mxu0 %v8468_v23  ;;  %7129 = vmatpush3.bf16.msra.mxu1 %v8572_v11 }
 0x375   :  { %7117 = vmatprep.subr.bf16.mxu0 %v8477_v28  ;;  %7130 = vmatprep.subr.bf16.mxu1 %v10388_v61 }
 0x378   :  { %7119 = vmatpush1.bf16.msra.mxu0 %v8494_v36  ;;  %7132 = vmatpush3.bf16.msra.mxu1 %v8596_v24 }
 0x379   :  { %7121 = vmatprep.subr.bf16.mxu0 %v8503_v41  ;;  %7133 = vmatprep.subr.bf16.mxu1 %v10388_v61 }
 0x37c   :  { %7123 = vmatpush1.bf16.msra.mxu0 %v8524_v50  ;;  %7135 = vmatpush3.bf16.msra.mxu1 %v8619_v37 }
 0x37d   :  { %7137 = vmatprep.subr.bf16.mxu0 %v8439_v9  ;;  %7168 = vmatprep.subr.bf16.mxu1 %v10388_v61 }
 0x37f   :  { %5367 = vmatmul.mubr.msk.f32.vlgmr.msra.gmra.mrb[8].mxu0 %vm134_vm0, %v5366_v42  ;;  %6093 = vmatmul.mubr.msk.f32.vlgmr.msra.gmra.mrb[18].mxu1 %vm134_vm0, %v5366_v42 }
 0x380   :  { %7139 = vmatpush1.bf16.msra.mxu0 %v8450_v14  ;;  %7170 = vmatpush3.bf16.msra.mxu1 %v8633_v43 }
 0x381   :  { %7141 = vmatprep.subr.bf16.mxu0 %v8462_v19  ;;  %7171 = vmatprep.subr.bf16.mxu1 %v10388_v61 }
 0x382   :  { %1664 = vmatprep.mubr.f32.mxu0 %v10387_v0  ;;  %6127 = vmatprep.mubr.msk.f32.mxu1 %vm8310_vm1, %v10387_v0 }
 0x384   :  { %7143 = vmatpush1.bf16.msra.mxu0 %v8475_v27  ;;  %7173 = vmatpush3.bf16.msra.mxu1 %v8647_v47 }
 0x385   :  { %7145 = vmatprep.subr.bf16.mxu0 %v8485_v32  ;;  %7174 = vmatprep.subr.bf16.mxu1 %v10388_v61 }
 0x388   :  { %7147 = vmatpush1.bf16.msra.mxu0 %v8501_v40  ;;  %7176 = vmatpush3.bf16.msra.mxu1 %v8662_v52 }
 0x389   :  { %7149 = vmatprep.subr.bf16.mxu0 %v8509_v45  ;;  %7177 = vmatprep.subr.bf16.mxu1 %v10388_v61 }
 0x38c   :  { %7151 = vmatpush1.bf16.msra.mxu0 %v8528_v51  ;;  %7179 = vmatpush3.bf16.msra.mxu1 %v8674_v56 }
 0x38d   :  { %7153 = vmatprep.subr.bf16.mxu0 %v8531_v54  ;;  %7180 = vmatprep.subr.bf16.mxu1 %v10388_v61 }
 0x390   :  { %7155 = vmatpush1.bf16.msra.mxu0 %v8553_v62  ;;  %7182 = vmatpush3.bf16.msra.mxu1 %v8686_v59 }
 0x391   :  { %7157 = vmatprep.subr.bf16.mxu0 %v8556_v3  ;;  %7183 = vmatprep.subr.bf16.mxu1 %v10388_v61 }
 0x394   :  { %7159 = vmatpush1.bf16.msra.mxu0 %v8578_v12  ;;  %7185 = vmatpush3.bf16.msra.mxu1 %v8698_v4 }
 0x395   :  { %7161 = vmatprep.subr.bf16.mxu0 %v8581_v16  ;;  %7186 = vmatprep.subr.bf16.mxu1 %v10388_v61 }
 0x398   :  { %7163 = vmatpush1.bf16.msra.mxu0 %v8605_v26  ;;  %7188 = vmatpush3.bf16.msra.mxu1 %v8708_v8 }
 0x399   :  { %7165 = vmatprep.subr.bf16.mxu0 %v8609_v31  ;;  %7189 = vmatprep.subr.bf16.mxu1 %v10388_v61 }
 0x39c   :  { %7167 = vmatpush1.bf16.msra.mxu0 %v8623_v38  ;;  %7191 = vmatpush3.bf16.msra.mxu1 %v8718_v17 }
 0x39d   :  { %7193 = vmatprep.subr.bf16.mxu0 %v8434_v5  ;;  %7208 = vmatprep.subr.bf16.mxu1 %v10388_v61 }
 0x442   :  { %v1352_v55 = vpop.f32.mrb[6].mxu0  ;;  %v1423_v15 = vpop.f32.mrb[16].mxu1 }
 0x443   :  { %v8023_v29 = vadd.f32 %v8879_v63, %v1352_v55  ;;  %v1354_v7 = vpop.f32.mrb[7].mxu0  ;;  %v6075_v22 = vpop.f32.mrb[17].mxu1  ;;  %v1424_v35 = vadd.f32 %v1423_v15, %v8805_v1  ;;  %v2076_v15 = vsel %vm2075_vm7, 1, %v10386_v53 }
 0x444   :  { %v8025_v2 = vadd.f32 %v8884_v21, %v1354_v7  ;;  %2078 = vperm.xlu1 %8098, %v2076_v15  }
 0x445   :  { %v5364_v57 = vmul.f32 -1.442695, %v8023_v29 }
 0x446   :  { %v5365_v49 = vmul.f32 -1.442695, %v8025_v2 }
 0x447   :  { %8129 = vpow2.f32 %v5364_v57 }
 0x448   :  { %8131 = vpow2.f32 %v5365_v49 }
 0x451   :  { %v8130_v6 = vpop.eup %8129 }
 0x452   :  { %v1435_v58 = vadd.f32 1.0, %v8130_v6  ;;  %v8132_v20 = vpop.eup %8131 }
 0x453   :  { %v1436_v55 = vadd.f32 1.0, %v8132_v20 }
 0x454   :  { %8133 = vrcp.f32 %v1435_v58 }
 0x45e   :  { %v8134_v42 = vpop.eup %8133 }
 0x45f   :  { %v1441_v39 = vmul.f32 %v8134_v42, %v1424_v35 }
 0x461   :  { %v1442_v34 = vadd.f32 %v1441_v39, %v1283_v46 }
 0x463   :  { %8135 = vtanh.f32 %v1442_v34  ;;  %v1596_v34 = vpop.f32.mrb[18].mxu1 }
 0x464   :  { %8137 = vrcp.f32 %v1436_v55  ;;  %v6094_v39 = vpop.f32.mrb[19].mxu1 }
 0x465   :  { %v1597_v39 = vadd.f32 %v1596_v34, %v8808_v48 }
 0x46d   :  { %v8136_v29 = vpop.eup %8135 }
 0x46e   :  { %v1444_v22 = vsub.f32 %v8960_v13, %v8136_v29  ;;  %v8138_v7 = vpop.eup %8137 }
 0x470   :  { %v1445_v57 = vmul.f32 %v8138_v7, %v1444_v22 }
 0x472   :  { %v9030_v2 = vadd.f32 %v8136_v29, %v1445_v57 }
 0x474   :  { %10389 = vst [vmem:[#allocation12_spill] sm:$0xff] %v9030_v2  ;;  %1665 = vmatmul.mubr.f32.vlgmr.msra.gmra.mrb[8].mxu0 %v9030_v2  ;;  %6128 = vmatmul.mubr.f32.vlgmr.msra.gmra.mrb[20].mxu1 %v9030_v2 }
 0x475   :  { %7195 = vmatpush1.bf16.msra.mxu0 %v8441_v10  ;;  %7210 = vmatpush3.bf16.msra.mxu1 %v8549_v60 }
 0x476   :  { %7197 = vmatprep.subr.bf16.mxu0 %v8460_v18  ;;  %7211 = vmatprep.subr.bf16.mxu1 %v10388_v61 }
 0x477   :  { %1837 = vmatprep.mubr.f32.mxu0 %v10387_v0  ;;  %6146 = vmatprep.mubr.msk.f32.mxu1 %vm8310_vm1, %v10387_v0 }
 0x479   :  { %7199 = vmatpush1.bf16.msra.mxu0 %v8468_v23  ;;  %7213 = vmatpush3.bf16.msra.mxu1 %v8572_v11 }
 0x47a   :  { %7201 = vmatprep.subr.bf16.mxu0 %v8477_v28  ;;  %7214 = vmatprep.subr.bf16.mxu1 %v10388_v61 }
 0x47d   :  { %7203 = vmatpush1.bf16.msra.mxu0 %v8494_v36  ;;  %7216 = vmatpush3.bf16.msra.mxu1 %v8596_v24 }
 0x47e   :  { %7205 = vmatprep.subr.bf16.mxu0 %v8503_v41  ;;  %7217 = vmatprep.subr.bf16.mxu1 %v10388_v61 }
 0x481   :  { %7207 = vmatpush1.bf16.msra.mxu0 %v8524_v50  ;;  %7219 = vmatpush3.bf16.msra.mxu1 %v8619_v37 }
 0x482   :  { %7221 = vmatprep.subr.bf16.mxu0 %v8439_v9  ;;  %7252 = vmatprep.subr.bf16.mxu1 %v10388_v61 }
 0x484   :  { %5372 = vmatmul.mubr.msk.f32.vlgmr.msra.gmra.mrb[10].mxu0 %vm134_vm0, %v5371_v33  ;;  %6147 = vmatmul.mubr.msk.f32.vlgmr.msra.gmra.mrb[22].mxu1 %vm134_vm0, %v5371_v33 }
 0x485   :  { %7223 = vmatpush1.bf16.msra.mxu0 %v8450_v14  ;;  %7254 = vmatpush3.bf16.msra.mxu1 %v8633_v43 }
 0x486   :  { %7225 = vmatprep.subr.bf16.mxu0 %v8462_v19  ;;  %7255 = vmatprep.subr.bf16.mxu1 %v10388_v61 }
 0x487   :  { %1978 = vmatprep.mubr.f32.mxu0 %v10387_v0  ;;  %6181 = vmatprep.mubr.msk.f32.mxu1 %vm8310_vm1, %v10387_v0 }
 0x489   :  { %7227 = vmatpush1.bf16.msra.mxu0 %v8475_v27  ;;  %7257 = vmatpush3.bf16.msra.mxu1 %v8647_v47 }
 0x48a   :  { %7229 = vmatprep.subr.bf16.mxu0 %v8485_v32  ;;  %7258 = vmatprep.subr.bf16.mxu1 %v10388_v61 }
 0x48d   :  { %7231 = vmatpush1.bf16.msra.mxu0 %v8501_v40  ;;  %7260 = vmatpush3.bf16.msra.mxu1 %v8662_v52 }
 0x48e   :  { %7233 = vmatprep.subr.bf16.mxu0 %v8509_v45  ;;  %7261 = vmatprep.subr.bf16.mxu1 %v10388_v61 }
 0x491   :  { %7235 = vmatpush1.bf16.msra.mxu0 %v8528_v51  ;;  %7263 = vmatpush3.bf16.msra.mxu1 %v8674_v56 }
 0x492   :  { %7237 = vmatprep.subr.bf16.mxu0 %v8531_v54  ;;  %7264 = vmatprep.subr.bf16.mxu1 %v10388_v61 }
 0x495   :  { %7239 = vmatpush1.bf16.msra.mxu0 %v8553_v62  ;;  %7266 = vmatpush3.bf16.msra.mxu1 %v8686_v59 }
 0x496   :  { %7241 = vmatprep.subr.bf16.mxu0 %v8556_v3  ;;  %7267 = vmatprep.subr.bf16.mxu1 %v10388_v61 }
 0x499   :  { %7243 = vmatpush1.bf16.msra.mxu0 %v8578_v12  ;;  %7269 = vmatpush3.bf16.msra.mxu1 %v8698_v4 }
 0x49a   :  { %7245 = vmatprep.subr.bf16.mxu0 %v8581_v16  ;;  %7270 = vmatprep.subr.bf16.mxu1 %v10388_v61 }
 0x49d   :  { %7247 = vmatpush1.bf16.msra.mxu0 %v8605_v26  ;;  %7272 = vmatpush3.bf16.msra.mxu1 %v8708_v8 }
 0x49e   :  { %7249 = vmatprep.subr.bf16.mxu0 %v8609_v31  ;;  %7273 = vmatprep.subr.bf16.mxu1 %v10388_v61 }
 0x4a1   :  { %7251 = vmatpush1.bf16.msra.mxu0 %v8623_v38  ;;  %7275 = vmatpush3.bf16.msra.mxu1 %v8718_v17 }
 0x4a2   :  { %7277 = vmatprep.subr.bf16.mxu0 %v8434_v5  ;;  %7292 = vmatprep.subr.bf16.mxu1 %v10388_v61 }
 0x547   :  { %v1666_v49 = vpop.f32.mrb[8].mxu0  ;;  %v1737_v6 = vpop.f32.mrb[20].mxu1 }
 0x548   :  { %v8027_v58 = vadd.f32 %v8879_v63, %v1666_v49  ;;  %v1668_v20 = vpop.f32.mrb[9].mxu0  ;;  %v6129_v35 = vpop.f32.mrb[21].mxu1  ;;  %v1738_v7 = vadd.f32 %v1737_v6, %v8805_v1 }
 0x549   :  { %v8029_v46 = vadd.f32 %v8884_v21, %v1668_v20 }
 0x54a   :  { %v5369_v42 = vmul.f32 -1.442695, %v8027_v58 }
 0x54b   :  { %v5370_v55 = vmul.f32 -1.442695, %v8029_v46 }
 0x54c   :  { %8139 = vpow2.f32 %v5369_v42 }
 0x54d   :  { %8141 = vpow2.f32 %v5370_v55  ;;  %v5376_v55 = vld [vmem:[%s10347_s0 + $0xc] sm:$0x3] }
 0x556   :  { %v8140_v29 = vpop.eup %8139 }
 0x557   :  { %v1749_v25 = vadd.f32 1.0, %v8140_v29  ;;  %v8142_v22 = vpop.eup %8141  ;;  %v1910_v34 = vpop.f32.mrb[22].mxu1  ;;  %v9164_v29 = vld [vmem:[%s10349_s2] sm:$0x3] }
 0x558   :  { %v1750_v49 = vadd.f32 1.0, %v8142_v22  ;;  %v6148_v6 = vpop.f32.mrb[23].mxu1  ;;  %vm2389_vm8 = vcmp.eq.s32.totalorder %v9164_v29, 6  ;;  %vm2703_vm9 = vcmp.eq.s32.totalorder %v9164_v29, 7  ;;  %v2717_v29 = vld [vmem:[#allocation4 + $0x38] sm:$0xff] }
 0x559   :  { %8143 = vrcp.f32 %v1749_v25  ;;  %v2390_v25 = vsel %vm2389_vm8, 1, %v10386_v53 }
 0x55a   :  { %2392 = vperm.xlu0 %8097, %v2390_v25  }
 0x563   :  { %v8144_v57 = vpop.eup %8143 }
 0x564   :  { %v1755_v33 = vmul.f32 %v8144_v57, %v1738_v7 }
 0x566   :  { %v1756_v15 = vadd.f32 %v1755_v33, %v1597_v39 }
 0x568   :  { %8145 = vtanh.f32 %v1756_v15 }
 0x569   :  { %8147 = vrcp.f32 %v1750_v49 }
 0x572   :  { %v8146_v58 = vpop.eup %8145 }
 0x573   :  { %v1758_v35 = vsub.f32 %v9030_v2, %v8146_v58  ;;  %v8148_v20 = vpop.eup %8147 }
 0x575   :  { %v1759_v42 = vmul.f32 %v8148_v20, %v1758_v35 }
 0x577   :  { %v9100_v46 = vadd.f32 %v8146_v58, %v1759_v42 }
 0x579   :  { %1979 = vmatmul.mubr.f32.vlgmr.msra.gmra.mrb[10].mxu0 %v9100_v46  ;;  %6182 = vmatmul.mubr.f32.vlgmr.msra.gmra.mrb[24].mxu1 %v9100_v46 }
 0x57a   :  { %7279 = vmatpush1.bf16.msra.mxu0 %v8441_v10  ;;  %7294 = vmatpush3.bf16.msra.mxu1 %v8549_v60 }
 0x57b   :  { %7281 = vmatprep.subr.bf16.mxu0 %v8460_v18  ;;  %7295 = vmatprep.subr.bf16.mxu1 %v10388_v61 }
 0x57c   :  { %2151 = vmatprep.mubr.f32.mxu0 %v10387_v0  ;;  %6200 = vmatprep.mubr.msk.f32.mxu1 %vm8310_vm1, %v10387_v0 }
 0x57e   :  { %7283 = vmatpush1.bf16.msra.mxu0 %v8468_v23  ;;  %7297 = vmatpush3.bf16.msra.mxu1 %v8572_v11 }
 0x57f   :  { %7285 = vmatprep.subr.bf16.mxu0 %v8477_v28  ;;  %7298 = vmatprep.subr.bf16.mxu1 %v10388_v61 }
 0x582   :  { %7287 = vmatpush1.bf16.msra.mxu0 %v8494_v36  ;;  %7300 = vmatpush3.bf16.msra.mxu1 %v8596_v24 }
 0x583   :  { %7289 = vmatprep.subr.bf16.mxu0 %v8503_v41  ;;  %7301 = vmatprep.subr.bf16.mxu1 %v10388_v61 }
 0x586   :  { %7291 = vmatpush1.bf16.msra.mxu0 %v8524_v50  ;;  %7303 = vmatpush3.bf16.msra.mxu1 %v8619_v37 }
 0x587   :  { %7305 = vmatprep.subr.bf16.mxu0 %v8439_v9  ;;  %7336 = vmatprep.subr.bf16.mxu1 %v10388_v61 }
 0x589   :  { %5377 = vmatmul.mubr.msk.f32.vlgmr.msra.gmra.mrb[12].mxu0 %vm134_vm0, %v5376_v55  ;;  %6201 = vmatmul.mubr.msk.f32.vlgmr.msra.gmra.mrb[26].mxu1 %vm134_vm0, %v5376_v55  ;;  %v1911_v55 = vadd.f32 %v1910_v34, %v8808_v48  ;;  %v2716_v34 = vld [vmem:[#allocation4 + $0x30] sm:$0xff] }
 0x58a   :  { %7307 = vmatpush1.bf16.msra.mxu0 %v8450_v14  ;;  %7338 = vmatpush3.bf16.msra.mxu1 %v8633_v43 }
 0x58b   :  { %7309 = vmatprep.subr.bf16.mxu0 %v8462_v19  ;;  %7339 = vmatprep.subr.bf16.mxu1 %v10388_v61 }
 0x58c   :  { %2292 = vmatprep.mubr.f32.mxu0 %v10387_v0  ;;  %6235 = vmatprep.mubr.msk.f32.mxu1 %vm8310_vm1, %v10387_v0 }
 0x58e   :  { %7311 = vmatpush1.bf16.msra.mxu0 %v8475_v27  ;;  %7341 = vmatpush3.bf16.msra.mxu1 %v8647_v47 }
 0x58f   :  { %7313 = vmatprep.subr.bf16.mxu0 %v8485_v32  ;;  %7342 = vmatprep.subr.bf16.mxu1 %v10388_v61 }
 0x592   :  { %7315 = vmatpush1.bf16.msra.mxu0 %v8501_v40  ;;  %7344 = vmatpush3.bf16.msra.mxu1 %v8662_v52 }
 0x593   :  { %7317 = vmatprep.subr.bf16.mxu0 %v8509_v45  ;;  %7345 = vmatprep.subr.bf16.mxu1 %v10388_v61 }
 0x596   :  { %7319 = vmatpush1.bf16.msra.mxu0 %v8528_v51  ;;  %7347 = vmatpush3.bf16.msra.mxu1 %v8674_v56 }
 0x597   :  { %7321 = vmatprep.subr.bf16.mxu0 %v8531_v54  ;;  %7348 = vmatprep.subr.bf16.mxu1 %v10388_v61 }
 0x59a   :  { %7323 = vmatpush1.bf16.msra.mxu0 %v8553_v62  ;;  %7350 = vmatpush3.bf16.msra.mxu1 %v8686_v59 }
 0x59b   :  { %7325 = vmatprep.subr.bf16.mxu0 %v8556_v3  ;;  %7351 = vmatprep.subr.bf16.mxu1 %v10388_v61 }
 0x59e   :  { %7327 = vmatpush1.bf16.msra.mxu0 %v8578_v12  ;;  %7353 = vmatpush3.bf16.msra.mxu1 %v8698_v4 }
 0x59f   :  { %7329 = vmatprep.subr.bf16.mxu0 %v8581_v16  ;;  %7354 = vmatprep.subr.bf16.mxu1 %v10388_v61 }
 0x5a2   :  { %7331 = vmatpush1.bf16.msra.mxu0 %v8605_v26  ;;  %7356 = vmatpush3.bf16.msra.mxu1 %v8708_v8 }
 0x5a3   :  { %7333 = vmatprep.subr.bf16.mxu0 %v8609_v31  ;;  %7357 = vmatprep.subr.bf16.mxu1 %v10388_v61 }
 0x5a6   :  { %7335 = vmatpush1.bf16.msra.mxu0 %v8623_v38  ;;  %7359 = vmatpush3.bf16.msra.mxu1 %v8718_v17 }
 0x5a7   :  { %7361 = vmatprep.subr.bf16.mxu0 %v8434_v5  ;;  %7376 = vmatprep.subr.bf16.mxu1 %v10388_v61 }
 0x64c   :  { %v1980_v22 = vpop.f32.mrb[10].mxu0  ;;  %v2051_v7 = vpop.f32.mrb[24].mxu1 }
 0x64d   :  { %v8031_v57 = vadd.f32 %v8879_v63, %v1980_v22  ;;  %v1982_v39 = vpop.f32.mrb[11].mxu0  ;;  %v6183_v33 = vpop.f32.mrb[25].mxu1  ;;  %v2052_v42 = vadd.f32 %v2051_v7, %v8805_v1  ;;  %v7454_v7 = vpack.c.bf16 %v2717_v29, %v2716_v34  ;;  %v2990_v34 = vld [vmem:[%s10357_s10 + $0x8] sm:$0xff]  ;;  %v2993_v29 = vld [vmem:[%s10357_s10 + $0x20] sm:$0xff] }
 0x64e   :  { %v8033_v49 = vadd.f32 %v8884_v21, %v1982_v39 }
 0x64f   :  { %v5374_v15 = vmul.f32 -1.442695, %v8031_v57 }
 0x650   :  { %v5375_v58 = vmul.f32 -1.442695, %v8033_v49 }
 0x651   :  { %8149 = vpow2.f32 %v5374_v15 }
 0x652   :  { %8151 = vpow2.f32 %v5375_v58  ;;  %v2718_v58 = vld [vmem:[#allocation4 + $0x40] sm:$0xff] }
 0x65b   :  { %v8150_v35 = vpop.eup %8149 }
 0x65c   :  { %v2063_v20 = vadd.f32 1.0, %v8150_v35  ;;  %v8152_v5 = vpop.eup %8151  ;;  %v2719_v35 = vld [vmem:[#allocation4 + $0x48] sm:$0xff] }
 0x65d   :  { %v2064_v22 = vadd.f32 1.0, %v8152_v5  ;;  %v2720_v5 = vld [vmem:[#allocation4 + $0x50] sm:$0xff] }
 0x65e   :  { %8153 = vrcp.f32 %v2063_v20  ;;  %v7457_v20 = vpack.c.bf16 %v2719_v35, %v2718_v58  ;;  %v9312_v58 = vpack.c.bf16 %v2993_v29, %v2990_v34  ;;  %v2989_v35 = vld [vmem:[%s10357_s10] sm:$0xff]  ;;  %v3028_v29 = vld [vmem:[%s10357_s10 + $0x138] sm:$0xff] }
 0x65f   :  { %v3025_v34 = vld [vmem:[%s10357_s10 + $0x120] sm:$0xff] }
 0x668   :  { %v8154_v6 = vpop.eup %8153 }
 0x669   :  { %v2069_v25 = vmul.f32 %v8154_v6, %v2052_v42  ;;  %v2721_v42 = vld [vmem:[#allocation4 + $0x58] sm:$0xff] }
 0x66a   :  { %v7460_v6 = vpack.c.bf16 %v2721_v42, %v2720_v5  ;;  %v2996_v5 = vld [vmem:[%s10357_s10 + $0x38] sm:$0xff]  ;;  %v2999_v42 = vld [vmem:[%s10357_s10 + $0x50] sm:$0xff] }
 0x66b   :  { %v2070_v2 = vadd.f32 %v2069_v25, %v1911_v55  ;;  %v2722_v55 = vld [vmem:[#allocation4 + $0x60] sm:$0xff]  ;;  %v2723_v25 = vld [vmem:[#allocation4 + $0x68] sm:$0xff] }
 0x66d   :  { %8155 = vtanh.f32 %v2070_v2 }
 0x66e   :  { %8157 = vrcp.f32 %v2064_v22  ;;  %v7463_v22 = vpack.c.bf16 %v2723_v25, %v2722_v55  ;;  %v9330_v55 = vpack.c.bf16 %v2999_v42, %v2996_v5  ;;  %v2995_v25 = vld [vmem:[%s10357_s10 + $0x30] sm:$0xff]  ;;  %v9437_v5 = vpack.c.bf16 %v3028_v29, %v3025_v34 }
 0x670   :  { %10392 = vst [vmem:[#allocation15_spill] sm:$0xff] %v9437_v5 }
 0x677   :  { %v8156_v57 = vpop.eup %8155 }
 0x678   :  { %v2072_v33 = vsub.f32 %v9100_v46, %v8156_v57  ;;  %v8158_v39 = vpop.eup %8157 }
 0x67a   :  { %v2073_v15 = vmul.f32 %v8158_v39, %v2072_v33  ;;  %v2725_v33 = vld [vmem:[#allocation4 + $0x78] sm:$0xff] }
 0x67c   :  { %v9175_v49 = vadd.f32 %v8156_v57, %v2073_v15  ;;  %v2724_v57 = vld [vmem:[#allocation4 + $0x70] sm:$0xff]  ;;  %v2805_v15 = vld [vmem:[#allocation6 + $0x8] sm:$0xff] }
 0x67d   :  { %v7466_v39 = vpack.c.bf16 %v2725_v33, %v2724_v57  ;;  %v3002_v57 = vld [vmem:[%s10357_s10 + $0x68] sm:$0xff]  ;;  %v3005_v33 = vld [vmem:[%s10357_s10 + $0x80] sm:$0xff] }
 0x67e   :  { %2293 = vmatmul.mubr.f32.vlgmr.msra.gmra.mrb[12].mxu0 %v9175_v49  ;;  %6236 = vmatmul.mubr.f32.vlgmr.msra.gmra.mrb[28].mxu1 %v9175_v49 }
 0x67f   :  { %7363 = vmatpush1.bf16.msra.mxu0 %v8441_v10  ;;  %7378 = vmatpush3.bf16.msra.mxu1 %v8549_v60  ;;  %v2224_v10 = vpop.f32.mrb[26].mxu1 }
 0x680   :  { %7365 = vmatprep.subr.bf16.mxu0 %v8460_v18  ;;  %7379 = vmatprep.subr.bf16.mxu1 %v10388_v61  ;;  %v6202_v18 = vpop.f32.mrb[27].mxu1 }
 0x681   :  { %2465 = vmatprep.mubr.f32.mxu0 %v10387_v0  ;;  %6254 = vmatprep.mubr.msk.f32.mxu1 %vm8310_vm1, %v10387_v0  ;;  %v2804_v18 = vld [vmem:[#allocation6] sm:$0xff] }
 0x683   :  { %7367 = vmatpush1.bf16.msra.mxu0 %v8468_v23  ;;  %7381 = vmatpush3.bf16.msra.mxu1 %v8572_v11  ;;  %v5381_v23 = vld [vmem:[%s10347_s0 + $0xe] sm:$0x3] }
 0x684   :  { %7369 = vmatprep.subr.bf16.mxu0 %v8477_v28  ;;  %7382 = vmatprep.subr.bf16.mxu1 %v10388_v61 }
 0x687   :  { %7371 = vmatpush1.bf16.msra.mxu0 %v8494_v36  ;;  %7384 = vmatpush3.bf16.msra.mxu1 %v8596_v24 }
 0x688   :  { %7373 = vmatprep.subr.bf16.mxu0 %v8503_v41  ;;  %7385 = vmatprep.subr.bf16.mxu1 %v10388_v61 }
 0x68b   :  { %7375 = vmatpush1.bf16.msra.mxu0 %v8524_v50  ;;  %7387 = vmatpush3.bf16.msra.mxu1 %v8619_v37 }
 0x68c   :  { %7389 = vmatprep.subr.bf16.mxu0 %v8439_v9  ;;  %7420 = vmatprep.subr.bf16.mxu1 %v10388_v61  ;;  %v2704_v9 = vsel %vm2703_vm9, 1, %v10386_v53  ;;  %v2715_v53 = vld [vmem:[#allocation4 + $0x28] sm:$0xff] }
 0x68d   :  { %2706 = vperm.xlu1 %8098, %v2704_v9   ;;  %v2807_v9 = vld [vmem:[#allocation6 + $0x18] sm:$0xff] }
 0x68e   :  { %5382 = vmatmul.mubr.msk.f32.vlgmr.msra.gmra.mrb[14].mxu0 %vm134_vm0, %v5381_v23  ;;  %6255 = vmatmul.mubr.msk.f32.vlgmr.msra.gmra.mrb[30].mxu1 %vm134_vm0, %v5381_v23 }
 0x68f   :  { %7391 = vmatpush1.bf16.msra.mxu0 %v8450_v14  ;;  %7422 = vmatpush3.bf16.msra.mxu1 %v8633_v43 }
 0x690   :  { %7393 = vmatprep.subr.bf16.mxu0 %v8462_v19  ;;  %7423 = vmatprep.subr.bf16.mxu1 %v10388_v61 }
 0x691   :  { %2606 = vmatprep.mubr.f32.mxu0 %v10387_v0  ;;  %6289 = vmatprep.mubr.msk.f32.mxu1 %vm8310_vm1, %v10387_v0 }
 0x693   :  { %7395 = vmatpush1.bf16.msra.mxu0 %v8475_v27  ;;  %7425 = vmatpush3.bf16.msra.mxu1 %v8647_v47  ;;  %v2710_v47 = vld [vmem:[#allocation4] sm:$0xff] }
 0x694   :  { %7397 = vmatprep.subr.bf16.mxu0 %v8485_v32  ;;  %7426 = vmatprep.subr.bf16.mxu1 %v10388_v61 }
 0x697   :  { %7399 = vmatpush1.bf16.msra.mxu0 %v8501_v40  ;;  %7428 = vmatpush3.bf16.msra.mxu1 %v8662_v52  ;;  %v2711_v52 = vld [vmem:[#allocation4 + $0x8] sm:$0xff] }
 0x698   :  { %7401 = vmatprep.subr.bf16.mxu0 %v8509_v45  ;;  %7429 = vmatprep.subr.bf16.mxu1 %v10388_v61 }
 0x69b   :  { %7403 = vmatpush1.bf16.msra.mxu0 %v8528_v51  ;;  %7431 = vmatpush3.bf16.msra.mxu1 %v8674_v56  ;;  %v7445_v56 = vpack.c.bf16 %v2711_v52, %v2710_v47  ;;  %v2812_v52 = vld [vmem:[#allocation6 + $0x40] sm:$0xff] }
 0x69c   :  { %7405 = vmatprep.subr.bf16.mxu0 %v8531_v54  ;;  %7432 = vmatprep.subr.bf16.mxu1 %v10388_v61 }
 0x69f   :  { %7407 = vmatpush1.bf16.msra.mxu0 %v8553_v62  ;;  %7434 = vmatpush3.bf16.msra.mxu1 %v8686_v59  ;;  %v2225_v62 = vadd.f32 %v2224_v10, %v8808_v48  ;;  %v2712_v59 = vld [vmem:[#allocation4 + $0x10] sm:$0xff]  ;;  %v2808_v10 = vld [vmem:[#allocation6 + $0x20] sm:$0xff] }
 0x6a0   :  { %7409 = vmatprep.subr.bf16.mxu0 %v8556_v3  ;;  %7435 = vmatprep.subr.bf16.mxu1 %v10388_v61  ;;  %v9261_v23 = vpack.c.bf16 %v2808_v10, %v2805_v15  ;;  %v9350_v15 = vpack.c.bf16 %v3005_v33, %v3002_v57  ;;  %v3001_v10 = vld [vmem:[%s10357_s10 + $0x60] sm:$0xff] }
 0x6a3   :  { %7411 = vmatpush1.bf16.msra.mxu0 %v8578_v12  ;;  %7437 = vmatpush3.bf16.msra.mxu1 %v8698_v4  ;;  %v2713_v4 = vld [vmem:[#allocation4 + $0x18] sm:$0xff] }
 0x6a4   :  { %7413 = vmatprep.subr.bf16.mxu0 %v8581_v16  ;;  %7438 = vmatprep.subr.bf16.mxu1 %v10388_v61 }
 0x6a7   :  { %7415 = vmatpush1.bf16.msra.mxu0 %v8605_v26  ;;  %7440 = vmatpush3.bf16.msra.mxu1 %v8708_v8  ;;  %v7448_v8 = vpack.c.bf16 %v2713_v4, %v2712_v59  ;;  %v2818_v4 = vld [vmem:[#allocation6 + $0x70] sm:$0xff] }
 0x6a8   :  { %7417 = vmatprep.subr.bf16.mxu0 %v8609_v31  ;;  %7441 = vmatprep.subr.bf16.mxu1 %v10388_v61 }
 0x6ab   :  { %7419 = vmatpush1.bf16.msra.mxu0 %v8623_v38  ;;  %7443 = vmatpush3.bf16.msra.mxu1 %v8718_v17  ;;  %v2714_v17 = vld [vmem:[#allocation4 + $0x20] sm:$0xff] }
 0x6ac   :  { %7444 = vmatprep.subr.bf16.mxu0 %v10388_v61  ;;  %v7451_v2 = vpack.c.bf16 %v2715_v53, %v2714_v17  ;;  %7469 = vmatprep.subr.bf16.mxu1 %v9261_v23  ;;  %v2824_v53 = vld [vmem:[#allocation6 + $0xa0] sm:$0xff] }
 0x751   :  { %v2294_v14 = vpop.f32.mrb[12].mxu0  ;;  %v2365_v19 = vpop.f32.mrb[28].mxu1 }
 0x752   :  { %v8035_v27 = vadd.f32 %v8879_v63, %v2294_v14  ;;  %v2296_v28 = vpop.f32.mrb[13].mxu0  ;;  %v6237_v32 = vpop.f32.mrb[29].mxu1  ;;  %v2366_v54 = vadd.f32 %v2365_v19, %v8805_v1  ;;  %v2811_v14 = vld [vmem:[#allocation6 + $0x38] sm:$0xff]  ;;  %v2814_v19 = vld [vmem:[#allocation6 + $0x50] sm:$0xff] }
 0x753   :  { %v8037_v40 = vadd.f32 %v8884_v21, %v2296_v28  ;;  %v9265_v28 = vpack.c.bf16 %v2814_v19, %v2811_v14  ;;  %v2810_v32 = vld [vmem:[#allocation6 + $0x30] sm:$0xff] }
 0x754   :  { %v5379_v36 = vmul.f32 -1.442695, %v8035_v27  ;;  %v9263_v27 = vpack.c.bf16 %v2807_v9, %v2804_v18  ;;  %v3004_v18 = vld [vmem:[%s10357_s10 + $0x78] sm:$0xff]  ;;  %v3011_v14 = vld [vmem:[%s10357_s10 + $0xb0] sm:$0xff] }
 0x755   :  { %v5380_v41 = vmul.f32 -1.442695, %v8037_v40  ;;  %v2817_v40 = vld [vmem:[#allocation6 + $0x68] sm:$0xff]  ;;  %v3008_v9 = vld [vmem:[%s10357_s10 + $0x98] sm:$0xff]  ;;  %v9365_v19 = vpack.c.bf16 %v3004_v18, %v3001_v10 }
 0x756   :  { %8159 = vpow2.f32 %v5379_v36  ;;  %v2813_v36 = vld [vmem:[#allocation6 + $0x48] sm:$0xff] }
 0x757   :  { %8161 = vpow2.f32 %v5380_v41  ;;  %v2820_v41 = vld [vmem:[#allocation6 + $0x80] sm:$0xff] }
 0x760   :  { %v8160_v45 = vpop.eup %8159 }
 0x761   :  { %v2377_v50 = vadd.f32 1.0, %v8160_v45  ;;  %v8162_v51 = vpop.eup %8161  ;;  %v9251_v38 = vpop.f32.mrb[30].mxu1  ;;  %v9269_v45 = vpack.c.bf16 %v2813_v36, %v2810_v32  ;;  %v9368_v32 = vpack.c.bf16 %v3011_v14, %v3008_v9  ;;  %v3007_v36 = vld [vmem:[%s10357_s10 + $0x90] sm:$0xff] }
 0x762   :  { %v2378_v12 = vadd.f32 1.0, %v8162_v51  ;;  %v6256_v43 = vpop.f32.mrb[31].mxu1  ;;  %v2816_v51 = vld [vmem:[#allocation6 + $0x60] sm:$0xff] }
 0x763   :  { %8163 = vrcp.f32 %v2377_v50  ;;  %v9272_v50 = vpack.c.bf16 %v2820_v41, %v2817_v40  ;;  %v2803_v43 = vld [vmem:[%s10348_s1] sm:$0x3]  ;;  %v3010_v40 = vld [vmem:[%s10357_s10 + $0xa8] sm:$0xff] }
 0x764   :  { %v3014_v41 = vld [vmem:[%s10357_s10 + $0xc8] sm:$0xff] }
 0x76d   :  { %v8164_v60 = vpop.eup %8163 }
 0x76e   :  { %v2383_v3 = vmul.f32 %v8164_v60, %v2366_v54  ;;  %v2819_v54 = vld [vmem:[#allocation6 + $0x78] sm:$0xff] }
 0x76f   :  { %v2823_v60 = vld [vmem:[#allocation6 + $0x98] sm:$0xff] }
 0x770   :  { %v2384_v11 = vadd.f32 %v2383_v3, %v2225_v62  ;;  %v2826_v62 = vld [vmem:[#allocation6 + $0xb0] sm:$0xff]  ;;  %v9275_v3 = vpack.c.bf16 %v2819_v54, %v2816_v51  ;;  %v3017_v51 = vld [vmem:[%s10357_s10 + $0xe0] sm:$0xff]  ;;  %v9383_v54 = vpack.c.bf16 %v3010_v40, %v3007_v36 }
 0x772   :  { %8165 = vtanh.f32 %v2384_v11  ;;  %v9278_v11 = vpack.c.bf16 %v2826_v62, %v2823_v60  ;;  %v9386_v60 = vpack.c.bf16 %v3017_v51, %v3014_v41  ;;  %v3013_v62 = vld [vmem:[%s10357_s10 + $0xc0] sm:$0xff] }
 0x773   :  { %8167 = vrcp.f32 %v2378_v12  ;;  %v2822_v12 = vld [vmem:[#allocation6 + $0x90] sm:$0xff] }
 0x77c   :  { %v8166_v16 = vpop.eup %8165 }
 0x77d   :  { %v2386_v24 = vsub.f32 %v9175_v49, %v8166_v16  ;;  %v8168_v26 = vpop.eup %8167 }
 0x77f   :  { %v2387_v31 = vmul.f32 %v8168_v26, %v2386_v24  ;;  %v2806_v26 = vld [vmem:[#allocation6 + $0x10] sm:$0xff] }
 0x781   :  { %v9244_v37 = vadd.f32 %v8166_v16, %v2387_v31  ;;  %v2825_v16 = vld [vmem:[#allocation6 + $0xa8] sm:$0xff] }
 0x782   :  { %v9281_v24 = vpack.c.bf16 %v2825_v16, %v2822_v12  ;;  %v2809_v31 = vld [vmem:[#allocation6 + $0x28] sm:$0xff]  ;;  %v3016_v12 = vld [vmem:[%s10357_s10 + $0xd8] sm:$0xff] }
 0x783   :  { %2607 = vmatmul.mubr.f32.vlgmr.msra.gmra.mrb[14].mxu0 %v9244_v37  ;;  %6290 = vmatmul.mubr.f32.vlgmr.msra.gmra.mrb[32].mxu1 %v9244_v37  ;;  %v9288_v47 = vpack.c.bf16 %v2809_v31, %v2806_v26  ;;  %v3020_v16 = vld [vmem:[%s10357_s10 + $0xf8] sm:$0xff]  ;;  %v3023_v26 = vld [vmem:[%s10357_s10 + $0x110] sm:$0xff]  ;;  %v9401_v31 = vpack.c.bf16 %v3016_v12, %v3013_v62  ;;  %v2539_v12 = vadd.f32 %v9251_v38, %v8808_v48 }
 0x784   :  { %6324 = vmatprep.mubr.msk.f32.mxu0 %vm8310_vm1, %v10387_v0  ;;  %2912 = vmatprep.mubr.f32.mxu1 %v10387_v0 }
 0x785   :  { %7446 = vmatpush3.bf16.msra.mxu0 %v7445_v56  ;;  %7471 = vmatpush1.bf16.msra.mxu1 %v9263_v27  ;;  %v2815_v56 = vld [vmem:[#allocation6 + $0x58] sm:$0xff] }
 0x786   :  { %7447 = vmatprep.subr.bf16.mxu0 %v10388_v61  ;;  %7473 = vmatprep.subr.bf16.mxu1 %v9265_v28  ;;  %v9293_v59 = vpack.c.bf16 %v2815_v56, %v2812_v52  ;;  %v3019_v52 = vld [vmem:[%s10357_s10 + $0xf0] sm:$0xff]  ;;  %v3022_v56 = vld [vmem:[%s10357_s10 + $0x108] sm:$0xff] }
 0x789   :  { %7449 = vmatpush3.bf16.msra.mxu0 %v7448_v8  ;;  %7475 = vmatpush1.bf16.msra.mxu1 %v9269_v45  ;;  %v2821_v8 = vld [vmem:[#allocation6 + $0x88] sm:$0xff] }
 0x78a   :  { %7450 = vmatprep.subr.bf16.mxu0 %v10388_v61  ;;  %7477 = vmatprep.subr.bf16.mxu1 %v9272_v50  ;;  %v9299_v17 = vpack.c.bf16 %v2821_v8, %v2818_v4  ;;  %v3026_v4 = vld [vmem:[%s10357_s10 + $0x128] sm:$0xff]  ;;  %v3029_v8 = vld [vmem:[%s10357_s10 + $0x140] sm:$0xff] }
 0x78d   :  { %7452 = vmatpush3.bf16.msra.mxu0 %v7451_v2  ;;  %7479 = vmatpush1.bf16.msra.mxu1 %v9275_v3  ;;  %v2827_v2 = vld [vmem:[#allocation6 + $0xb8] sm:$0xff] }
 0x78e   :  { %7453 = vmatprep.subr.bf16.mxu0 %v10388_v61  ;;  %7481 = vmatprep.subr.bf16.mxu1 %v9278_v11 }
 0x791   :  { %7455 = vmatpush3.bf16.msra.mxu0 %v7454_v7  ;;  %7483 = vmatpush1.bf16.msra.mxu1 %v9281_v24  ;;  %v9309_v7 = vpack.c.bf16 %v2827_v2, %v2824_v53  ;;  %v9419_v53 = vpack.c.bf16 %v3022_v56, %v3019_v52  ;;  %v9422_v2 = vpack.c.bf16 %v3029_v8, %v3026_v4  ;;  %v1137_v56 = vpop.permute.xlu1 %1136 }
 0x792   :  { %7456 = vmatprep.subr.bf16.mxu0 %v10388_v61  ;;  %7484 = vmatprep.subr.bf16.mxu1 %v10388_v61  ;;  %vm1138_vm12 = vcmp.eq.s32.totalorder %v1137_v56, 1 }
 0x793   :  { %10390 = vst [vmem:[#allocation13_spill] sm:$0xff] %v9419_v53  ;;  %10391 = vst [vmem:[#allocation14_spill] sm:$0xff] %v9422_v2 }
 0x794   :  { %5387 = vmatmul.mubr.msk.f32.vlgmr.msra.gmra.mrb[34].mxu1 %vm134_vm0, %v2803_v43 }
 0x795   :  { %7458 = vmatpush3.bf16.msra.mxu0 %v7457_v20  ;;  %7486 = vmatpush3.bf16.msra.mxu1 %v9288_v47  ;;  %v2992_v20 = vld [vmem:[%s10357_s10 + $0x18] sm:$0xff] }
 0x796   :  { %7459 = vmatprep.subr.bf16.mxu0 %v10388_v61  ;;  %6343 = vmatprep.mubr.msk.f32.mxu1 %vm8310_vm1, %v10387_v0 }
 0x797   :  { %7487 = vmatprep.subr.bf16.mxu1 %v10388_v61 }
 0x799   :  { %7461 = vmatpush3.bf16.msra.mxu0 %v7460_v6  ;;  %7489 = vmatpush3.bf16.msra.mxu1 %v9293_v59  ;;  %v9327_v6 = vpack.c.bf16 %v2992_v20, %v2989_v35  ;;  %v3032_v35 = vld [vmem:[%s10357_s10 + $0x158] sm:$0xff]  ;;  %v3035_v20 = vld [vmem:[%s10357_s10 + $0x170] sm:$0xff] }
 0x79a   :  { %7462 = vmatprep.subr.bf16.mxu0 %v10388_v61  ;;  %7490 = vmatprep.subr.bf16.mxu1 %v10388_v61  ;;  %v9440_v42 = vpack.c.bf16 %v3035_v20, %v3032_v35 }
 0x79c   :  { %10393 = vst [vmem:[#allocation16_spill] sm:$0xff] %v9440_v42 }
 0x79d   :  { %7464 = vmatpush3.bf16.msra.mxu0 %v7463_v22  ;;  %7492 = vmatpush3.bf16.msra.mxu1 %v9299_v17  ;;  %v2998_v22 = vld [vmem:[%s10357_s10 + $0x48] sm:$0xff] }
 0x79e   :  { %7465 = vmatprep.subr.bf16.mxu0 %v10388_v61  ;;  %7493 = vmatprep.subr.bf16.mxu1 %v10388_v61 }
 0x7a1   :  { %7467 = vmatpush3.bf16.msra.mxu0 %v7466_v39  ;;  %7495 = vmatpush3.bf16.msra.mxu1 %v9309_v7  ;;  %v9346_v39 = vpack.c.bf16 %v2998_v22, %v2995_v25 }
 0x7a2   :  { %7528 = vmatprep.subr.bf16.mxu0 %v10388_v61  ;;  %7497 = vmatprep.subr.bf16.mxu1 %v9312_v58 }
 0x7a4   :  { %6344 = vmatmul.mubr.msk.f32.vlgmr.msra.gmra.mrb[36].mxu1 %vm134_vm0, %v2803_v43  ;;  %v9404_v43 = vpack.c.bf16 %v3023_v26, %v3020_v16 }
 0x7a5   :  { %7499 = vmatpush1.bf16.msra.mxu1 %v9327_v6  ;;  %3118 = vmatprep.mubr.f32.mxu1 %v10387_v0 }
 0x7a6   :  { %7501 = vmatprep.subr.bf16.mxu1 %v9330_v55 }
 0x7a9   :  { %7503 = vmatpush1.bf16.msra.mxu1 %v9346_v39 }
 0x7aa   :  { %7505 = vmatprep.subr.bf16.mxu1 %v9350_v15 }
 0x7ad   :  { %7507 = vmatpush1.bf16.msra.mxu1 %v9365_v19 }
 0x7ae   :  { %7509 = vmatprep.subr.bf16.mxu1 %v9368_v32 }
 0x7b1   :  { %7511 = vmatpush1.bf16.msra.mxu1 %v9383_v54 }
 0x7b2   :  { %7513 = vmatprep.subr.bf16.mxu1 %v9386_v60 }
 0x7b5   :  { %7515 = vmatpush1.bf16.msra.mxu1 %v9401_v31 }
 0x7b6   :  { %7517 = vmatprep.subr.bf16.mxu1 %v9404_v43 }
 0x7b9   :  { %7519 = vmatpush1.bf16.msra.mxu1 %v9419_v53 }
 0x7ba   :  { %7521 = vmatprep.subr.bf16.mxu1 %v9422_v2 }
 0x7bd   :  { %7523 = vmatpush1.bf16.msra.mxu1 %v9437_v5 }
 0x7be   :  { %7525 = vmatprep.subr.bf16.mxu1 %v9440_v42 }
 0x856   :  { %v2608_v25 = vpop.f32.mrb[14].mxu0  ;;  %v2679_v22 = vpop.f32.mrb[32].mxu1 }
 0x857   :  { %v8039_v57 = vadd.f32 %v8879_v63, %v2608_v25  ;;  %v2610_v33 = vpop.f32.mrb[15].mxu0  ;;  %v6291_v10 = vpop.f32.mrb[33].mxu1  ;;  %v2680_v51 = vadd.f32 %v2679_v22, %v8805_v1  ;;  %v2991_v22 = vld [vmem:[%s10357_s10 + $0x10] sm:$0xff] }
 0x858   :  { %v8041_v9 = vadd.f32 %v8884_v21, %v2610_v33  ;;  %v509_v63 = vpop.permute.xlu0 %508  ;;  %v1451_v21 = vpop.permute.xlu1 %1450 }
 0x859   :  { %v5384_v18 = vmul.f32 -1.442695, %v8039_v57  ;;  %vm510_vm10 = vcmp.eq.s32.totalorder %v509_v63, 1  ;;  %vm1452_vm13 = vcmp.eq.s32.totalorder %v1451_v21, 1  ;;  %v2994_v57 = vld [vmem:[%s10357_s10 + $0x28] sm:$0xff]  ;;  %v3024_v21 = vld [vmem:[%s10357_s10 + $0x118] sm:$0xff] }
 0x85a   :  { %v5385_v14 = vmul.f32 -1.442695, %v8041_v9  ;;  %v511_v1 = vsel %vm510_vm10, %v8812_v30, 0.0  ;;  %v10394_v30 = vld [vmem:[#allocation12_spill] sm:$0xff] }
 0x85b   :  { %8169 = vpow2.f32 %v5384_v18 }
 0x85c   :  { %8171 = vpow2.f32 %v5385_v14  ;;  %v823_v4 = vpop.permute.xlu0 %822  ;;  %v2079_v34 = vpop.permute.xlu1 %2078 }
 0x85d   :  { %vm824_vm11 = vcmp.eq.s32.totalorder %v823_v4, 1  ;;  %vm2080_vm15 = vcmp.eq.s32.totalorder %v2079_v34, 1  ;;  %v3021_v4 = vld [vmem:[%s10357_s10 + $0x100] sm:$0xff]  ;;  %v3027_v34 = vld [vmem:[%s10357_s10 + $0x130] sm:$0xff] }
 0x85e   :  { %v825_v48 = vsel %vm824_vm11, %v8890_v44, %v511_v1 }
 0x85f   :  { %v1139_v25 = vsel %vm1138_vm12, %v8960_v13, %v825_v48  ;;  %v9462_v13 = vpack.c.bf16 %v2994_v57, %v2991_v22  ;;  %v3034_v48 = vld [vmem:[%s10357_s10 + $0x168] sm:$0xff] }
 0x860   :  { %v1765_v8 = vpop.permute.xlu0 %1764  ;;  %v1453_v33 = vsel %vm1452_vm13, %v10394_v30, %v1139_v25  ;;  %v2707_v44 = vpop.permute.xlu1 %2706  ;;  %v3036_v25 = vld [vmem:[%s10357_s10 + $0x178] sm:$0xff] }
 0x861   :  { %vm1766_vm14 = vcmp.eq.s32.totalorder %v1765_v8, 1  ;;  %vm2708_vm3 = vcmp.eq.s32.totalorder %v2707_v44, 1  ;;  %v9514_v8 = vpack.c.bf16 %v3024_v21, %v3021_v4  ;;  %v3223_v21 = vld [vmem:[%s10360_s13 + $0x40] sm:$0xff] }
 0x862   :  { %v1767_v18 = vsel %vm1766_vm14, %v9100_v46, %v1453_v33  ;;  %v5386_v33 = vld [vmem:[%s10355_s8] ss:$0 sm:$0xff] }
 0x863   :  { %v2081_v9 = vsel %vm2080_vm15, %v9175_v49, %v1767_v18  ;;  %v3003_v49 = vld [vmem:[%s10357_s10 + $0x70] sm:$0xff] }
 0x864   :  { %v2393_v35 = vpop.permute.xlu0 %2392 }
 0x865   :  { %v8170_v36 = vpop.eup %8169  ;;  %vm2394_vm2 = vcmp.eq.s32.totalorder %v2393_v35, 1  ;;  %v3031_v35 = vld [vmem:[%s10357_s10 + $0x150] sm:$0xff] }
 0x866   :  { %v2691_v40 = vadd.f32 1.0, %v8170_v36  ;;  %v8172_v41 = vpop.eup %8171  ;;  %v2395_v36 = vsel %vm2394_vm2, %v9244_v37, %v2081_v9  ;;  %v5392_v9 = vld [vmem:[%s10348_s1 + $0x2] sm:$0x3] }
 0x867   :  { %v2692_v52 = vadd.f32 1.0, %v8172_v41  ;;  %v3000_v41 = vld [vmem:[%s10357_s10 + $0x58] sm:$0xff] }
 0x868   :  { %8173 = vrcp.f32 %v2691_v40  ;;  %v2997_v40 = vld [vmem:[%s10357_s10 + $0x40] sm:$0xff] }
 0x869   :  { %v9472_v46 = vpack.c.bf16 %v3000_v41, %v2997_v40  ;;  %v3217_v41 = vld [vmem:[%s10360_s13 + $0x10] sm:$0xff] }
 0x872   :  { %v8174_v62 = vpop.eup %8173 }
 0x873   :  { %v2697_v16 = vmul.f32 %v8174_v62, %v2680_v51 }
 0x875   :  { %v2698_v26 = vadd.f32 %v2697_v16, %v2539_v12  ;;  %v3009_v12 = vld [vmem:[%s10357_s10 + $0xa0] sm:$0xff]  ;;  %v3012_v16 = vld [vmem:[%s10357_s10 + $0xb8] sm:$0xff] }
 0x876   :  { %v9494_v63 = vpack.c.bf16 %v3012_v16, %v3009_v12  ;;  %v3220_v12 = vld [vmem:[%s10360_s13 + $0x28] sm:$0xff] }
 0x877   :  { %8175 = vtanh.f32 %v2698_v26  ;;  %v3015_v26 = vld [vmem:[%s10357_s10 + $0xd0] sm:$0xff]  ;;  %v9549_v57 = vpop.f32.mrb[36].mxu1 }
 0x878   :  { %8177 = vrcp.f32 %v2692_v52  ;;  %v3018_v52 = vld [vmem:[%s10357_s10 + $0xe8] sm:$0xff]  ;;  %v6345_v30 = vpop.f32.mrb[37].mxu1 }
 0x879   :  { %v9504_v56 = vpack.c.bf16 %v3018_v52, %v3015_v26  ;;  %v3221_v26 = vld [vmem:[%s10360_s13 + $0x30] sm:$0xff]  ;;  %v3222_v52 = vld [vmem:[%s10360_s13 + $0x38] sm:$0xff]  ;;  %v3228_v30 = vld [vmem:[%s10360_s13 + $0x68] sm:$0xff] }
 0x87a   :  { %v9626_v4 = vpack.c.bf16 %v3222_v52, %v3221_v26 }
 0x881   :  { %v8176_v29 = vpop.eup %8175 }
 0x882   :  { %v2700_v38 = vsub.f32 %v9244_v37, %v8176_v29  ;;  %v8178_v20 = vpop.eup %8177  ;;  %v3006_v37 = vld [vmem:[%s10357_s10 + $0x88] sm:$0xff] }
 0x883   :  { %v9484_v62 = vpack.c.bf16 %v3006_v37, %v3003_v49  ;;  %v3219_v37 = vld [vmem:[%s10360_s13 + $0x20] sm:$0xff] }
 0x884   :  { %v2701_v10 = vmul.f32 %v8178_v20, %v2700_v38  ;;  %v3033_v38 = vld [vmem:[%s10357_s10 + $0x160] sm:$0xff]  ;;  %v9538_v20 = vpack.c.bf16 %v3034_v48, %v3031_v35  ;;  %v9614_v16 = vpack.c.bf16 %v3220_v12, %v3219_v37  ;;  %v3225_v35 = vld [vmem:[%s10360_s13 + $0x50] sm:$0xff]  ;;  %v3226_v48 = vld [vmem:[%s10360_s13 + $0x58] sm:$0xff] }
 0x885   :  { %v9543_v22 = vpack.c.bf16 %v3036_v25, %v3033_v38  ;;  %v9648_v38 = vpack.c.bf16 %v3226_v48, %v3225_v35  ;;  %v3227_v25 = vld [vmem:[%s10360_s13 + $0x60] sm:$0xff] }
 0x886   :  { %v2702_v14 = vadd.f32 %v8176_v29, %v2701_v10  ;;  %v3030_v29 = vld [vmem:[%s10357_s10 + $0x148] sm:$0xff]  ;;  %10395 = vst [vmem:[#allocation12_spill] sm:$0xff] %v9538_v20  ;;  %7527 = vmatpush1.bf16.msra.mxu1 %v9538_v20 }
 0x887   :  { %v9524_v1 = vpack.c.bf16 %v3030_v29, %v3027_v34  ;;  %7577 = vmatprep.subr.bf16.mxu1 %v9261_v23  ;;  %v3224_v34 = vld [vmem:[%s10360_s13 + $0x48] sm:$0xff] }
 0x888   :  { %v2709_v51 = vsel %vm2708_vm3, %v2702_v14, %v2395_v36  ;;  %v3215_v14 = vld [vmem:[%s10360_s13] sm:$0xff]  ;;  %v3216_v36 = vld [vmem:[%s10360_s13 + $0x8] sm:$0xff]  ;;  %v9638_v29 = vpack.c.bf16 %v3224_v34, %v3223_v21 }
 0x889   :  { %6325 = vmatmul.mubr.f32.vlgmr.msra.gmra.mrb[16].mxu0 %v2709_v51  ;;  %v9588_v40 = vpack.c.bf16 %v3216_v36, %v3215_v14  ;;  %v3218_v51 = vld [vmem:[%s10360_s13 + $0x18] sm:$0xff]  ;;  %v3037_v14 = vld [vmem:[%s10359_s12] sm:$0x7]  ;;  %v10397_v34 = vld [vmem:[#allocation10_spill] sm:$0xff] }
 0x88a   :  { %7530 = vmatpush3.bf16.msra.mxu0 %v9462_v13  ;;  %6378 = vmatprep.mubr.msk.f32.mxu0 %vm8310_vm1, %v10387_v0  ;;  %v9601_v49 = vpack.c.bf16 %v3218_v51, %v3217_v41  ;;  %v2828_v36 = vld [vmem:[%s10358_s11] sm:$0x7] }
 0x88b   :  { %7531 = vmatprep.subr.bf16.mxu0 %v10388_v61  ;;  %v10396_v41 = vld [vmem:[#allocation9_spill] sm:$0xff]  ;;  %v2837_v35 = vrot.slane %v2828_v36, %v10397_v34 }
 0x88c   :  { %v2833_v51 = vrot.slane %v2828_v36, %v10396_v41  ;;  %v3042_v37 = vrot.slane %v3037_v14, %v10396_v41  ;;  %v10398_v41 = vld [vmem:[#allocation11_spill] sm:$0xff] }
 0x88e   :  { %7533 = vmatpush3.bf16.msra.mxu0 %v9472_v46  ;;  %v8042_v12 = vadd.f32 %v3042_v37, %v2833_v51  ;;  %v3050_v51 = vrot.slane %v3037_v14, %v10398_v41  ;;  %v2841_v37 = vrot.slane %v2828_v36, %v10398_v41 }
 0x88f   :  { %7534 = vmatprep.subr.bf16.mxu0 %v10388_v61 }
 0x892   :  { %7536 = vmatpush3.bf16.msra.mxu0 %v9484_v62 }
 0x893   :  { %7537 = vmatprep.subr.bf16.mxu0 %v10388_v61 }
 0x896   :  { %7539 = vmatpush3.bf16.msra.mxu0 %v9494_v63 }
 0x897   :  { %7540 = vmatprep.subr.bf16.mxu0 %v10388_v61 }
 0x89a   :  { %7542 = vmatpush3.bf16.msra.mxu0 %v9504_v56 }
 0x89b   :  { %7543 = vmatprep.subr.bf16.mxu0 %v10388_v61 }
 0x89e   :  { %7545 = vmatpush3.bf16.msra.mxu0 %v9514_v8 }
 0x89f   :  { %7546 = vmatprep.subr.bf16.mxu0 %v10388_v61 }
 0x8a2   :  { %7548 = vmatpush3.bf16.msra.mxu0 %v9524_v1 }
 0x8a3   :  { %7549 = vmatprep.subr.bf16.mxu0 %v10388_v61 }
 0x8a6   :  { %7551 = vmatpush3.bf16.msra.mxu0 %v9543_v22 }
 0x8a7   :  { %7552 = vmatprep.subr.bf16.mxu0 %v10388_v61 }
 0x95c   :  { %v2799_v10 = vpop.f32.mrb[16].mxu0 }
 0x95d   :  { %v9554_v44 = vadd.f32 %v5386_v33, %v2799_v10  ;;  %v6326_v18 = vpop.f32.mrb[17].mxu0  ;;  %v9660_v33 = vpack.c.bf16 %v3228_v30, %v3227_v25  ;;  %v3229_v10 = vld [vmem:[%s10360_s13 + $0x70] sm:$0xff] }
 0x95e   :  { %v3230_v18 = vld [vmem:[%s10360_s13 + $0x78] sm:$0xff] }
 0x95f   :  { %3119 = vmatmul.mubr.f32.vlgmr.msra.gmra.mrb[34].mxu1 %v9554_v44  ;;  %6379 = vmatmul.mubr.f32.vlgmr.msra.gmra.mrb[18].mxu0 %v9554_v44 }
 0x960   :  { %7579 = vmatpush1.bf16.msra.mxu1 %v9263_v27  ;;  %3419 = vmatprep.mubr.f32.mxu1 %v10387_v0 }
 0x961   :  { %7581 = vmatprep.subr.bf16.mxu1 %v9265_v28  ;;  %6413 = vmatprep.mubr.msk.f32.mxu0 %vm8310_vm1, %v10387_v0 }
 0x962   :  { %7554 = vmatpush3.bf16.msra.mxu0 %v9588_v40 }
 0x963   :  { %7555 = vmatprep.subr.bf16.mxu0 %v10388_v61 }
 0x964   :  { %7583 = vmatpush1.bf16.msra.mxu1 %v9269_v45 }
 0x965   :  { %7585 = vmatprep.subr.bf16.mxu1 %v9272_v50 }
 0x966   :  { %7557 = vmatpush3.bf16.msra.mxu0 %v9601_v49 }
 0x967   :  { %7558 = vmatprep.subr.bf16.mxu0 %v10388_v61 }
 0x968   :  { %7587 = vmatpush1.bf16.msra.mxu1 %v9275_v3 }
 0x969   :  { %7589 = vmatprep.subr.bf16.mxu1 %v9278_v11 }
 0x96a   :  { %7560 = vmatpush3.bf16.msra.mxu0 %v9614_v16 }
 0x96b   :  { %7561 = vmatprep.subr.bf16.mxu0 %v10388_v61 }
 0x96c   :  { %7591 = vmatpush1.bf16.msra.mxu1 %v9281_v24 }
 0x96d   :  { %7592 = vmatprep.subr.bf16.mxu1 %v10388_v61 }
 0x96e   :  { %7563 = vmatpush3.bf16.msra.mxu0 %v9626_v4 }
 0x96f   :  { %5393 = vmatmul.mubr.msk.f32.vlgmr.msra.gmra.mrb[38].mxu1 %vm134_vm0, %v5392_v9  ;;  %7564 = vmatprep.subr.bf16.mxu0 %v10388_v61 }
 0x970   :  { %7594 = vmatpush3.bf16.msra.mxu1 %v9288_v47  ;;  %6432 = vmatprep.mubr.msk.f32.mxu1 %vm8310_vm1, %v10387_v0 }
 0x971   :  { %7595 = vmatprep.subr.bf16.mxu1 %v10388_v61 }
 0x972   :  { %7566 = vmatpush3.bf16.msra.mxu0 %v9638_v29 }
 0x973   :  { %7567 = vmatprep.subr.bf16.mxu0 %v10388_v61 }
 0x974   :  { %7597 = vmatpush3.bf16.msra.mxu1 %v9293_v59 }
 0x975   :  { %7598 = vmatprep.subr.bf16.mxu1 %v10388_v61 }
 0x976   :  { %7569 = vmatpush3.bf16.msra.mxu0 %v9648_v38 }
 0x977   :  { %7570 = vmatprep.subr.bf16.mxu0 %v10388_v61 }
 0x978   :  { %7600 = vmatpush3.bf16.msra.mxu1 %v9299_v17 }
 0x979   :  { %7601 = vmatprep.subr.bf16.mxu1 %v10388_v61 }
 0x97a   :  { %7572 = vmatpush3.bf16.msra.mxu0 %v9660_v33 }
 0x97b   :  { %7573 = vmatprep.subr.bf16.mxu0 %v10388_v61 }
 0x97c   :  { %7603 = vmatpush3.bf16.msra.mxu1 %v9309_v7 }
 0x97d   :  { %7605 = vmatprep.subr.bf16.mxu1 %v9312_v58 }
 0x97f   :  { %6433 = vmatmul.mubr.msk.f32.vlgmr.msra.gmra.mrb[40].mxu1 %vm134_vm0, %v5392_v9  ;;  %v9672_v9 = vpack.c.bf16 %v3230_v18, %v3229_v10 }
 0x980   :  { %7607 = vmatpush1.bf16.msra.mxu1 %v9327_v6  ;;  %3625 = vmatprep.mubr.f32.mxu1 %v10387_v0 }
 0x981   :  { %7609 = vmatprep.subr.bf16.mxu1 %v9330_v55  ;;  %7575 = vmatpush3.bf16.msra.mxu0 %v9672_v9 }
 0x982   :  { %7636 = vmatprep.subr.bf16.mxu0 %v10388_v61 }
 0x984   :  { %7611 = vmatpush1.bf16.msra.mxu1 %v9346_v39 }
 0x985   :  { %7613 = vmatprep.subr.bf16.mxu1 %v9350_v15 }
 0x988   :  { %7615 = vmatpush1.bf16.msra.mxu1 %v9365_v19 }
 0x989   :  { %7617 = vmatprep.subr.bf16.mxu1 %v9368_v32 }
 0x98c   :  { %7619 = vmatpush1.bf16.msra.mxu1 %v9383_v54 }
 0x98d   :  { %7621 = vmatprep.subr.bf16.mxu1 %v9386_v60 }
 0x990   :  { %7623 = vmatpush1.bf16.msra.mxu1 %v9401_v31 }
 0x991   :  { %7625 = vmatprep.subr.bf16.mxu1 %v9404_v43 }
 0x994   :  { %7627 = vmatpush1.bf16.msra.mxu1 %v9419_v53 }
 0x995   :  { %7629 = vmatprep.subr.bf16.mxu1 %v9422_v2 }
 0x998   :  { %7631 = vmatpush1.bf16.msra.mxu1 %v9437_v5 }
 0x999   :  { %7633 = vmatprep.subr.bf16.mxu1 %v9440_v42 }
 0x99c   :  { %7635 = vmatpush1.bf16.msra.mxu1 %v9538_v20 }
 0x99d   :  { %7685 = vmatprep.subr.bf16.mxu1 %v9261_v23  ;;  %v3046_v23 = vrot.slane %v3037_v14, %v10397_v34  ;;  %v2986_v34 = vadd.f32 %v9549_v57, %v2841_v37 }
 0x99f   :  { %v8044_v10 = vadd.f32 %v3046_v23, %v2837_v35 }
 0xa32   :  { %v3120_v26 = vpop.f32.mrb[34].mxu1  ;;  %v3191_v52 = vpop.f32.mrb[18].mxu0 }
 0xa33   :  { %v8043_v21 = vadd.f32 %v8042_v12, %v3120_v26  ;;  %v3122_v48 = vpop.f32.mrb[35].mxu1  ;;  %v6380_v25 = vpop.f32.mrb[19].mxu0  ;;  %v3192_v26 = vadd.f32 %v3191_v52, %v3050_v51 }
 0xa34   :  { %v8045_v18 = vadd.f32 %v8044_v10, %v3122_v48 }
 0xa35   :  { %v5389_v30 = vmul.f32 -1.442695, %v8043_v21 }
 0xa36   :  { %v5390_v20 = vmul.f32 -1.442695, %v8045_v18 }
 0xa37   :  { %8179 = vpow2.f32 %v5389_v30 }
 0xa38   :  { %8181 = vpow2.f32 %v5390_v20 }
 0xa41   :  { %v8180_v42 = vpop.eup %8179 }
 0xa42   :  { %v3203_v5 = vadd.f32 1.0, %v8180_v42  ;;  %v8182_v12 = vpop.eup %8181 }
 0xa43   :  { %v3204_v21 = vadd.f32 1.0, %v8182_v12 }
 0xa44   :  { %8183 = vrcp.f32 %v3203_v5 }
 0xa4e   :  { %v8184_v2 = vpop.eup %8183 }
 0xa4f   :  { %v3209_v53 = vmul.f32 %v8184_v2, %v3192_v26 }
 0xa51   :  { %v3210_v25 = vadd.f32 %v3209_v53, %v2986_v34 }
 0xa53   :  { %8185 = vtanh.f32 %v3210_v25 }
 0xa54   :  { %8187 = vrcp.f32 %v3204_v21 }
 0xa5d   :  { %v8186_v35 = vpop.eup %8185 }
 0xa5e   :  { %v3212_v23 = vsub.f32 %v9554_v44, %v8186_v35  ;;  %v8188_v42 = vpop.eup %8187 }
 0xa60   :  { %v3213_v20 = vmul.f32 %v8188_v42, %v3212_v23  ;;  %v4006_v23 = vld [vmem:[%s10357_s10 + $0x10] sm:$0xff]  ;;  %v4009_v42 = vld [vmem:[%s10357_s10 + $0x28] sm:$0xff] }
 0xa62   :  { %v9695_v5 = vadd.f32 %v8186_v35, %v3213_v20 }
 0xa64   :  { %6414 = vmatmul.mubr.f32.vlgmr.msra.gmra.mrb[20].mxu0 %v9695_v5  ;;  %3626 = vmatmul.mubr.f32.vlgmr.msra.gmra.mrb[38].mxu1 %v9695_v5 }
 0xa65   :  { %7638 = vmatpush3.bf16.msra.mxu0 %v9462_v13  ;;  %6467 = vmatprep.mubr.msk.f32.mxu0 %vm8310_vm1, %v10387_v0 }
 0xa66   :  { %7639 = vmatprep.subr.bf16.mxu0 %v10388_v61  ;;  %7687 = vmatpush1.bf16.msra.mxu1 %v9263_v27  ;;  %v9739_v27 = vpop.f32.mrb[40].mxu1 }
 0xa67   :  { %7689 = vmatprep.subr.bf16.mxu1 %v9265_v28  ;;  %3927 = vmatprep.mubr.f32.mxu1 %v10387_v0  ;;  %v6434_v28 = vpop.f32.mrb[41].mxu1 }
 0xa68   :  { %v4327_v28 = vld [vmem:[#allocation6] sm:$0xff] }
 0xa69   :  { %7641 = vmatpush3.bf16.msra.mxu0 %v9472_v46  ;;  %v10405_v46 = vld [vmem:[#allocation10_spill] sm:$0xff] }
 0xa6a   :  { %7642 = vmatprep.subr.bf16.mxu0 %v10388_v61  ;;  %7691 = vmatpush1.bf16.msra.mxu1 %v9269_v45  ;;  %v5399_v45 = vld [vmem:[%s10348_s1 + $0x4] sm:$0x3] }
 0xa6b   :  { %7693 = vmatprep.subr.bf16.mxu1 %v9272_v50  ;;  %v10399_v50 = vld [vmem:[#allocation13_spill] sm:$0xff] }
 0xa6d   :  { %7644 = vmatpush3.bf16.msra.mxu0 %v9484_v62 }
 0xa6e   :  { %7645 = vmatprep.subr.bf16.mxu0 %v10388_v61  ;;  %7695 = vmatpush1.bf16.msra.mxu1 %v9275_v3  ;;  %v10400_v3 = vld [vmem:[#allocation14_spill] sm:$0xff] }
 0xa6f   :  { %7697 = vmatprep.subr.bf16.mxu1 %v9278_v11  ;;  %v10401_v11 = vld [vmem:[#allocation15_spill] sm:$0xff] }
 0xa71   :  { %7647 = vmatpush3.bf16.msra.mxu0 %v9494_v63 }
 0xa72   :  { %7648 = vmatprep.subr.bf16.mxu0 %v10388_v61  ;;  %7699 = vmatpush1.bf16.msra.mxu1 %v9281_v24  ;;  %v10402_v24 = vld [vmem:[#allocation16_spill] sm:$0xff] }
 0xa73   :  { %7700 = vmatprep.subr.bf16.mxu1 %v10388_v61 }
 0xa75   :  { %7650 = vmatpush3.bf16.msra.mxu0 %v9504_v56  ;;  %5400 = vmatmul.mubr.msk.f32.vlgmr.msra.gmra.mrb[42].mxu1 %vm134_vm0, %v5399_v45 }
 0xa76   :  { %7651 = vmatprep.subr.bf16.mxu0 %v10388_v61  ;;  %7702 = vmatpush3.bf16.msra.mxu1 %v9288_v47  ;;  %v10403_v47 = vld [vmem:[#allocation12_spill] sm:$0xff] }
 0xa77   :  { %6521 = vmatprep.mubr.msk.f32.mxu1 %vm8310_vm1, %v10387_v0  ;;  %7703 = vmatprep.subr.bf16.mxu1 %v10388_v61 }
 0xa79   :  { %7653 = vmatpush3.bf16.msra.mxu0 %v9514_v8 }
 0xa7a   :  { %7654 = vmatprep.subr.bf16.mxu0 %v10388_v61  ;;  %7705 = vmatpush3.bf16.msra.mxu1 %v9293_v59  ;;  %v4328_v59 = vld [vmem:[#allocation6 + $0x8] sm:$0xff] }
 0xa7b   :  { %7706 = vmatprep.subr.bf16.mxu1 %v10388_v61 }
 0xa7d   :  { %7656 = vmatpush3.bf16.msra.mxu0 %v9524_v1 }
 0xa7e   :  { %7657 = vmatprep.subr.bf16.mxu0 %v10388_v61  ;;  %7708 = vmatpush3.bf16.msra.mxu1 %v9299_v17  ;;  %v4331_v17 = vld [vmem:[#allocation6 + $0x20] sm:$0xff] }
 0xa7f   :  { %7709 = vmatprep.subr.bf16.mxu1 %v10388_v61 }
 0xa81   :  { %7659 = vmatpush3.bf16.msra.mxu0 %v9543_v22 }
 0xa82   :  { %7660 = vmatprep.subr.bf16.mxu0 %v10388_v61  ;;  %7711 = vmatpush3.bf16.msra.mxu1 %v9309_v7  ;;  %v9778_v7 = vpack.c.bf16 %v4331_v17, %v4328_v59 }
 0xa83   :  { %7713 = vmatprep.subr.bf16.mxu1 %v9312_v58  ;;  %v3544_v58 = vld [vmem:[%s10359_s12] sm:$0x7] }
 0xa84   :  { %6468 = vmatmul.mubr.f32.vlgmr.msra.gmra.mrb[22].mxu0 %v9695_v5  ;;  %v3553_v63 = vrot.slane %v3544_v58, %v10405_v46  ;;  %v3557_v52 = vrot.slane %v3544_v58, %v10398_v41 }
 0xa85   :  { %7662 = vmatpush3.bf16.msra.mxu0 %v9588_v40  ;;  %6502 = vmatprep.mubr.msk.f32.mxu0 %vm8310_vm1, %v10387_v0 }
 0xa86   :  { %7663 = vmatprep.subr.bf16.mxu0 %v10388_v61  ;;  %6522 = vmatmul.mubr.msk.f32.vlgmr.msra.gmra.mrb[44].mxu1 %vm134_vm0, %v5399_v45  ;;  %v4330_v45 = vld [vmem:[#allocation6 + $0x18] sm:$0xff] }
 0xa87   :  { %7715 = vmatpush1.bf16.msra.mxu1 %v9327_v6  ;;  %4133 = vmatprep.mubr.f32.mxu1 %v10387_v0  ;;  %v3335_v6 = vld [vmem:[%s10358_s11] sm:$0x7]  ;;  %v9820_v59 = vpack.c.bf16 %v4330_v45, %v4327_v28  ;;  %v4522_v28 = vld [vmem:[%s10357_s10 + $0x50] sm:$0xff] }
 0xa88   :  { %7717 = vmatprep.subr.bf16.mxu1 %v9330_v55  ;;  %v10404_v55 = vld [vmem:[#allocation9_spill] sm:$0xff]  ;;  %v3344_v62 = vrot.slane %v3335_v6, %v10405_v46  ;;  %v3348_v34 = vrot.slane %v3335_v6, %v10398_v41 }
 0xa89   :  { %7665 = vmatpush3.bf16.msra.mxu0 %v9601_v49 }
 0xa8a   :  { %7666 = vmatprep.subr.bf16.mxu0 %v10388_v61  ;;  %v8048_v56 = vadd.f32 %v3553_v63, %v3344_v62  ;;  %v3493_v37 = vadd.f32 %v9739_v27, %v3348_v34  ;;  %v4030_v63 = vld [vmem:[%s10357_s10 + $0xd0] sm:$0xff]  ;;  %v4335_v34 = vld [vmem:[#allocation6 + $0x40] sm:$0xff] }
 0xa8b   :  { %7719 = vmatpush1.bf16.msra.mxu1 %v9346_v39  ;;  %v3340_v39 = vrot.slane %v3335_v6, %v10404_v55  ;;  %v4336_v6 = vld [vmem:[#allocation6 + $0x48] sm:$0xff] }
 0xa8c   :  { %7721 = vmatprep.subr.bf16.mxu1 %v9350_v15  ;;  %v3549_v15 = vrot.slane %v3544_v58, %v10404_v55  ;;  %v4333_v58 = vld [vmem:[#allocation6 + $0x30] sm:$0xff] }
 0xa8d   :  { %7668 = vmatpush3.bf16.msra.mxu0 %v9614_v16 }
 0xa8e   :  { %7669 = vmatprep.subr.bf16.mxu0 %v10388_v61 }
 0xa8f   :  { %7723 = vmatpush1.bf16.msra.mxu1 %v9365_v19  ;;  %v8046_v19 = vadd.f32 %v3549_v15, %v3340_v39  ;;  %v4340_v39 = vld [vmem:[#allocation6 + $0x68] sm:$0xff]  ;;  %v4343_v15 = vld [vmem:[#allocation6 + $0x80] sm:$0xff] }
 0xa90   :  { %7725 = vmatprep.subr.bf16.mxu1 %v9368_v32  ;;  %v9792_v32 = vld [vmem:[%s10361_s14] ss:$0 sm:$0xff] }
 0xa91   :  { %7671 = vmatpush3.bf16.msra.mxu0 %v9626_v4 }
 0xa92   :  { %7672 = vmatprep.subr.bf16.mxu0 %v10388_v61 }
 0xa93   :  { %7727 = vmatpush1.bf16.msra.mxu1 %v9383_v54 }
 0xa94   :  { %7729 = vmatprep.subr.bf16.mxu1 %v9386_v60 }
 0xa95   :  { %7674 = vmatpush3.bf16.msra.mxu0 %v9638_v29 }
 0xa96   :  { %7675 = vmatprep.subr.bf16.mxu0 %v10388_v61 }
 0xa97   :  { %7731 = vmatpush1.bf16.msra.mxu1 %v9401_v31 }
 0xa98   :  { %7733 = vmatprep.subr.bf16.mxu1 %v9404_v43 }
 0xa99   :  { %7677 = vmatpush3.bf16.msra.mxu0 %v9648_v38 }
 0xa9a   :  { %7678 = vmatprep.subr.bf16.mxu0 %v10388_v61 }
 0xa9b   :  { %7735 = vmatpush1.bf16.msra.mxu1 %v10399_v50  ;;  %v4334_v50 = vld [vmem:[#allocation6 + $0x38] sm:$0xff] }
 0xa9c   :  { %7737 = vmatprep.subr.bf16.mxu1 %v10400_v3  ;;  %v4337_v3 = vld [vmem:[#allocation6 + $0x50] sm:$0xff] }
 0xa9d   :  { %7680 = vmatpush3.bf16.msra.mxu0 %v9660_v33  ;;  %v9822_v17 = vpack.c.bf16 %v4337_v3, %v4334_v50  ;;  %v4518_v50 = vld [vmem:[%s10357_s10 + $0x30] sm:$0xff]  ;;  %v4521_v3 = vld [vmem:[%s10357_s10 + $0x48] sm:$0xff] }
 0xa9e   :  { %7681 = vmatprep.subr.bf16.mxu0 %v10388_v61 }
 0xa9f   :  { %7739 = vmatpush1.bf16.msra.mxu1 %v10401_v11  ;;  %v9810_v11 = vpack.c.bf16 %v4009_v42, %v4006_v23  ;;  %v4515_v42 = vld [vmem:[%s10357_s10 + $0x18] sm:$0xff] }
 0xaa0   :  { %7741 = vmatprep.subr.bf16.mxu1 %v10402_v24 }
 0xaa1   :  { %7683 = vmatpush3.bf16.msra.mxu0 %v9672_v9 }
 0xaa2   :  { %7744 = vmatprep.subr.bf16.mxu0 %v10388_v61 }
 0xaa3   :  { %7743 = vmatpush1.bf16.msra.mxu1 %v10403_v47  ;;  %v4015_v47 = vld [vmem:[%s10357_s10 + $0x58] sm:$0xff] }
 0xaa4   :  { %7793 = vmatprep.subr.bf16.mxu1 %v9778_v7 }
 0xb37   :  { %v3304_v54 = vpop.f32.mrb[20].mxu0  ;;  %v3627_v60 = vpop.f32.mrb[38].mxu1 }
 0xb38   :  { %v3305_v31 = vadd.f32 %v9792_v32, %v3304_v54  ;;  %v8047_v43 = vadd.f32 %v8046_v19, %v3627_v60  ;;  %v6415_v53 = vpop.f32.mrb[21].mxu0  ;;  %v3629_v2 = vpop.f32.mrb[39].mxu1  ;;  %v4018_v54 = vld [vmem:[%s10357_s10 + $0x70] sm:$0xff]  ;;  %v4021_v60 = vld [vmem:[%s10357_s10 + $0x88] sm:$0xff] }
 0xb39   :  { %v8049_v57 = vadd.f32 %v8048_v56, %v3629_v2  ;;  %v9846_v53 = vpack.c.bf16 %v4021_v60, %v4018_v54  ;;  %v4024_v2 = vld [vmem:[%s10357_s10 + $0xa0] sm:$0xff]  ;;  %v4033_v56 = vld [vmem:[%s10357_s10 + $0xe8] sm:$0xff]  ;;  %v4531_v60 = vld [vmem:[%s10357_s10 + $0x98] sm:$0xff] }
 0xb3a   :  { %3308 = vst [vmem:[%s10362_s15] sm:$0x3] %v3305_v31  ;;  %v5395_v13 = vmul.f32 -1.442695, %v8047_v43  ;;  %v9839_v31 = vpack.c.bf16 %v4336_v6, %v4333_v58  ;;  %v9842_v43 = vpack.c.bf16 %v4343_v15, %v4340_v39  ;;  %v4528_v58 = vld [vmem:[%s10357_s10 + $0x80] sm:$0xff]  ;;  %v4527_v15 = vld [vmem:[%s10357_s10 + $0x78] sm:$0xff] }
 0xb3b   :  { %v5396_v14 = vmul.f32 -1.442695, %v8049_v57  ;;  %v9868_v57 = vpack.c.bf16 %v4033_v56, %v4030_v63  ;;  %v4524_v39 = vld [vmem:[%s10357_s10 + $0x60] sm:$0xff]  ;;  %v4530_v63 = vld [vmem:[%s10357_s10 + $0x90] sm:$0xff]  ;;  %v4533_v56 = vld [vmem:[%s10357_s10 + $0xa8] sm:$0xff] }
 0xb3c   :  { %8189 = vpow2.f32 %v5395_v13  ;;  %v4027_v13 = vld [vmem:[%s10357_s10 + $0xb8] sm:$0xff]  ;;  %v9983_v54 = vpack.c.bf16 %v4527_v15, %v4524_v39  ;;  %v3843_v39 = vld [vmem:[%s10358_s11] sm:$0x7] }
 0xb3d   :  { %8191 = vpow2.f32 %v5396_v14  ;;  %v9858_v62 = vpack.c.bf16 %v4027_v13, %v4024_v2  ;;  %v4534_v2 = vld [vmem:[%s10357_s10 + $0xb0] sm:$0xff]  ;;  %v3848_v15 = vrot.slane %v3843_v39, %v10404_v55 }
 0xb3e   :  { %v9993_v13 = vpack.c.bf16 %v4534_v2, %v4531_v60 }
 0xb46   :  { %v8190_v44 = vpop.eup %8189 }
 0xb47   :  { %v3710_v36 = vadd.f32 1.0, %v8190_v44  ;;  %v8192_v30 = vpop.eup %8191  ;;  %v4348_v44 = vld [vmem:[#allocation6 + $0xa8] sm:$0xff] }
 0xb48   :  { %v3711_v26 = vadd.f32 1.0, %v8192_v30 }
 0xb49   :  { %8193 = vrcp.f32 %v3710_v36 }
 0xb53   :  { %v8194_v51 = vpop.eup %8193 }
 0xb57   :  { %v3698_v48 = vpop.f32.mrb[22].mxu0 }
 0xb58   :  { %v3699_v10 = vadd.f32 %v3698_v48, %v3557_v52  ;;  %v6469_v18 = vpop.f32.mrb[23].mxu0  ;;  %v5406_v52 = vld [vmem:[%s10348_s1 + $0x6] sm:$0x3]  ;;  %v4338_v48 = vld [vmem:[#allocation6 + $0x58] sm:$0xff] }
 0xb59   :  { %v9920_v30 = vpack.c.bf16 %v4338_v48, %v4335_v34  ;;  %v4344_v18 = vld [vmem:[#allocation6 + $0x88] sm:$0xff] }
 0xb5a   :  { %v3716_v12 = vmul.f32 %v8194_v51, %v3699_v10  ;;  %v4341_v10 = vld [vmem:[#allocation6 + $0x70] sm:$0xff]  ;;  %v4545_v48 = vld [vmem:[%s10357_s10 + $0x108] sm:$0xff] }
 0xb5b   :  { %v9924_v51 = vpack.c.bf16 %v4344_v18, %v4341_v10  ;;  %v4549_v10 = vld [vmem:[%s10357_s10 + $0x128] sm:$0xff]  ;;  %v4552_v18 = vld [vmem:[%s10357_s10 + $0x140] sm:$0xff] }
 0xb5c   :  { %v3717_v25 = vadd.f32 %v3716_v12, %v3493_v37  ;;  %v4347_v37 = vld [vmem:[#allocation6 + $0xa0] sm:$0xff]  ;;  %v4350_v12 = vld [vmem:[#allocation6 + $0xb8] sm:$0xff] }
 0xb5e   :  { %8195 = vtanh.f32 %v3717_v25  ;;  %v4513_v25 = vld [vmem:[%s10357_s10 + $0x8] sm:$0xff] }
 0xb5f   :  { %8197 = vrcp.f32 %v3711_v26  ;;  %v9928_v26 = vpack.c.bf16 %v4350_v12, %v4347_v37  ;;  %v10046_v12 = vpack.c.bf16 %v4552_v18, %v4549_v10 }
 0xb68   :  { %v8196_v21 = vpop.eup %8195 }
 0xb69   :  { %v3719_v35 = vsub.f32 %v9695_v5, %v8196_v21  ;;  %v8198_v20 = vpop.eup %8197  ;;  %v4012_v5 = vld [vmem:[%s10357_s10 + $0x40] sm:$0xff] }
 0xb6a   :  { %v9827_v19 = vpack.c.bf16 %v4015_v47, %v4012_v5  ;;  %v9964_v5 = vpack.c.bf16 %v4521_v3, %v4518_v50  ;;  %v4525_v47 = vld [vmem:[%s10357_s10 + $0x68] sm:$0xff]  ;;  %v4554_v50 = vld [vmem:[%s10357_s10 + $0x150] sm:$0xff] }
 0xb6b   :  { %v3720_v27 = vmul.f32 %v8198_v20, %v3719_v35  ;;  %v4512_v35 = vld [vmem:[%s10357_s10] sm:$0xff]  ;;  %v4519_v20 = vld [vmem:[%s10357_s10 + $0x38] sm:$0xff]  ;;  %v9975_v6 = vpack.c.bf16 %v4528_v58, %v4525_v47  ;;  %v4557_v3 = vld [vmem:[%s10357_s10 + $0x168] sm:$0xff] }
 0xb6c   :  { %v9951_v45 = vpack.c.bf16 %v4515_v42, %v4512_v35  ;;  %v4555_v35 = vld [vmem:[%s10357_s10 + $0x158] sm:$0xff]  ;;  %v4558_v42 = vld [vmem:[%s10357_s10 + $0x170] sm:$0xff]  ;;  %v10073_v47 = vpack.c.bf16 %v4557_v3, %v4554_v50  ;;  %v4052_v58 = vld [vmem:[%s10359_s12] sm:$0x7] }
 0xb6d   :  { %v9812_v24 = vadd.f32 %v8196_v21, %v3720_v27  ;;  %v4516_v21 = vld [vmem:[%s10357_s10 + $0x20] sm:$0xff]  ;;  %v9954_v27 = vpack.c.bf16 %v4522_v28, %v4519_v20  ;;  %v10064_v28 = vpack.c.bf16 %v4558_v42, %v4555_v35  ;;  %v4057_v60 = vrot.slane %v4052_v58, %v10404_v55 }
 0xb6e   :  { %v9939_v23 = vpack.c.bf16 %v4516_v21, %v4513_v25  ;;  %v4548_v25 = vld [vmem:[%s10357_s10 + $0x120] sm:$0xff]  ;;  %v4551_v21 = vld [vmem:[%s10357_s10 + $0x138] sm:$0xff]  ;;  %v3856_v35 = vrot.slane %v3843_v39, %v10398_v41 }
 0xb6f   :  { %6503 = vmatmul.mubr.f32.vlgmr.msra.gmra.mrb[24].mxu0 %v9812_v24  ;;  %4134 = vmatmul.mubr.f32.vlgmr.msra.gmra.mrb[42].mxu1 %v9812_v24  ;;  %v10061_v20 = vpack.c.bf16 %v4551_v21, %v4548_v25  ;;  %v8050_v2 = vadd.f32 %v4057_v60, %v3848_v15  ;;  %v4065_v21 = vrot.slane %v4052_v58, %v10398_v41 }
 0xb70   :  { %7746 = vmatpush3.bf16.msra.mxu0 %v9810_v11  ;;  %6556 = vmatprep.mubr.msk.f32.mxu0 %vm8310_vm1, %v10387_v0 }
 0xb71   :  { %7747 = vmatprep.subr.bf16.mxu0 %v10388_v61  ;;  %7795 = vmatpush1.bf16.msra.mxu1 %v9820_v59 }
 0xb72   :  { %7797 = vmatprep.subr.bf16.mxu1 %v9822_v17  ;;  %4435 = vmatprep.mubr.f32.mxu1 %v10387_v0 }
 0xb74   :  { %7749 = vmatpush3.bf16.msra.mxu0 %v9827_v19 }
 0xb75   :  { %7750 = vmatprep.subr.bf16.mxu0 %v10388_v61  ;;  %7799 = vmatpush1.bf16.msra.mxu1 %v9839_v31 }
 0xb76   :  { %7801 = vmatprep.subr.bf16.mxu1 %v9842_v43 }
 0xb78   :  { %7752 = vmatpush3.bf16.msra.mxu0 %v9846_v53 }
 0xb79   :  { %7753 = vmatprep.subr.bf16.mxu0 %v10388_v61 }
 0xb7c   :  { %7755 = vmatpush3.bf16.msra.mxu0 %v9858_v62 }
 0xb7d   :  { %7756 = vmatprep.subr.bf16.mxu0 %v10388_v61 }
 0xb80   :  { %7758 = vmatpush3.bf16.msra.mxu0 %v9868_v57 }
 0xb81   :  { %7759 = vmatprep.subr.bf16.mxu0 %v10388_v61 }
 0xb84   :  { %7761 = vmatpush3.bf16.msra.mxu0 %v9514_v8  ;;  %v9892_v8 = vpop.f32.mrb[44].mxu1 }
 0xb85   :  { %7762 = vmatprep.subr.bf16.mxu0 %v10388_v61 }
 0xb88   :  { %7764 = vmatpush3.bf16.msra.mxu0 %v9524_v1  ;;  %v6523_v1 = vpop.f32.mrb[45].mxu1 }
 0xb89   :  { %7765 = vmatprep.subr.bf16.mxu0 %v10388_v61  ;;  %v10001_v1 = vpack.c.bf16 %v4533_v56, %v4530_v63 }
 0xb8c   :  { %7767 = vmatpush3.bf16.msra.mxu0 %v9543_v22  ;;  %v4339_v22 = vld [vmem:[#allocation6 + $0x60] sm:$0xff] }
 0xb8d   :  { %7768 = vmatprep.subr.bf16.mxu0 %v10388_v61 }
 0xb8f   :  { %6557 = vmatmul.mubr.f32.vlgmr.msra.gmra.mrb[26].mxu0 %v9812_v24 }
 0xb90   :  { %7770 = vmatpush3.bf16.msra.mxu0 %v9588_v40  ;;  %6591 = vmatprep.mubr.msk.f32.mxu0 %vm8310_vm1, %v10387_v0  ;;  %v4342_v40 = vld [vmem:[#allocation6 + $0x78] sm:$0xff] }
 0xb91   :  { %7771 = vmatprep.subr.bf16.mxu0 %v10388_v61 }
 0xb94   :  { %7773 = vmatpush3.bf16.msra.mxu0 %v9601_v49  ;;  %v9900_v49 = vpack.c.bf16 %v4342_v40, %v4339_v22  ;;  %v4537_v22 = vld [vmem:[%s10357_s10 + $0xc8] sm:$0xff]  ;;  %v4540_v40 = vld [vmem:[%s10357_s10 + $0xe0] sm:$0xff] }
 0xb95   :  { %7774 = vmatprep.subr.bf16.mxu0 %v10388_v61 }
 0xb96   :  { %7803 = vmatpush1.bf16.msra.mxu1 %v9900_v49 }
 0xb98   :  { %7776 = vmatpush3.bf16.msra.mxu0 %v9614_v16  ;;  %v4346_v16 = vld [vmem:[#allocation6 + $0x98] sm:$0xff] }
 0xb99   :  { %7777 = vmatprep.subr.bf16.mxu0 %v10388_v61 }
 0xb9c   :  { %7779 = vmatpush3.bf16.msra.mxu0 %v9626_v4  ;;  %v4349_v4 = vld [vmem:[#allocation6 + $0xb0] sm:$0xff] }
 0xb9d   :  { %7780 = vmatprep.subr.bf16.mxu0 %v10388_v61 }
 0xba0   :  { %7782 = vmatpush3.bf16.msra.mxu0 %v9638_v29  ;;  %v9903_v29 = vpack.c.bf16 %v4349_v4, %v4346_v16  ;;  %v10011_v16 = vpack.c.bf16 %v4540_v40, %v4537_v22  ;;  %v4536_v4 = vld [vmem:[%s10357_s10 + $0xc0] sm:$0xff] }
 0xba1   :  { %7783 = vmatprep.subr.bf16.mxu0 %v10388_v61 }
 0xba2   :  { %7805 = vmatprep.subr.bf16.mxu1 %v9903_v29 }
 0xba4   :  { %7785 = vmatpush3.bf16.msra.mxu0 %v9648_v38  ;;  %v4345_v38 = vld [vmem:[#allocation6 + $0x90] sm:$0xff] }
 0xba5   :  { %7786 = vmatprep.subr.bf16.mxu0 %v10388_v61  ;;  %v9905_v14 = vpack.c.bf16 %v4348_v44, %v4345_v38  ;;  %v4539_v38 = vld [vmem:[%s10357_s10 + $0xd8] sm:$0xff] }
 0xba6   :  { %v10019_v44 = vpack.c.bf16 %v4539_v38, %v4536_v4 }
 0xba7   :  { %7807 = vmatpush1.bf16.msra.mxu1 %v9905_v14 }
 0xba8   :  { %7788 = vmatpush3.bf16.msra.mxu0 %v9660_v33  ;;  %7808 = vmatprep.subr.bf16.mxu1 %v10388_v61  ;;  %v4329_v33 = vld [vmem:[#allocation6 + $0x10] sm:$0xff] }
 0xba9   :  { %7789 = vmatprep.subr.bf16.mxu0 %v10388_v61 }
 0xbaa   :  { %5407 = vmatmul.mubr.msk.f32.vlgmr.msra.gmra.mrb[46].mxu1 %vm134_vm0, %v5406_v52 }
 0xbab   :  { %6610 = vmatprep.mubr.msk.f32.mxu1 %vm8310_vm1, %v10387_v0 }
 0xbac   :  { %7791 = vmatpush3.bf16.msra.mxu0 %v9672_v9  ;;  %v4332_v9 = vld [vmem:[#allocation6 + $0x28] sm:$0xff] }
 0xbad   :  { %7852 = vmatprep.subr.bf16.mxu0 %v10388_v61  ;;  %v9910_v36 = vpack.c.bf16 %v4332_v9, %v4329_v33  ;;  %v4543_v33 = vld [vmem:[%s10357_s10 + $0xf8] sm:$0xff]  ;;  %v4546_v9 = vld [vmem:[%s10357_s10 + $0x110] sm:$0xff] }
 0xbae   :  { %v10031_v34 = vpack.c.bf16 %v4546_v9, %v4543_v33  ;;  %v3852_v33 = vrot.slane %v3843_v39, %v10405_v46  ;;  %v4061_v9 = vrot.slane %v4052_v58, %v10405_v46 }
 0xbaf   :  { %7810 = vmatpush3.bf16.msra.mxu1 %v9910_v36 }
 0xbb0   :  { %7811 = vmatprep.subr.bf16.mxu1 %v10388_v61 }
 0xbb3   :  { %7813 = vmatpush3.bf16.msra.mxu1 %v9920_v30 }
 0xbb4   :  { %7814 = vmatprep.subr.bf16.mxu1 %v10388_v61 }
 0xbb7   :  { %7816 = vmatpush3.bf16.msra.mxu1 %v9924_v51 }
 0xbb8   :  { %7817 = vmatprep.subr.bf16.mxu1 %v10388_v61 }
 0xbbb   :  { %7819 = vmatpush3.bf16.msra.mxu1 %v9928_v26 }
 0xbbc   :  { %7821 = vmatprep.subr.bf16.mxu1 %v9939_v23 }
 0xbbe   :  { %6611 = vmatmul.mubr.msk.f32.vlgmr.msra.gmra.mrb[48].mxu1 %vm134_vm0, %v5406_v52  ;;  %v4542_v52 = vld [vmem:[%s10357_s10 + $0xf0] sm:$0xff] }
 0xbbf   :  { %7823 = vmatpush1.bf16.msra.mxu1 %v9951_v45  ;;  %4641 = vmatprep.mubr.f32.mxu1 %v10387_v0  ;;  %v10043_v37 = vpack.c.bf16 %v4545_v48, %v4542_v52  ;;  %v8052_v52 = vadd.f32 %v4061_v9, %v3852_v33  ;;  %v5413_v9 = vld [vmem:[%s10348_s1 + $0x8] sm:$0x3] }
 0xbc0   :  { %7825 = vmatprep.subr.bf16.mxu1 %v9954_v27 }
 0xbc3   :  { %7827 = vmatpush1.bf16.msra.mxu1 %v9964_v5 }
 0xbc4   :  { %7829 = vmatprep.subr.bf16.mxu1 %v9975_v6 }
 0xbc7   :  { %7831 = vmatpush1.bf16.msra.mxu1 %v9983_v54 }
 0xbc8   :  { %7833 = vmatprep.subr.bf16.mxu1 %v9993_v13 }
 0xbcb   :  { %7835 = vmatpush1.bf16.msra.mxu1 %v10001_v1 }
 0xbcc   :  { %7837 = vmatprep.subr.bf16.mxu1 %v10011_v16 }
 0xbcf   :  { %7839 = vmatpush1.bf16.msra.mxu1 %v10019_v44 }
 0xbd0   :  { %7841 = vmatprep.subr.bf16.mxu1 %v10031_v34 }
 0xbd3   :  { %7843 = vmatpush1.bf16.msra.mxu1 %v10043_v37 }
 0xbd4   :  { %7845 = vmatprep.subr.bf16.mxu1 %v10046_v12 }
 0xbd7   :  { %7847 = vmatpush1.bf16.msra.mxu1 %v10061_v20 }
 0xbd8   :  { %7849 = vmatprep.subr.bf16.mxu1 %v10064_v28 }
 0xbdb   :  { %7851 = vmatpush1.bf16.msra.mxu1 %v10073_v47 }
 0xbdc   :  { %7901 = vmatprep.subr.bf16.mxu1 %v9778_v7 }
 0xc42   :  { %v3811_v63 = vpop.f32.mrb[24].mxu0  ;;  %v4135_v56 = vpop.f32.mrb[42].mxu1 }
 0xc43   :  { %v3812_v22 = vadd.f32 %v9792_v32, %v3811_v63  ;;  %v8051_v40 = vadd.f32 %v8050_v2, %v4135_v56  ;;  %v6504_v4 = vpop.f32.mrb[25].mxu0  ;;  %v4137_v7 = vpop.f32.mrb[43].mxu1  ;;  %v4001_v2 = vadd.f32 %v9892_v8, %v3856_v35 }
 0xc44   :  { %v8053_v48 = vadd.f32 %v8052_v52, %v4137_v7  ;;  %v4738_v52 = vld [vmem:[%s10360_s13] sm:$0xff] }
 0xc45   :  { %5398 = vst [vmem:[%s10362_s15 + $0x2] sm:$0x3] %v3812_v22  ;;  %v5402_v38 = vmul.f32 -1.442695, %v8051_v40 }
 0xc46   :  { %v5403_v18 = vmul.f32 -1.442695, %v8053_v48  ;;  %v4740_v48 = vld [vmem:[%s10360_s13 + $0x10] sm:$0xff] }
 0xc47   :  { %8199 = vpow2.f32 %v5402_v38 }
 0xc48   :  { %8201 = vpow2.f32 %v5403_v18 }
 0xc51   :  { %v8200_v10 = vpop.eup %8199 }
 0xc52   :  { %v4218_v25 = vadd.f32 1.0, %v8200_v10  ;;  %v8202_v50 = vpop.eup %8201 }
 0xc53   :  { %v4219_v56 = vadd.f32 1.0, %v8202_v50  ;;  %v4752_v50 = vld [vmem:[%s10360_s13 + $0x70] sm:$0xff] }
 0xc54   :  { %8203 = vrcp.f32 %v4218_v25 }
 0xc5e   :  { %v8204_v60 = vpop.eup %8203 }
 0xc62   :  { %v4206_v42 = vpop.f32.mrb[26].mxu0 }
 0xc63   :  { %v4207_v3 = vadd.f32 %v4206_v42, %v4065_v21  ;;  %v6558_v15 = vpop.f32.mrb[27].mxu0 }
 0xc65   :  { %v4224_v63 = vmul.f32 %v8204_v60, %v4207_v3  ;;  %v4753_v3 = vld [vmem:[%s10360_s13 + $0x78] sm:$0xff] }
 0xc67   :  { %v4225_v22 = vadd.f32 %v4224_v63, %v4001_v2 }
 0xc69   :  { %8205 = vtanh.f32 %v4225_v22 }
 0xc6a   :  { %8207 = vrcp.f32 %v4219_v56 }
 0xc73   :  { %v8206_v40 = vpop.eup %8205 }
 0xc74   :  { %v4227_v4 = vsub.f32 %v9812_v24, %v8206_v40  ;;  %v8208_v7 = vpop.eup %8207  ;;  %v4544_v24 = vld [vmem:[%s10357_s10 + $0x100] sm:$0xff] }
 0xc76   :  { %v4228_v38 = vmul.f32 %v8208_v7, %v4227_v4 }
 0xc78   :  { %v10096_v58 = vadd.f32 %v8206_v40, %v4228_v38 }
 0xc7a   :  { %6592 = vmatmul.mubr.f32.vlgmr.msra.gmra.mrb[28].mxu0 %v10096_v58  ;;  %4642 = vmatmul.mubr.f32.vlgmr.msra.gmra.mrb[46].mxu1 %v10096_v58 }
 0xc7b   :  { %7854 = vmatpush3.bf16.msra.mxu0 %v9810_v11  ;;  %6645 = vmatprep.mubr.msk.f32.mxu0 %vm8310_vm1, %v10387_v0 }
 0xc7c   :  { %7855 = vmatprep.subr.bf16.mxu0 %v10388_v61  ;;  %7903 = vmatpush1.bf16.msra.mxu1 %v9820_v59  ;;  %v4547_v59 = vld [vmem:[%s10357_s10 + $0x118] sm:$0xff] }
 0xc7d   :  { %7905 = vmatprep.subr.bf16.mxu1 %v9822_v17  ;;  %4943 = vmatprep.mubr.f32.mxu1 %v10387_v0  ;;  %v10126_v17 = vpack.c.bf16 %v4547_v59, %v4544_v24 }
 0xc7f   :  { %7857 = vmatpush3.bf16.msra.mxu0 %v9827_v19 }
 0xc80   :  { %7858 = vmatprep.subr.bf16.mxu0 %v10388_v61  ;;  %7907 = vmatpush1.bf16.msra.mxu1 %v9839_v31  ;;  %v4550_v31 = vld [vmem:[%s10357_s10 + $0x130] sm:$0xff] }
 0xc81   :  { %7909 = vmatprep.subr.bf16.mxu1 %v9842_v43  ;;  %v4553_v43 = vld [vmem:[%s10357_s10 + $0x148] sm:$0xff] }
 0xc82   :  { %v10136_v8 = vpack.c.bf16 %v4553_v43, %v4550_v31 }
 0xc83   :  { %7860 = vmatpush3.bf16.msra.mxu0 %v9846_v53 }
 0xc84   :  { %7861 = vmatprep.subr.bf16.mxu0 %v10388_v61  ;;  %7911 = vmatpush1.bf16.msra.mxu1 %v9900_v49  ;;  %v4556_v49 = vld [vmem:[%s10357_s10 + $0x160] sm:$0xff] }
 0xc85   :  { %7913 = vmatprep.subr.bf16.mxu1 %v9903_v29  ;;  %v4559_v29 = vld [vmem:[%s10357_s10 + $0x178] sm:$0xff] }
 0xc87   :  { %7863 = vmatpush3.bf16.msra.mxu0 %v9858_v62 }
 0xc88   :  { %7864 = vmatprep.subr.bf16.mxu0 %v10388_v61  ;;  %7915 = vmatpush1.bf16.msra.mxu1 %v9905_v14  ;;  %v10146_v14 = vpack.c.bf16 %v4559_v29, %v4556_v49 }
 0xc89   :  { %7916 = vmatprep.subr.bf16.mxu1 %v10388_v61 }
 0xc8b   :  { %7866 = vmatpush3.bf16.msra.mxu0 %v9868_v57  ;;  %5414 = vmatmul.mubr.msk.f32.vlgmr.msra.gmra.mrb[50].mxu1 %vm134_vm0, %v5413_v9 }
 0xc8c   :  { %7867 = vmatprep.subr.bf16.mxu0 %v10388_v61  ;;  %7918 = vmatpush3.bf16.msra.mxu1 %v9910_v36  ;;  %v4739_v36 = vld [vmem:[%s10360_s13 + $0x8] sm:$0xff] }
 0xc8d   :  { %6699 = vmatprep.mubr.msk.f32.mxu1 %vm8310_vm1, %v10387_v0  ;;  %7919 = vmatprep.subr.bf16.mxu1 %v10388_v61  ;;  %v10177_v10 = vpack.c.bf16 %v4739_v36, %v4738_v52 }
 0xc8f   :  { %7869 = vmatpush3.bf16.msra.mxu0 %v10126_v17 }
 0xc90   :  { %7870 = vmatprep.subr.bf16.mxu0 %v10388_v61  ;;  %7921 = vmatpush3.bf16.msra.mxu1 %v9920_v30  ;;  %v4741_v30 = vld [vmem:[%s10360_s13 + $0x18] sm:$0xff] }
 0xc91   :  { %v10154_v39 = vpop.f32.mrb[48].mxu1  ;;  %7922 = vmatprep.subr.bf16.mxu1 %v10388_v61 }
 0xc92   :  { %v6612_v33 = vpop.f32.mrb[49].mxu1 }
 0xc93   :  { %7872 = vmatpush3.bf16.msra.mxu0 %v10136_v8 }
 0xc94   :  { %7873 = vmatprep.subr.bf16.mxu0 %v10388_v61  ;;  %7924 = vmatpush3.bf16.msra.mxu1 %v9924_v51  ;;  %v10184_v51 = vpack.c.bf16 %v4741_v30, %v4740_v48 }
 0xc95   :  { %7925 = vmatprep.subr.bf16.mxu1 %v10388_v61 }
 0xc97   :  { %7875 = vmatpush3.bf16.msra.mxu0 %v10146_v14 }
 0xc98   :  { %7876 = vmatprep.subr.bf16.mxu0 %v10388_v61  ;;  %7927 = vmatpush3.bf16.msra.mxu1 %v9928_v26  ;;  %v4742_v26 = vld [vmem:[%s10360_s13 + $0x20] sm:$0xff] }
 0xc99   :  { %7929 = vmatprep.subr.bf16.mxu1 %v9939_v23  ;;  %v4743_v23 = vld [vmem:[%s10360_s13 + $0x28] sm:$0xff] }
 0xc9a   :  { %6646 = vmatmul.mubr.f32.vlgmr.msra.gmra.mrb[30].mxu0 %v10096_v58  ;;  %v10201_v18 = vpack.c.bf16 %v4743_v23, %v4742_v26 }
 0xc9b   :  { %6680 = vmatprep.mubr.msk.f32.mxu0 %vm8310_vm1, %v10387_v0  ;;  %7878 = vmatpush3.bf16.msra.mxu0 %v10177_v10 }
 0xc9c   :  { %7879 = vmatprep.subr.bf16.mxu0 %v10388_v61  ;;  %6700 = vmatmul.mubr.msk.f32.vlgmr.msra.gmra.mrb[52].mxu1 %vm134_vm0, %v5413_v9 }
 0xc9d   :  { %7931 = vmatpush1.bf16.msra.mxu1 %v9951_v45  ;;  %5149 = vmatprep.mubr.f32.mxu1 %v10387_v0  ;;  %v4744_v45 = vld [vmem:[%s10360_s13 + $0x30] sm:$0xff] }
 0xc9e   :  { %7933 = vmatprep.subr.bf16.mxu1 %v9954_v27  ;;  %v4745_v27 = vld [vmem:[%s10360_s13 + $0x38] sm:$0xff] }
 0xc9f   :  { %7881 = vmatpush3.bf16.msra.mxu0 %v10184_v51  ;;  %v10213_v25 = vpack.c.bf16 %v4745_v27, %v4744_v45 }
 0xca0   :  { %7882 = vmatprep.subr.bf16.mxu0 %v10388_v61 }
 0xca1   :  { %7935 = vmatpush1.bf16.msra.mxu1 %v9964_v5  ;;  %v4746_v5 = vld [vmem:[%s10360_s13 + $0x40] sm:$0xff] }
 0xca2   :  { %7937 = vmatprep.subr.bf16.mxu1 %v9975_v6  ;;  %v4747_v6 = vld [vmem:[%s10360_s13 + $0x48] sm:$0xff] }
 0xca3   :  { %7884 = vmatpush3.bf16.msra.mxu0 %v10201_v18  ;;  %v10225_v21 = vpack.c.bf16 %v4747_v6, %v4746_v5 }
 0xca4   :  { %7885 = vmatprep.subr.bf16.mxu0 %v10388_v61 }
 0xca5   :  { %7939 = vmatpush1.bf16.msra.mxu1 %v9983_v54  ;;  %v4748_v54 = vld [vmem:[%s10360_s13 + $0x50] sm:$0xff] }
 0xca6   :  { %7941 = vmatprep.subr.bf16.mxu1 %v9993_v13  ;;  %v4749_v13 = vld [vmem:[%s10360_s13 + $0x58] sm:$0xff] }
 0xca7   :  { %7887 = vmatpush3.bf16.msra.mxu0 %v10213_v25  ;;  %v10235_v35 = vpack.c.bf16 %v4749_v13, %v4748_v54 }
 0xca8   :  { %7888 = vmatprep.subr.bf16.mxu0 %v10388_v61 }
 0xca9   :  { %7943 = vmatpush1.bf16.msra.mxu1 %v10001_v1  ;;  %v4750_v1 = vld [vmem:[%s10360_s13 + $0x60] sm:$0xff] }
 0xcaa   :  { %7945 = vmatprep.subr.bf16.mxu1 %v10011_v16  ;;  %v4751_v16 = vld [vmem:[%s10360_s13 + $0x68] sm:$0xff] }
 0xcab   :  { %7890 = vmatpush3.bf16.msra.mxu0 %v10225_v21  ;;  %v10247_v42 = vpack.c.bf16 %v4751_v16, %v4750_v1 }
 0xcac   :  { %7891 = vmatprep.subr.bf16.mxu0 %v10388_v61 }
 0xcad   :  { %7947 = vmatpush1.bf16.msra.mxu1 %v10019_v44  ;;  %v10259_v44 = vpack.c.bf16 %v4753_v3, %v4752_v50 }
 0xcae   :  { %7949 = vmatprep.subr.bf16.mxu1 %v10031_v34  ;;  %v4560_v34 = vld [vmem:[%s10359_s12] sm:$0x7] }
 0xcaf   :  { %7893 = vmatpush3.bf16.msra.mxu0 %v10235_v35  ;;  %v4569_v4 = vrot.slane %v4560_v34, %v10405_v46 }
 0xcb0   :  { %7894 = vmatprep.subr.bf16.mxu0 %v10388_v61 }
 0xcb1   :  { %7951 = vmatpush1.bf16.msra.mxu1 %v10043_v37  ;;  %v4351_v37 = vld [vmem:[%s10358_s11] sm:$0x7] }
 0xcb2   :  { %7953 = vmatprep.subr.bf16.mxu1 %v10046_v12  ;;  %v4356_v12 = vrot.slane %v4351_v37, %v10404_v55  ;;  %v4360_v40 = vrot.slane %v4351_v37, %v10405_v46  ;;  %v4364_v43 = vrot.slane %v4351_v37, %v10398_v41 }
 0xcb3   :  { %7896 = vmatpush3.bf16.msra.mxu0 %v10247_v42 }
 0xcb4   :  { %7897 = vmatprep.subr.bf16.mxu0 %v10388_v61  ;;  %v8056_v7 = vadd.f32 %v4569_v4, %v4360_v40  ;;  %v4509_v36 = vadd.f32 %v10154_v39, %v4364_v43 }
 0xcb5   :  { %7955 = vmatpush1.bf16.msra.mxu1 %v10061_v20  ;;  %v4565_v20 = vrot.slane %v4560_v34, %v10404_v55 }
 0xcb6   :  { %7957 = vmatprep.subr.bf16.mxu1 %v10064_v28 }
 0xcb7   :  { %7899 = vmatpush3.bf16.msra.mxu0 %v10259_v44  ;;  %v8054_v15 = vadd.f32 %v4565_v20, %v4356_v12 }
 0xcb8   :  { %7960 = vmatprep.subr.bf16.mxu0 %v10388_v61 }
 0xcb9   :  { %7959 = vmatpush1.bf16.msra.mxu1 %v10073_v47 }
 0xd4d   :  { %v4319_v28 = vpop.f32.mrb[28].mxu0  ;;  %v4643_v60 = vpop.f32.mrb[46].mxu1 }
 0xd4e   :  { %v4320_v2 = vadd.f32 %v9792_v32, %v4319_v28  ;;  %v8055_v63 = vadd.f32 %v8054_v15, %v4643_v60  ;;  %v6593_v56 = vpop.f32.mrb[29].mxu0  ;;  %v4645_v47 = vpop.f32.mrb[47].mxu1  ;;  %v4573_v32 = vrot.slane %v4560_v34, %v10398_v41 }
 0xd4f   :  { %v8057_v38 = vadd.f32 %v8056_v7, %v4645_v47 }
 0xd50   :  { %5405 = vst [vmem:[%s10362_s15 + $0x4] sm:$0x3] %v4320_v2  ;;  %v5409_v22 = vmul.f32 -1.442695, %v8055_v63 }
 0xd51   :  { %v5410_v59 = vmul.f32 -1.442695, %v8057_v38 }
 0xd52   :  { %8209 = vpow2.f32 %v5409_v22 }
 0xd53   :  { %8211 = vpow2.f32 %v5410_v59 }
 0xd5c   :  { %v8210_v24 = vpop.eup %8209 }
 0xd5d   :  { %v4726_v31 = vadd.f32 1.0, %v8210_v24  ;;  %v8212_v29 = vpop.eup %8211 }
 0xd5e   :  { %v4727_v30 = vadd.f32 1.0, %v8212_v29 }
 0xd5f   :  { %8213 = vrcp.f32 %v4726_v31 }
 0xd69   :  { %v8214_v52 = vpop.eup %8213 }
 0xd6d   :  { %v4714_v49 = vpop.f32.mrb[30].mxu0 }
 0xd6e   :  { %v4715_v33 = vadd.f32 %v4714_v49, %v4573_v32  ;;  %v6647_v9 = vpop.f32.mrb[31].mxu0 }
 0xd70   :  { %v4732_v48 = vmul.f32 %v8214_v52, %v4715_v33 }
 0xd72   :  { %v4733_v26 = vadd.f32 %v4732_v48, %v4509_v36 }
 0xd74   :  { %8215 = vtanh.f32 %v4733_v26 }
 0xd75   :  { %8217 = vrcp.f32 %v4727_v30 }
 0xd7e   :  { %v8216_v23 = vpop.eup %8215 }
 0xd7f   :  { %v4735_v45 = vsub.f32 %v10096_v58, %v8216_v23  ;;  %v8218_v27 = vpop.eup %8217 }
 0xd81   :  { %v4736_v5 = vmul.f32 %v8218_v27, %v4735_v45 }
 0xd83   :  { %v10285_v6 = vadd.f32 %v8216_v23, %v4736_v5 }
 0xd85   :  { %6681 = vmatmul.mubr.f32.vlgmr.msra.gmra.mrb[32].mxu0 %v10285_v6  ;;  %5150 = vmatmul.mubr.f32.vlgmr.msra.gmra.mrb[50].mxu1 %v10285_v6 }
 0xd86   :  { %7962 = vmatpush3.bf16.msra.mxu0 %v9810_v11  ;;  %6734 = vmatprep.mubr.msk.f32.mxu0 %vm8310_vm1, %v10387_v0  ;;  %v5016_v11 = vpop.f32.mrb[52].mxu1 }
 0xd87   :  { %7963 = vmatprep.subr.bf16.mxu0 %v10388_v61 }
 0xd8a   :  { %7965 = vmatpush3.bf16.msra.mxu0 %v9827_v19  ;;  %v5068_v19 = vld [vmem:[%s10359_s12] sm:$0x7] }
 0xd8b   :  { %7966 = vmatprep.subr.bf16.mxu0 %v10388_v61  ;;  %v5081_v16 = vrot.slane %v5068_v19, %v10398_v41 }
 0xd8e   :  { %7968 = vmatpush3.bf16.msra.mxu0 %v9846_v53  ;;  %v4859_v53 = vld [vmem:[%s10358_s11] sm:$0x7] }
 0xd8f   :  { %7969 = vmatprep.subr.bf16.mxu0 %v10388_v61 }
 0xd92   :  { %7971 = vmatpush3.bf16.msra.mxu0 %v9858_v62  ;;  %v4864_v62 = vrot.slane %v4859_v53, %v10404_v55 }
 0xd93   :  { %7972 = vmatprep.subr.bf16.mxu0 %v10388_v61 }
 0xd96   :  { %7974 = vmatpush3.bf16.msra.mxu0 %v9868_v57  ;;  %v5073_v57 = vrot.slane %v5068_v19, %v10404_v55  ;;  %v5077_v55 = vrot.slane %v5068_v19, %v10405_v46 }
 0xd97   :  { %7975 = vmatprep.subr.bf16.mxu0 %v10388_v61 }
 0xd98   :  { %v8058_v58 = vadd.f32 %v5073_v57, %v4864_v62 }
 0xd9a   :  { %7977 = vmatpush3.bf16.msra.mxu0 %v10126_v17  ;;  %v5411_v17 = vld [vmem:[%s10361_s14] ss:$0 sm:$0xff] }
 0xd9b   :  { %7978 = vmatprep.subr.bf16.mxu0 %v10388_v61 }
 0xd9e   :  { %7980 = vmatpush3.bf16.msra.mxu0 %v10136_v8 }
 0xd9f   :  { %7981 = vmatprep.subr.bf16.mxu0 %v10388_v61 }
 0xda2   :  { %7983 = vmatpush3.bf16.msra.mxu0 %v10146_v14 }
 0xda3   :  { %7984 = vmatprep.subr.bf16.mxu0 %v10388_v61 }
 0xda5   :  { %6735 = vmatmul.mubr.f32.vlgmr.msra.gmra.mrb[34].mxu0 %v10285_v6 }
 0xda6   :  { %7986 = vmatpush3.bf16.msra.mxu0 %v10177_v10  ;;  %6769 = vmatprep.mubr.msk.f32.mxu0 %vm8310_vm1, %v10387_v0  ;;  %v6701_v0 = vpop.f32.mrb[53].mxu1 }
 0xda7   :  { %7987 = vmatprep.subr.bf16.mxu0 %v10388_v61 }
 0xdaa   :  { %7989 = vmatpush3.bf16.msra.mxu0 %v10184_v51 }
 0xdab   :  { %7990 = vmatprep.subr.bf16.mxu0 %v10388_v61 }
 0xdae   :  { %7992 = vmatpush3.bf16.msra.mxu0 %v10201_v18 }
 0xdaf   :  { %7993 = vmatprep.subr.bf16.mxu0 %v10388_v61 }
 0xdb2   :  { %7995 = vmatpush3.bf16.msra.mxu0 %v10213_v25  ;;  %v4868_v25 = vrot.slane %v4859_v53, %v10405_v46 }
 0xdb3   :  { %7996 = vmatprep.subr.bf16.mxu0 %v10388_v61 }
 0xdb6   :  { %7998 = vmatpush3.bf16.msra.mxu0 %v10225_v21  ;;  %v8060_v21 = vadd.f32 %v5077_v55, %v4868_v25 }
 0xdb7   :  { %7999 = vmatprep.subr.bf16.mxu0 %v10388_v61 }
 0xdba   :  { %8001 = vmatpush3.bf16.msra.mxu0 %v10235_v35 }
 0xdbb   :  { %8002 = vmatprep.subr.bf16.mxu0 %v10388_v61 }
 0xdbe   :  { %8004 = vmatpush3.bf16.msra.mxu0 %v10247_v42  ;;  %v4872_v42 = vrot.slane %v4859_v53, %v10398_v41 }
 0xdbf   :  { %8005 = vmatprep.subr.bf16.mxu0 %v10388_v61 }
 0xdc0   :  { %v5017_v12 = vadd.f32 %v5016_v11, %v4872_v42 }
 0xdc2   :  { %8007 = vmatpush3.bf16.msra.mxu0 %v10259_v44 }
 0xe58   :  { %v4827_v61 = vpop.f32.mrb[32].mxu0  ;;  %v5151_v8 = vpop.f32.mrb[50].mxu1 }
 0xe59   :  { %v4828_v14 = vadd.f32 %v5411_v17, %v4827_v61  ;;  %v8059_v39 = vadd.f32 %v8058_v58, %v5151_v8  ;;  %v6682_v10 = vpop.f32.mrb[33].mxu0  ;;  %v5153_v51 = vpop.f32.mrb[51].mxu1 }
 0xe5a   :  { %v8061_v54 = vadd.f32 %v8060_v21, %v5153_v51 }
 0xe5b   :  { %5412 = vst [vmem:[%s10362_s15 + $0x6] sm:$0x3] %v4828_v14  ;;  %v5416_v18 = vmul.f32 -1.442695, %v8059_v39 }
 0xe5c   :  { %v5417_v35 = vmul.f32 -1.442695, %v8061_v54 }
 0xe5d   :  { %8219 = vpow2.f32 %v5416_v18 }
 0xe5e   :  { %8221 = vpow2.f32 %v5417_v35 }
 0xe67   :  { %v8220_v13 = vpop.eup %8219 }
 0xe68   :  { %v5234_v1 = vadd.f32 1.0, %v8220_v13  ;;  %v8222_v3 = vpop.eup %8221 }
 0xe69   :  { %v5235_v15 = vadd.f32 1.0, %v8222_v3 }
 0xe6a   :  { %8223 = vrcp.f32 %v5234_v1 }
 0xe74   :  { %v8224_v37 = vpop.eup %8223 }
 0xe78   :  { %v5222_v50 = vpop.f32.mrb[34].mxu0 }
 0xe79   :  { %v5223_v44 = vadd.f32 %v5222_v50, %v5081_v16  ;;  %v6736_v34 = vpop.f32.mrb[35].mxu0 }
 0xe7b   :  { %v5240_v20 = vmul.f32 %v8224_v37, %v5223_v44 }
 0xe7d   :  { %v5241_v46 = vadd.f32 %v5240_v20, %v5017_v12 }
 0xe7f   :  { %8225 = vtanh.f32 %v5241_v46 }
 0xe80   :  { %8227 = vrcp.f32 %v5235_v15 }
 0xe89   :  { %v8226_v28 = vpop.eup %8225 }
 0xe8a   :  { %v5243_v60 = vsub.f32 %v10285_v6, %v8226_v28  ;;  %v8228_v2 = vpop.eup %8227 }
 0xe8c   :  { %v5244_v63 = vmul.f32 %v8228_v2, %v5243_v60 }
 0xe8e   :  { %v5245_v56 = vadd.f32 %v8226_v28, %v5244_v63 }
 0xe90   :  { %6770 = vmatmul.mubr.f32.vlgmr.msra.gmra.mrb[36].mxu0 %v5245_v56 }
 0xf63   :  { %v5335_v47 = vpop.f32.mrb[36].mxu0 }
 0xf64   :  { %v5336_v41 = vadd.f32 %v5411_v17, %v5335_v47  ;;  %v6771_v22 = vpop.f32.mrb[37].mxu0 }
 0xf66   :  { %5419 = vst [vmem:[%s10362_s15 + $0x8] sm:$0x3] %v5336_v41 }
 0xf67   :  { %5345 = vsyncpa [#allocation3], 1 }
 0xf68   :  { %5346 = vsyncpa [#allocation5], 1 }

</bundles_post_ra>
